<compile_context>
chip_gen: v6e
topology: v6e:2x2x1
jax: 0.10.0
libtpu: 0.0.40
codegen_flags: <defaults>
</compile_context>

<pallas_src>
import functools

import jax
import jax.numpy as jnp
from jax import lax
from jax.experimental import pallas as pl
from jax.experimental.pallas import tpu as pltpu


# ------------------------------------------------------------------ kernel ---
def _resblock_kernel(x_ref, w1_ref, b1_ref, w2_ref, b2_ref, wsc_ref, bsc_ref,
                     out_ref, pool_ref, *, H, W, downsample, learnable_sc):
    HW = H * W
    x = x_ref[0]                                       # (HW, Cin_p) float32

    def shift_rows(a, s):
        # b[i] = a[i + s], zero-filled where i + s is out of range (s static).
        if s == 0:
            return a
        n, c = a.shape
        z = jnp.zeros((abs(s), c), a.dtype)
        if s > 0:
            return jnp.concatenate([a[s:], z], axis=0)
        return jnp.concatenate([z, a[:n + s]], axis=0)

    def conv3x3(a, w_ref, b_ref):
        # a: (HW, C) f32, already activated.  w_ref: (9*C, Co_p) bf16 (im2col).
        C = a.shape[-1]
        # Per-pixel W coordinate (output pixel), used to mask the W-border wrap.
        ww = jnp.broadcast_to(lax.broadcasted_iota(jnp.int32, (W, C), 0),
                              (H, W, C)).reshape(HW, C)
        # dx = -1, 0, +1 column shifts == +-1 row shifts of the flattened image
        # (the only sublane-unaligned data movement in the kernel).
        rows = [shift_rows(a, dx - 1) for dx in range(3)]
        taps = []
        for dy in range(3):
            for dx in range(3):
                # +-W row shift: a whole number of sublane tiles (W % 8 == 0),
                # and its zero fill also covers the H-border (no H mask needed).
                t = shift_rows(rows[dx], (dy - 1) * W)
                if dx != 1:                            # mask W-border wraparound
                    w_in = ww + (dx - 1)
                    t = jnp.where((w_in >= 0) & (w_in <= W - 1), t, 0.0)
                taps.append(t)
        col = jnp.concatenate(taps, axis=-1).astype(jnp.bfloat16)   # (HW, 9*C)
        y = jnp.dot(col, w_ref[...], preferred_element_type=jnp.float32)
        return y + b_ref[...]                          # (HW, Co_p) f32

    # residual branch: conv2(ReLU(conv1(ReLU(x))))
    y = conv3x3(jnp.maximum(x, 0.0), w1_ref, b1_ref)
    y = conv3x3(jnp.maximum(y, 0.0), w2_ref, b2_ref)

    # shortcut branch
    if learnable_sc:
        sc = jnp.dot(x.astype(jnp.bfloat16), wsc_ref[...],
                     preferred_element_type=jnp.float32) + bsc_ref[...]
    else:
        sc = x                                         # identity (Cin == Cout)

    z = y + sc                                         # (HW, Co_p) f32

    if downsample:                                     # avg_pool2d(2), linear ->
        Cp = z.shape[-1]                               # pool the summed result
        Ho, Wo = H // 2, W // 2
        pool_ref[...] = z.reshape(H, W, Cp)
        p = (pool_ref[pl.ds(0, Ho, stride=2), pl.ds(0, Wo, stride=2), :]
             + pool_ref[pl.ds(0, Ho, stride=2), pl.ds(1, Wo, stride=2), :]
             + pool_ref[pl.ds(1, Ho, stride=2), pl.ds(0, Wo, stride=2), :]
             + pool_ref[pl.ds(1, Ho, stride=2), pl.ds(1, Wo, stride=2), :]
             ) * 0.25
        out_ref[0] = p.reshape(Ho * Wo, Cp).astype(out_ref.dtype)
    else:
        out_ref[0] = z.astype(out_ref.dtype)


# ------------------------------------------------------------------ wrapper ---
def _round_up(n, m):
    return ((n + m - 1) // m) * m


def _pad_axis(a, axis, target):
    pad = target - a.shape[axis]
    if pad == 0:
        return a
    widths = [(0, 0)] * a.ndim
    widths[axis] = (0, pad)
    return jnp.pad(a, widths)


def _pack_conv3x3_weight(w_hwio, cin_p, cout_p):
    # (3, 3, Cin, Cout) -> (9 * cin_p, cout_p) bf16, tap order (dy, dx) row-major.
    kh, kw, _, _ = w_hwio.shape
    w = _pad_axis(_pad_axis(w_hwio.astype(jnp.float32), 2, cin_p), 3, cout_p)
    return w.reshape(kh * kw * cin_p, cout_p).astype(jnp.bfloat16)


def resblock_pallas(x_nchw, params, *, downsample):
    N, Cin, H, W = x_nchw.shape
    Cout = params["w1"].shape[-1]
    learnable_sc = (Cin != Cout) or downsample          # derived, as in the module
    if downsample:
        assert H % 2 == 0 and W % 2 == 0
    Ho, Wo = (H // 2, W // 2) if downsample else (H, W)
    cin_p = _round_up(Cin, 128)
    cout_p = _round_up(Cout, 128)

    # NCHW -> (N, H*W, cin_p): channels on the (dense, 128-multiple) lane axis.
    x = jnp.transpose(x_nchw, (0, 2, 3, 1)).astype(jnp.float32)
    x = _pad_axis(x, 3, cin_p).reshape(N, H * W, cin_p)

    w1 = _pack_conv3x3_weight(params["w1"], cin_p, cout_p)            # (9*cin_p, cout_p)
    w2 = _pack_conv3x3_weight(params["w2"], cout_p, cout_p)           # (9*cout_p, cout_p)
    b1 = _pad_axis(params["b1"].astype(jnp.float32), 1, cout_p)       # (1, cout_p)
    b2 = _pad_axis(params["b2"].astype(jnp.float32), 1, cout_p)
    wsc = params.get("wsc", jnp.zeros((Cin, Cout), jnp.float32))
    bsc = params.get("bsc", jnp.zeros((1, Cout), jnp.float32))
    wsc = _pad_axis(_pad_axis(wsc.astype(jnp.float32), 0, cin_p),
                    1, cout_p).astype(jnp.bfloat16)                   # (cin_p, cout_p)
    bsc = _pad_axis(bsc.astype(jnp.float32), 1, cout_p)               # (1, cout_p)

    kernel = functools.partial(_resblock_kernel, H=H, W=W,
                               downsample=downsample, learnable_sc=learnable_sc)

    grid_spec = pltpu.PrefetchScalarGridSpec(
        num_scalar_prefetch=0,
        grid=(N,),
        in_specs=[
            pl.BlockSpec((1, H * W, cin_p), lambda n: (n, 0, 0)),     # x (flat, lane-dense)
            pl.BlockSpec((9 * cin_p, cout_p), lambda n: (0, 0)),      # w1 (im2col layout)
            pl.BlockSpec((1, cout_p), lambda n: (0, 0)),              # b1
            pl.BlockSpec((9 * cout_p, cout_p), lambda n: (0, 0)),     # w2 (im2col layout)
            pl.BlockSpec((1, cout_p), lambda n: (0, 0)),              # b2
            pl.BlockSpec((cin_p, cout_p), lambda n: (0, 0)),          # wsc (1x1 conv)
            pl.BlockSpec((1, cout_p), lambda n: (0, 0)),              # bsc
        ],
        out_specs=pl.BlockSpec((1, Ho * Wo, cout_p), lambda n: (n, 0, 0)),
        scratch_shapes=[pltpu.VMEM((H, W, cout_p), jnp.float32)],     # pooling buffer
    )

    out = pl.pallas_call(
        kernel,
        out_shape=jax.ShapeDtypeStruct((N, Ho * Wo, cout_p), jnp.float32),
        grid_spec=grid_spec,
        compiler_params=pltpu.CompilerParams(
            dimension_semantics=("parallel",)),        # v7x: 2 TCs split the batch
    )(x, w1, b1, w2, b2, wsc, bsc)

    out = out[:, :, :Cout].reshape(N, Ho, Wo, Cout)
    return jnp.transpose(out, (0, 3, 1, 2))            # back to NCHW


# ------------------------------------------------------- params / reference ---
def _spectral_normalize(w_oihw, key, eps=1e-4):
    """One power iteration, matching torch spectral_norm(eps=1e-4) semantics."""
    out_ch = w_oihw.shape[0]
    wm = w_oihw.reshape(out_ch, -1)
    u = jax.random.normal(key, (out_ch,), dtype=jnp.float32)
    u = u / jnp.maximum(jnp.linalg.norm(u), eps)
    v = wm.T @ u
    v = v / jnp.maximum(jnp.linalg.norm(v), eps)
    u = wm @ v
    u = u / jnp.maximum(jnp.linalg.norm(u), eps)
    sigma = u @ (wm @ v)
    return w_oihw / sigma


def make_params(key, in_ch, out_ch, ksize=3):
    """Deterministic synthetic parameters (spectral-normalized)."""
    ks = jax.random.split(key, 8)
    w1 = 0.2 * jax.random.normal(ks[0], (out_ch, in_ch, ksize, ksize), jnp.float32)
    w2 = 0.2 * jax.random.normal(ks[1], (out_ch, out_ch, ksize, ksize), jnp.float32)
    wsc = 0.2 * jax.random.normal(ks[2], (out_ch, in_ch, 1, 1), jnp.float32)
    b1 = 0.1 * jax.random.normal(ks[3], (out_ch,), jnp.float32)
    b2 = 0.1 * jax.random.normal(ks[4], (out_ch,), jnp.float32)
    bsc = 0.1 * jax.random.normal(ks[5], (out_ch,), jnp.float32)

    w1 = _spectral_normalize(w1, ks[6])
    w2 = _spectral_normalize(w2, ks[7])
    wsc = _spectral_normalize(wsc, ks[6])

    return {
        # OIHW -> HWIO
        "w1": jnp.transpose(w1, (2, 3, 1, 0)),
        "w2": jnp.transpose(w2, (2, 3, 1, 0)),
        "wsc": wsc[:, :, 0, 0].T,                 # (Cin, Cout)
        "b1": b1.reshape(1, out_ch),
        "b2": b2.reshape(1, out_ch),
        "bsc": bsc.reshape(1, out_ch),
    }


def resblock_reference(x_nchw, params, *, downsample, emulate_bf16=False):
    """Pure-JAX reference (XLA convs, f32-accurate).  With emulate_bf16=True the
    conv inputs/weights are rounded to bf16 first, matching the kernel's MXU
    operand precision so the comparison can be tight."""
    Cin = x_nchw.shape[1]
    Cout = params["w1"].shape[-1]
    learnable_sc = (Cin != Cout) or downsample

    if emulate_bf16:
        cast = lambda a: a.astype(jnp.bfloat16).astype(jnp.float32)
    else:
        cast = lambda a: a

    def conv(x, w_hwio, b, pad):
        y = lax.conv_general_dilated(
            cast(x), cast(w_hwio), window_strides=(1, 1),
            padding=[(pad, pad), (pad, pad)],
            dimension_numbers=("NHWC", "HWIO", "NHWC"),
            precision=lax.Precision.HIGHEST)
        return y + b.reshape(1, 1, 1, -1)

    def avg_pool2(x):
        n, h, w, c = x.shape
        return x.reshape(n, h // 2, 2, w // 2, 2, c).mean(axis=(2, 4))

    x = jnp.transpose(x_nchw, (0, 2, 3, 1)).astype(jnp.float32)
    y = conv(jax.nn.relu(x), params["w1"], params["b1"], 1)
    y = conv(jax.nn.relu(y), params["w2"], params["b2"], 1)
    if downsample:
        y = avg_pool2(y)
    if learnable_sc:
        sc = conv(x, params["wsc"][None, None], params["bsc"], 0)
        if downsample:
            sc = avg_pool2(sc)
    else:
        sc = x
    return jnp.transpose(y + sc, (0, 3, 1, 2))


# --------------------------------------------------------------------- main ---
if __name__ == "__main__":
    key = jax.random.PRNGKey(0)
    k_x, k_p = jax.random.split(key)

    N, in_ch, out_ch, H, W = 2, 4, 8, 16, 16
    downsample = True

    x = jax.random.normal(k_x, (N, in_ch, H, W), jnp.float32)   # NCHW like PyTorch
    params = make_params(k_p, in_ch, out_ch)

    out = resblock_pallas(x, params, downsample=downsample)
    out = jax.block_until_ready(out)
    assert out.shape == (N, out_ch, H // 2, W // 2), out.shape

    # Tight check against a reference with bf16-rounded conv operands (should
    # agree to f32-accumulation noise), plus a looser check against the pure
    # f32 reference (slack accounts only for the bf16 MXU operands).
    ref_bf16 = resblock_reference(x, params, downsample=downsample,
                                  emulate_bf16=True)
    ref_f32 = resblock_reference(x, params, downsample=downsample,
                                 emulate_bf16=False)
    assert jnp.allclose(out, ref_bf16, atol=1e-3, rtol=1e-3), \
        float(jnp.max(jnp.abs(out - ref_bf16)))
    assert jnp.allclose(out, ref_f32, atol=2e-2, rtol=2e-2), \
        float(jnp.max(jnp.abs(out - ref_f32)))

    print("KERNEL_OK")
</pallas_src>

<mosaic_0001>
module attributes {stable_mosaic.version = 11 : i64} {
  func.func @_resblock_kernel(%arg0: i32, %arg1: memref<1x256x128xf32, #tpu.memory_space<vmem>>, %arg2: memref<1152x128xbf16, #tpu.memory_space<vmem>>, %arg3: memref<1x128xf32, #tpu.memory_space<vmem>>, %arg4: memref<1152x128xbf16, #tpu.memory_space<vmem>>, %arg5: memref<1x128xf32, #tpu.memory_space<vmem>>, %arg6: memref<128x128xbf16, #tpu.memory_space<vmem>>, %arg7: memref<1x128xf32, #tpu.memory_space<vmem>>, %arg8: memref<1x64x128xf32, #tpu.memory_space<vmem>>, %arg9: memref<16x16x128xf32, #tpu.memory_space<vmem>>) attributes {dimension_semantics = [#tpu.dimension_semantics<parallel>], iteration_bounds = array<i64: 2>, scalar_prefetch = 0 : i64, scratch_operands = 1 : i64, tpu.core_type = #tpu.core_type<tc>, window_params = [{transform_indices = @transform_0, window_bounds = array<i64: 1, 256, 128>}, {pipeline_mode = #tpu.pipeline_mode<synchronous>, transform_indices = @transform_1, window_bounds = array<i64: 1152, 128>}, {pipeline_mode = #tpu.pipeline_mode<synchronous>, transform_indices = @transform_2, window_bounds = array<i64: 1, 128>}, {pipeline_mode = #tpu.pipeline_mode<synchronous>, transform_indices = @transform_3, window_bounds = array<i64: 1152, 128>}, {pipeline_mode = #tpu.pipeline_mode<synchronous>, transform_indices = @transform_4, window_bounds = array<i64: 1, 128>}, {pipeline_mode = #tpu.pipeline_mode<synchronous>, transform_indices = @transform_5, window_bounds = array<i64: 128, 128>}, {pipeline_mode = #tpu.pipeline_mode<synchronous>, transform_indices = @transform_6, window_bounds = array<i64: 1, 128>}, {transform_indices = @transform_7, window_bounds = array<i64: 1, 64, 128>}]} {
    %c0 = arith.constant 0 : index
    %c0_0 = arith.constant 0 : index
    %c0_1 = arith.constant 0 : index
    %0 = vector.load %arg1[%c0, %c0_0, %c0_1] : memref<1x256x128xf32, #tpu.memory_space<vmem>>, vector<1x256x128xf32>
    %1 = vector.shape_cast %0 : vector<1x256x128xf32> to vector<256x128xf32>
    %cst = arith.constant 0.000000e+00 : f32
    %2 = vector.broadcast %cst : f32 to vector<256x128xf32>
    %3 = arith.maximumf %1, %2 : vector<256x128xf32>
    %4 = tpu.iota {dimensions = array<i32: 0>} : vector<16x128xi32>
    %5 = vector.shape_cast %4 : vector<16x128xi32> to vector<1x16x128xi32>
    %6 = vector.broadcast %5 : vector<1x16x128xi32> to vector<16x16x128xi32>
    %7 = vector.shape_cast %6 : vector<16x16x128xi32> to vector<256x128xi32>
    %cst_2 = arith.constant 0.000000e+00 : f32
    %8 = vector.broadcast %cst_2 : f32 to vector<1x128xf32>
    %9 = vector.extract_strided_slice %3 {offsets = [0, 0], sizes = [255, 128], strides = [1, 1]} : vector<256x128xf32> to vector<255x128xf32>
    %10 = tpu.concatenate %8, %9 in 0 : vector<1x128xf32>, vector<255x128xf32> -> vector<256x128xf32>
    %cst_3 = arith.constant 0.000000e+00 : f32
    %11 = vector.broadcast %cst_3 : f32 to vector<1x128xf32>
    %12 = vector.extract_strided_slice %3 {offsets = [1, 0], sizes = [255, 128], strides = [1, 1]} : vector<256x128xf32> to vector<255x128xf32>
    %13 = tpu.concatenate %12, %11 in 0 : vector<255x128xf32>, vector<1x128xf32> -> vector<256x128xf32>
    %cst_4 = arith.constant 0.000000e+00 : f32
    %14 = vector.broadcast %cst_4 : f32 to vector<16x128xf32>
    %15 = vector.extract_strided_slice %10 {offsets = [0, 0], sizes = [240, 128], strides = [1, 1]} : vector<256x128xf32> to vector<240x128xf32>
    %16 = tpu.concatenate %14, %15 in 0 : vector<16x128xf32>, vector<240x128xf32> -> vector<256x128xf32>
    %c-1_i32 = arith.constant -1 : i32
    %17 = vector.broadcast %c-1_i32 : i32 to vector<256x128xi32>
    %18 = arith.addi %7, %17 : vector<256x128xi32>
    %c0_i32 = arith.constant 0 : i32
    %19 = vector.broadcast %c0_i32 : i32 to vector<256x128xi32>
    %20 = arith.cmpi sge, %18, %19 : vector<256x128xi32>
    %c15_i32 = arith.constant 15 : i32
    %21 = vector.broadcast %c15_i32 : i32 to vector<256x128xi32>
    %22 = arith.cmpi sle, %18, %21 : vector<256x128xi32>
    %23 = arith.andi %20, %22 : vector<256x128xi1>
    %cst_5 = arith.constant 0.000000e+00 : f32
    %24 = vector.broadcast %cst_5 : f32 to vector<256x128xf32>
    %25 = arith.select %23, %16, %24 : vector<256x128xi1>, vector<256x128xf32>
    %cst_6 = arith.constant 0.000000e+00 : f32
    %26 = vector.broadcast %cst_6 : f32 to vector<16x128xf32>
    %27 = vector.extract_strided_slice %3 {offsets = [0, 0], sizes = [240, 128], strides = [1, 1]} : vector<256x128xf32> to vector<240x128xf32>
    %28 = tpu.concatenate %26, %27 in 0 : vector<16x128xf32>, vector<240x128xf32> -> vector<256x128xf32>
    %cst_7 = arith.constant 0.000000e+00 : f32
    %29 = vector.broadcast %cst_7 : f32 to vector<16x128xf32>
    %30 = vector.extract_strided_slice %13 {offsets = [0, 0], sizes = [240, 128], strides = [1, 1]} : vector<256x128xf32> to vector<240x128xf32>
    %31 = tpu.concatenate %29, %30 in 0 : vector<16x128xf32>, vector<240x128xf32> -> vector<256x128xf32>
    %c1_i32 = arith.constant 1 : i32
    %32 = vector.broadcast %c1_i32 : i32 to vector<256x128xi32>
    %33 = arith.addi %7, %32 : vector<256x128xi32>
    %c0_i32_8 = arith.constant 0 : i32
    %34 = vector.broadcast %c0_i32_8 : i32 to vector<256x128xi32>
    %35 = arith.cmpi sge, %33, %34 : vector<256x128xi32>
    %c15_i32_9 = arith.constant 15 : i32
    %36 = vector.broadcast %c15_i32_9 : i32 to vector<256x128xi32>
    %37 = arith.cmpi sle, %33, %36 : vector<256x128xi32>
    %38 = arith.andi %35, %37 : vector<256x128xi1>
    %cst_10 = arith.constant 0.000000e+00 : f32
    %39 = vector.broadcast %cst_10 : f32 to vector<256x128xf32>
    %40 = arith.select %38, %31, %39 : vector<256x128xi1>, vector<256x128xf32>
    %c-1_i32_11 = arith.constant -1 : i32
    %41 = vector.broadcast %c-1_i32_11 : i32 to vector<256x128xi32>
    %42 = arith.addi %7, %41 : vector<256x128xi32>
    %c0_i32_12 = arith.constant 0 : i32
    %43 = vector.broadcast %c0_i32_12 : i32 to vector<256x128xi32>
    %44 = arith.cmpi sge, %42, %43 : vector<256x128xi32>
    %c15_i32_13 = arith.constant 15 : i32
    %45 = vector.broadcast %c15_i32_13 : i32 to vector<256x128xi32>
    %46 = arith.cmpi sle, %42, %45 : vector<256x128xi32>
    %47 = arith.andi %44, %46 : vector<256x128xi1>
    %cst_14 = arith.constant 0.000000e+00 : f32
    %48 = vector.broadcast %cst_14 : f32 to vector<256x128xf32>
    %49 = arith.select %47, %10, %48 : vector<256x128xi1>, vector<256x128xf32>
    %c1_i32_15 = arith.constant 1 : i32
    %50 = vector.broadcast %c1_i32_15 : i32 to vector<256x128xi32>
    %51 = arith.addi %7, %50 : vector<256x128xi32>
    %c0_i32_16 = arith.constant 0 : i32
    %52 = vector.broadcast %c0_i32_16 : i32 to vector<256x128xi32>
    %53 = arith.cmpi sge, %51, %52 : vector<256x128xi32>
    %c15_i32_17 = arith.constant 15 : i32
    %54 = vector.broadcast %c15_i32_17 : i32 to vector<256x128xi32>
    %55 = arith.cmpi sle, %51, %54 : vector<256x128xi32>
    %56 = arith.andi %53, %55 : vector<256x128xi1>
    %cst_18 = arith.constant 0.000000e+00 : f32
    %57 = vector.broadcast %cst_18 : f32 to vector<256x128xf32>
    %58 = arith.select %56, %13, %57 : vector<256x128xi1>, vector<256x128xf32>
    %cst_19 = arith.constant 0.000000e+00 : f32
    %59 = vector.broadcast %cst_19 : f32 to vector<16x128xf32>
    %60 = vector.extract_strided_slice %10 {offsets = [16, 0], sizes = [240, 128], strides = [1, 1]} : vector<256x128xf32> to vector<240x128xf32>
    %61 = tpu.concatenate %60, %59 in 0 : vector<240x128xf32>, vector<16x128xf32> -> vector<256x128xf32>
    %c-1_i32_20 = arith.constant -1 : i32
    %62 = vector.broadcast %c-1_i32_20 : i32 to vector<256x128xi32>
    %63 = arith.addi %7, %62 : vector<256x128xi32>
    %c0_i32_21 = arith.constant 0 : i32
    %64 = vector.broadcast %c0_i32_21 : i32 to vector<256x128xi32>
    %65 = arith.cmpi sge, %63, %64 : vector<256x128xi32>
    %c15_i32_22 = arith.constant 15 : i32
    %66 = vector.broadcast %c15_i32_22 : i32 to vector<256x128xi32>
    %67 = arith.cmpi sle, %63, %66 : vector<256x128xi32>
    %68 = arith.andi %65, %67 : vector<256x128xi1>
    %cst_23 = arith.constant 0.000000e+00 : f32
    %69 = vector.broadcast %cst_23 : f32 to vector<256x128xf32>
    %70 = arith.select %68, %61, %69 : vector<256x128xi1>, vector<256x128xf32>
    %cst_24 = arith.constant 0.000000e+00 : f32
    %71 = vector.broadcast %cst_24 : f32 to vector<16x128xf32>
    %72 = vector.extract_strided_slice %3 {offsets = [16, 0], sizes = [240, 128], strides = [1, 1]} : vector<256x128xf32> to vector<240x128xf32>
    %73 = tpu.concatenate %72, %71 in 0 : vector<240x128xf32>, vector<16x128xf32> -> vector<256x128xf32>
    %cst_25 = arith.constant 0.000000e+00 : f32
    %74 = vector.broadcast %cst_25 : f32 to vector<16x128xf32>
    %75 = vector.extract_strided_slice %13 {offsets = [16, 0], sizes = [240, 128], strides = [1, 1]} : vector<256x128xf32> to vector<240x128xf32>
    %76 = tpu.concatenate %75, %74 in 0 : vector<240x128xf32>, vector<16x128xf32> -> vector<256x128xf32>
    %c1_i32_26 = arith.constant 1 : i32
    %77 = vector.broadcast %c1_i32_26 : i32 to vector<256x128xi32>
    %78 = arith.addi %7, %77 : vector<256x128xi32>
    %c0_i32_27 = arith.constant 0 : i32
    %79 = vector.broadcast %c0_i32_27 : i32 to vector<256x128xi32>
    %80 = arith.cmpi sge, %78, %79 : vector<256x128xi32>
    %c15_i32_28 = arith.constant 15 : i32
    %81 = vector.broadcast %c15_i32_28 : i32 to vector<256x128xi32>
    %82 = arith.cmpi sle, %78, %81 : vector<256x128xi32>
    %83 = arith.andi %80, %82 : vector<256x128xi1>
    %cst_29 = arith.constant 0.000000e+00 : f32
    %84 = vector.broadcast %cst_29 : f32 to vector<256x128xf32>
    %85 = arith.select %83, %76, %84 : vector<256x128xi1>, vector<256x128xf32>
    %86 = tpu.concatenate %25, %28, %40, %49, %3, %58, %70, %73, %85 in 1 : vector<256x128xf32>, vector<256x128xf32>, vector<256x128xf32>, vector<256x128xf32>, vector<256x128xf32>, vector<256x128xf32>, vector<256x128xf32>, vector<256x128xf32>, vector<256x128xf32> -> vector<256x1152xf32>
    %87 = arith.truncf %86 : vector<256x1152xf32> to vector<256x1152xbf16>
    %c0_30 = arith.constant 0 : index
    %c0_31 = arith.constant 0 : index
    %88 = vector.load %arg2[%c0_30, %c0_31] : memref<1152x128xbf16, #tpu.memory_space<vmem>>, vector<1152x128xbf16>
    %cst_32 = arith.constant dense<0.000000e+00> : vector<256x128xf32>
    %89 = tpu.matmul %87, %88, %cst_32 {dimension_numbers = #tpu.dot_dimension_numbers<[1], [0], [0], [1], [0, 0, 1, 1], [], []>} : vector<256x1152xbf16>, vector<1152x128xbf16>, vector<256x128xf32> -> vector<256x128xf32>
    %c0_33 = arith.constant 0 : index
    %c0_34 = arith.constant 0 : index
    %90 = vector.load %arg3[%c0_33, %c0_34] : memref<1x128xf32, #tpu.memory_space<vmem>>, vector<1x128xf32>
    %91 = vector.broadcast %90 : vector<1x128xf32> to vector<256x128xf32>
    %92 = arith.addf %89, %91 : vector<256x128xf32>
    %cst_35 = arith.constant 0.000000e+00 : f32
    %93 = vector.broadcast %cst_35 : f32 to vector<256x128xf32>
    %94 = arith.maximumf %92, %93 : vector<256x128xf32>
    %95 = tpu.iota {dimensions = array<i32: 0>} : vector<16x128xi32>
    %96 = vector.shape_cast %95 : vector<16x128xi32> to vector<1x16x128xi32>
    %97 = vector.broadcast %96 : vector<1x16x128xi32> to vector<16x16x128xi32>
    %98 = vector.shape_cast %97 : vector<16x16x128xi32> to vector<256x128xi32>
    %cst_36 = arith.constant 0.000000e+00 : f32
    %99 = vector.broadcast %cst_36 : f32 to vector<1x128xf32>
    %100 = vector.extract_strided_slice %94 {offsets = [0, 0], sizes = [255, 128], strides = [1, 1]} : vector<256x128xf32> to vector<255x128xf32>
    %101 = tpu.concatenate %99, %100 in 0 : vector<1x128xf32>, vector<255x128xf32> -> vector<256x128xf32>
    %cst_37 = arith.constant 0.000000e+00 : f32
    %102 = vector.broadcast %cst_37 : f32 to vector<1x128xf32>
    %103 = vector.extract_strided_slice %94 {offsets = [1, 0], sizes = [255, 128], strides = [1, 1]} : vector<256x128xf32> to vector<255x128xf32>
    %104 = tpu.concatenate %103, %102 in 0 : vector<255x128xf32>, vector<1x128xf32> -> vector<256x128xf32>
    %cst_38 = arith.constant 0.000000e+00 : f32
    %105 = vector.broadcast %cst_38 : f32 to vector<16x128xf32>
    %106 = vector.extract_strided_slice %101 {offsets = [0, 0], sizes = [240, 128], strides = [1, 1]} : vector<256x128xf32> to vector<240x128xf32>
    %107 = tpu.concatenate %105, %106 in 0 : vector<16x128xf32>, vector<240x128xf32> -> vector<256x128xf32>
    %c-1_i32_39 = arith.constant -1 : i32
    %108 = vector.broadcast %c-1_i32_39 : i32 to vector<256x128xi32>
    %109 = arith.addi %98, %108 : vector<256x128xi32>
    %c0_i32_40 = arith.constant 0 : i32
    %110 = vector.broadcast %c0_i32_40 : i32 to vector<256x128xi32>
    %111 = arith.cmpi sge, %109, %110 : vector<256x128xi32>
    %c15_i32_41 = arith.constant 15 : i32
    %112 = vector.broadcast %c15_i32_41 : i32 to vector<256x128xi32>
    %113 = arith.cmpi sle, %109, %112 : vector<256x128xi32>
    %114 = arith.andi %111, %113 : vector<256x128xi1>
    %cst_42 = arith.constant 0.000000e+00 : f32
    %115 = vector.broadcast %cst_42 : f32 to vector<256x128xf32>
    %116 = arith.select %114, %107, %115 : vector<256x128xi1>, vector<256x128xf32>
    %cst_43 = arith.constant 0.000000e+00 : f32
    %117 = vector.broadcast %cst_43 : f32 to vector<16x128xf32>
    %118 = vector.extract_strided_slice %94 {offsets = [0, 0], sizes = [240, 128], strides = [1, 1]} : vector<256x128xf32> to vector<240x128xf32>
    %119 = tpu.concatenate %117, %118 in 0 : vector<16x128xf32>, vector<240x128xf32> -> vector<256x128xf32>
    %cst_44 = arith.constant 0.000000e+00 : f32
    %120 = vector.broadcast %cst_44 : f32 to vector<16x128xf32>
    %121 = vector.extract_strided_slice %104 {offsets = [0, 0], sizes = [240, 128], strides = [1, 1]} : vector<256x128xf32> to vector<240x128xf32>
    %122 = tpu.concatenate %120, %121 in 0 : vector<16x128xf32>, vector<240x128xf32> -> vector<256x128xf32>
    %c1_i32_45 = arith.constant 1 : i32
    %123 = vector.broadcast %c1_i32_45 : i32 to vector<256x128xi32>
    %124 = arith.addi %98, %123 : vector<256x128xi32>
    %c0_i32_46 = arith.constant 0 : i32
    %125 = vector.broadcast %c0_i32_46 : i32 to vector<256x128xi32>
    %126 = arith.cmpi sge, %124, %125 : vector<256x128xi32>
    %c15_i32_47 = arith.constant 15 : i32
    %127 = vector.broadcast %c15_i32_47 : i32 to vector<256x128xi32>
    %128 = arith.cmpi sle, %124, %127 : vector<256x128xi32>
    %129 = arith.andi %126, %128 : vector<256x128xi1>
    %cst_48 = arith.constant 0.000000e+00 : f32
    %130 = vector.broadcast %cst_48 : f32 to vector<256x128xf32>
    %131 = arith.select %129, %122, %130 : vector<256x128xi1>, vector<256x128xf32>
    %c-1_i32_49 = arith.constant -1 : i32
    %132 = vector.broadcast %c-1_i32_49 : i32 to vector<256x128xi32>
    %133 = arith.addi %98, %132 : vector<256x128xi32>
    %c0_i32_50 = arith.constant 0 : i32
    %134 = vector.broadcast %c0_i32_50 : i32 to vector<256x128xi32>
    %135 = arith.cmpi sge, %133, %134 : vector<256x128xi32>
    %c15_i32_51 = arith.constant 15 : i32
    %136 = vector.broadcast %c15_i32_51 : i32 to vector<256x128xi32>
    %137 = arith.cmpi sle, %133, %136 : vector<256x128xi32>
    %138 = arith.andi %135, %137 : vector<256x128xi1>
    %cst_52 = arith.constant 0.000000e+00 : f32
    %139 = vector.broadcast %cst_52 : f32 to vector<256x128xf32>
    %140 = arith.select %138, %101, %139 : vector<256x128xi1>, vector<256x128xf32>
    %c1_i32_53 = arith.constant 1 : i32
    %141 = vector.broadcast %c1_i32_53 : i32 to vector<256x128xi32>
    %142 = arith.addi %98, %141 : vector<256x128xi32>
    %c0_i32_54 = arith.constant 0 : i32
    %143 = vector.broadcast %c0_i32_54 : i32 to vector<256x128xi32>
    %144 = arith.cmpi sge, %142, %143 : vector<256x128xi32>
    %c15_i32_55 = arith.constant 15 : i32
    %145 = vector.broadcast %c15_i32_55 : i32 to vector<256x128xi32>
    %146 = arith.cmpi sle, %142, %145 : vector<256x128xi32>
    %147 = arith.andi %144, %146 : vector<256x128xi1>
    %cst_56 = arith.constant 0.000000e+00 : f32
    %148 = vector.broadcast %cst_56 : f32 to vector<256x128xf32>
    %149 = arith.select %147, %104, %148 : vector<256x128xi1>, vector<256x128xf32>
    %cst_57 = arith.constant 0.000000e+00 : f32
    %150 = vector.broadcast %cst_57 : f32 to vector<16x128xf32>
    %151 = vector.extract_strided_slice %101 {offsets = [16, 0], sizes = [240, 128], strides = [1, 1]} : vector<256x128xf32> to vector<240x128xf32>
    %152 = tpu.concatenate %151, %150 in 0 : vector<240x128xf32>, vector<16x128xf32> -> vector<256x128xf32>
    %c-1_i32_58 = arith.constant -1 : i32
    %153 = vector.broadcast %c-1_i32_58 : i32 to vector<256x128xi32>
    %154 = arith.addi %98, %153 : vector<256x128xi32>
    %c0_i32_59 = arith.constant 0 : i32
    %155 = vector.broadcast %c0_i32_59 : i32 to vector<256x128xi32>
    %156 = arith.cmpi sge, %154, %155 : vector<256x128xi32>
    %c15_i32_60 = arith.constant 15 : i32
    %157 = vector.broadcast %c15_i32_60 : i32 to vector<256x128xi32>
    %158 = arith.cmpi sle, %154, %157 : vector<256x128xi32>
    %159 = arith.andi %156, %158 : vector<256x128xi1>
    %cst_61 = arith.constant 0.000000e+00 : f32
    %160 = vector.broadcast %cst_61 : f32 to vector<256x128xf32>
    %161 = arith.select %159, %152, %160 : vector<256x128xi1>, vector<256x128xf32>
    %cst_62 = arith.constant 0.000000e+00 : f32
    %162 = vector.broadcast %cst_62 : f32 to vector<16x128xf32>
    %163 = vector.extract_strided_slice %94 {offsets = [16, 0], sizes = [240, 128], strides = [1, 1]} : vector<256x128xf32> to vector<240x128xf32>
    %164 = tpu.concatenate %163, %162 in 0 : vector<240x128xf32>, vector<16x128xf32> -> vector<256x128xf32>
    %cst_63 = arith.constant 0.000000e+00 : f32
    %165 = vector.broadcast %cst_63 : f32 to vector<16x128xf32>
    %166 = vector.extract_strided_slice %104 {offsets = [16, 0], sizes = [240, 128], strides = [1, 1]} : vector<256x128xf32> to vector<240x128xf32>
    %167 = tpu.concatenate %166, %165 in 0 : vector<240x128xf32>, vector<16x128xf32> -> vector<256x128xf32>
    %c1_i32_64 = arith.constant 1 : i32
    %168 = vector.broadcast %c1_i32_64 : i32 to vector<256x128xi32>
    %169 = arith.addi %98, %168 : vector<256x128xi32>
    %c0_i32_65 = arith.constant 0 : i32
    %170 = vector.broadcast %c0_i32_65 : i32 to vector<256x128xi32>
    %171 = arith.cmpi sge, %169, %170 : vector<256x128xi32>
    %c15_i32_66 = arith.constant 15 : i32
    %172 = vector.broadcast %c15_i32_66 : i32 to vector<256x128xi32>
    %173 = arith.cmpi sle, %169, %172 : vector<256x128xi32>
    %174 = arith.andi %171, %173 : vector<256x128xi1>
    %cst_67 = arith.constant 0.000000e+00 : f32
    %175 = vector.broadcast %cst_67 : f32 to vector<256x128xf32>
    %176 = arith.select %174, %167, %175 : vector<256x128xi1>, vector<256x128xf32>
    %177 = tpu.concatenate %116, %119, %131, %140, %94, %149, %161, %164, %176 in 1 : vector<256x128xf32>, vector<256x128xf32>, vector<256x128xf32>, vector<256x128xf32>, vector<256x128xf32>, vector<256x128xf32>, vector<256x128xf32>, vector<256x128xf32>, vector<256x128xf32> -> vector<256x1152xf32>
    %178 = arith.truncf %177 : vector<256x1152xf32> to vector<256x1152xbf16>
    %c0_68 = arith.constant 0 : index
    %c0_69 = arith.constant 0 : index
    %179 = vector.load %arg4[%c0_68, %c0_69] : memref<1152x128xbf16, #tpu.memory_space<vmem>>, vector<1152x128xbf16>
    %cst_70 = arith.constant dense<0.000000e+00> : vector<256x128xf32>
    %180 = tpu.matmul %178, %179, %cst_70 {dimension_numbers = #tpu.dot_dimension_numbers<[1], [0], [0], [1], [0, 0, 1, 1], [], []>} : vector<256x1152xbf16>, vector<1152x128xbf16>, vector<256x128xf32> -> vector<256x128xf32>
    %c0_71 = arith.constant 0 : index
    %c0_72 = arith.constant 0 : index
    %181 = vector.load %arg5[%c0_71, %c0_72] : memref<1x128xf32, #tpu.memory_space<vmem>>, vector<1x128xf32>
    %182 = vector.broadcast %181 : vector<1x128xf32> to vector<256x128xf32>
    %183 = arith.addf %180, %182 : vector<256x128xf32>
    %184 = arith.truncf %1 : vector<256x128xf32> to vector<256x128xbf16>
    %c0_73 = arith.constant 0 : index
    %c0_74 = arith.constant 0 : index
    %185 = vector.load %arg6[%c0_73, %c0_74] : memref<128x128xbf16, #tpu.memory_space<vmem>>, vector<128x128xbf16>
    %cst_75 = arith.constant dense<0.000000e+00> : vector<256x128xf32>
    %186 = tpu.matmul %184, %185, %cst_75 {dimension_numbers = #tpu.dot_dimension_numbers<[1], [0], [0], [1], [0, 0, 1, 1], [], []>} : vector<256x128xbf16>, vector<128x128xbf16>, vector<256x128xf32> -> vector<256x128xf32>
    %c0_76 = arith.constant 0 : index
    %c0_77 = arith.constant 0 : index
    %187 = vector.load %arg7[%c0_76, %c0_77] : memref<1x128xf32, #tpu.memory_space<vmem>>, vector<1x128xf32>
    %188 = vector.broadcast %187 : vector<1x128xf32> to vector<256x128xf32>
    %189 = arith.addf %186, %188 : vector<256x128xf32>
    %190 = arith.addf %183, %189 : vector<256x128xf32>
    %191 = vector.shape_cast %190 : vector<256x128xf32> to vector<16x16x128xf32>
    %c0_78 = arith.constant 0 : index
    %c0_79 = arith.constant 0 : index
    %c0_80 = arith.constant 0 : index
    %192 = vector.load %arg9[%c0_78, %c0_79, %c0_80] : memref<16x16x128xf32, #tpu.memory_space<vmem>>, vector<16x16x128xf32>
    tpu.vector_store %arg9[%c0_78, %c0_79, %c0_80], %191 {strides = array<i32>} : memref<16x16x128xf32, #tpu.memory_space<vmem>>, vector<16x16x128xf32>,
    %c0_81 = arith.constant 0 : index
    %c0_82 = arith.constant 0 : index
    %c0_83 = arith.constant 0 : index
    %193 = tpu.strided_load %arg9[%c0_81, %c0_82, %c0_83] {strides = array<i32: 2, 2, 1>} : memref<16x16x128xf32, #tpu.memory_space<vmem>>, vector<8x8x128xf32>
    %c0_84 = arith.constant 0 : index
    %c1 = arith.constant 1 : index
    %c0_85 = arith.constant 0 : index
    %194 = tpu.strided_load %arg9[%c0_84, %c1, %c0_85] {strides = array<i32: 2, 2, 1>} : memref<16x16x128xf32, #tpu.memory_space<vmem>>, vector<8x8x128xf32>
    %195 = arith.addf %193, %194 : vector<8x8x128xf32>
    %c1_86 = arith.constant 1 : index
    %c0_87 = arith.constant 0 : index
    %c0_88 = arith.constant 0 : index
    %196 = tpu.strided_load %arg9[%c1_86, %c0_87, %c0_88] {strides = array<i32: 2, 2, 1>} : memref<16x16x128xf32, #tpu.memory_space<vmem>>, vector<8x8x128xf32>
    %197 = arith.addf %195, %196 : vector<8x8x128xf32>
    %c1_89 = arith.constant 1 : index
    %c1_90 = arith.constant 1 : index
    %c0_91 = arith.constant 0 : index
    %198 = tpu.strided_load %arg9[%c1_89, %c1_90, %c0_91] {strides = array<i32: 2, 2, 1>} : memref<16x16x128xf32, #tpu.memory_space<vmem>>, vector<8x8x128xf32>
    %199 = arith.addf %197, %198 : vector<8x8x128xf32>
    %cst_92 = arith.constant 2.500000e-01 : f32
    %200 = vector.broadcast %cst_92 : f32 to vector<8x8x128xf32>
    %201 = arith.mulf %199, %200 : vector<8x8x128xf32>
    %202 = vector.shape_cast %201 : vector<8x8x128xf32> to vector<64x128xf32>
    %c0_93 = arith.constant 0 : index
    %c0_94 = arith.constant 0 : index
    %c0_95 = arith.constant 0 : index
    %203 = vector.load %arg8[%c0_93, %c0_94, %c0_95] : memref<1x64x128xf32, #tpu.memory_space<vmem>>, vector<1x64x128xf32>
    %204 = vector.shape_cast %203 : vector<1x64x128xf32> to vector<64x128xf32>
    %205 = vector.shape_cast %202 : vector<64x128xf32> to vector<1x64x128xf32>
    tpu.vector_store %arg8[%c0_93, %c0_94, %c0_95], %205 {strides = array<i32>} : memref<1x64x128xf32, #tpu.memory_space<vmem>>, vector<1x64x128xf32>,
    return
  }
  func.func @transform_0(%arg0: i32) -> (i32, i32, i32) {
    %c0_i32 = arith.constant 0 : i32
    %c0_i32_0 = arith.constant 0 : i32
    %c0_i32_1 = arith.constant 0 : i32
    return %arg0, %c0_i32, %c0_i32_0 : i32, i32, i32
  }
  func.func @transform_1(%arg0: i32) -> (i32, i32) {
    %c0_i32 = arith.constant 0 : i32
    %c0_i32_0 = arith.constant 0 : i32
    %c0_i32_1 = arith.constant 0 : i32
    return %c0_i32, %c0_i32_0 : i32, i32
  }
  func.func @transform_2(%arg0: i32) -> (i32, i32) {
    %c0_i32 = arith.constant 0 : i32
    %c0_i32_0 = arith.constant 0 : i32
    %c0_i32_1 = arith.constant 0 : i32
    return %c0_i32, %c0_i32_0 : i32, i32
  }
  func.func @transform_3(%arg0: i32) -> (i32, i32) {
    %c0_i32 = arith.constant 0 : i32
    %c0_i32_0 = arith.constant 0 : i32
    %c0_i32_1 = arith.constant 0 : i32
    return %c0_i32, %c0_i32_0 : i32, i32
  }
  func.func @transform_4(%arg0: i32) -> (i32, i32) {
    %c0_i32 = arith.constant 0 : i32
    %c0_i32_0 = arith.constant 0 : i32
    %c0_i32_1 = arith.constant 0 : i32
    return %c0_i32, %c0_i32_0 : i32, i32
  }
  func.func @transform_5(%arg0: i32) -> (i32, i32) {
    %c0_i32 = arith.constant 0 : i32
    %c0_i32_0 = arith.constant 0 : i32
    %c0_i32_1 = arith.constant 0 : i32
    return %c0_i32, %c0_i32_0 : i32, i32
  }
  func.func @transform_6(%arg0: i32) -> (i32, i32) {
    %c0_i32 = arith.constant 0 : i32
    %c0_i32_0 = arith.constant 0 : i32
    %c0_i32_1 = arith.constant 0 : i32
    return %c0_i32, %c0_i32_0 : i32, i32
  }
  func.func @transform_7(%arg0: i32) -> (i32, i32, i32) {
    %c0_i32 = arith.constant 0 : i32
    %c0_i32_0 = arith.constant 0 : i32
    %c0_i32_1 = arith.constant 0 : i32
    return %arg0, %c0_i32, %c0_i32_0 : i32, i32, i32
  }
}

</mosaic_0001>

<bundles_post_ra>
// kernel: tpu_custom_call.1
= control target key start
LH: loop header
LB: loop body
LE: loop exit
PB: predicated region body
PF: predicated region fallthrough
CT: control target
= control target key end

     0   :  { %s9275_s0 = inlined_call_operand.hbm [shape: f32[2,256,128], index: 0, kind: input, shape index: {}]   ;;  %s9276_s1 = inlined_call_operand.hbm [shape: bf16[1152,128], index: 1, kind: input, shape index: {}]   ;;  %s9277_s2 = inlined_call_operand.vmem [shape: f32[1,128], index: 2, kind: input, shape index: {}]   ;;  %s9278_s3 = inlined_call_operand.hbm [shape: bf16[1152,128], index: 3, kind: input, shape index: {}]   ;;  %s9279_s4 = inlined_call_operand.vmem [shape: f32[1,128], index: 4, kind: input, shape index: {}]   ;;  %s9280_s5 = inlined_call_operand.hbm [shape: bf16[128,128], index: 5, kind: input, shape index: {}]   ;;  %s9281_s6 = inlined_call_operand.vmem [shape: f32[1,128], index: 6, kind: input, shape index: {}]   ;;  %s9282_s7 = inlined_call_operand.hbm [shape: f32[2,64,128], index: 7, kind: output, shape index: {}]  }
   0x1   :  { %9330 = sst [smem:[#allocation32_spill]] %s9276_s1 }
   0x2   :  { %12 = vsyncpa [#allocation4], 0 }
   0x3   :  { %14 = vsyncpa [#allocation4 + $0x1], 0 }
   0x4   :  { %15 = vsyncpa [#allocation7], 0 }
   0x5   :  { %16 = vsyncpa [#allocation10], 0 }
   0x6   :  { %17 = vsyncpa [#allocation5], 0 }
   0x7   :  { %19 = vsyncpa [#allocation5 + $0x1], 0  ;;  %s6811_s24 = smov 0   ;;  %s6813_s25 = smov 0  }
   0x8   :  { %s6815_s26 = smov 0   ;;  %s6817_s27 = smov 0  }
   0x9 LB: > { %s6832_s28 = sadd.s32 4294967295, %s6756_s27   ;;  %s4454_s29 = sadd.s32 4294967294, %s6756_s27   ;;  %s6756_s27 = sphi %s6817_s27, %s9472_s27   ;;  %s6752_s26 = sphi %s6815_s26, %s9471_s26   ;;  %s6748_s25 = sphi %s6813_s25, %s9470_s25   ;;  %s6744_s24 = sphi %s6811_s24, %s9469_s24  }
   0xa   : > { %p45_p0 = scmp.ne.s32.totalorder %s6748_s25, %s6744_s24  ;;  %p9283_p1 = scmp.eq.s32.totalorder %s6832_s28, 0 }
   0xb   : > { %p201_p3 = scmp.eq.s32.totalorder %s4454_s29, 1  ;;  %p4455_p5 = scmp.ge.s32.totalorder %s6756_s27, 1 }
   0xc   : > { %p6841_p4 = por %p9283_p1, %p45_p0  ;;  %p208_p7 = scmp.lt.s32.totalorder %s6756_s27, 3 }
   0xd   : > { %p6846_p6 = por %p201_p3, %p45_p0  ;;  %s6758_s10 = smov [#allocation6]  }
   0xe   : > { %s9331_s30 = scalar_select %p6841_p4, 1, 0 }
   0xf   : > { %s9332_s8 = scalar_select %p6846_p6, 1, 0 }
  0x10   : > { %p6851_p8 = pnand %p4455_p5, %p208_p7  ;;  %s220_s11 = sshll.u32 %s6758_s10, 4  ;;  %s221_s11 = int_to_ptr.vmem [resolvable:$true] %s220_s11 }
  0x11   : > { %s6759_s13 = smov [#allocation8]   ;;  %s6760_s15 = smov [#allocation9]  }
  0x12   : > { %s9333_s9 = scalar_select %p6851_p8, 1, 0 }
  0x13   : > { %p6327_p9 = pneg %p6851_p8  ;;  %s236_s14 = sshll.u32 %s6759_s13, 4  ;;  %s237_s14 = int_to_ptr.vmem [resolvable:$true] %s236_s14 }
  0x14   : > { %s252_s16 = sshll.u32 %s6760_s15, 4  ;;  %s6589_s17 = scalar_lea.vmem %s221_s11, 9216  ;;  %s253_s16 = int_to_ptr.vmem [resolvable:$true] %s252_s16 }
  0x15   : > { %p6860_p11 = pnand %p6327_p9, %p9283_p1  ;;  %p6590_p13 = scmp.ne.s32.totalorder %s221_s11, %s6589_s17 }
  0x16   : > { %p6597_p5 = scmp.lt.s32.totalorder %s221_s11, %s221_s11  ;;  %p6598_p7 = scmp.lt.s32.totalorder %s6589_s17, %s6589_s17 }
  0x17   : > { %p6580_p12 = pneg %p6860_p11 }
  0x18   : > { %p6599_p9 = por %p6598_p7, %p6597_p5 }
  0x19   : > { %p6592_p0 = pnand %p6590_p13, %p6580_p12 }
  0x1b   : > { %p6593_p3 = pneg %p6592_p0 }
  0x1d   : > { %p6600_p10 = pnand %p6599_p9, %p6593_p3 }
  0x1f   : > { %6603 = shalt.err (!%p6600_p10)
}
  0x20   : > { %s6761_s18 = smov 64   ;;  %s6762_s19 = smov 4  }
  0x21   : > { %s9335_s1 = sld [smem:[#allocation32_spill]]  ;;  %s6615_s22 = scalar_lea.vmem %s237_s14, 9216 }
  0x22   : > { %p6616_p1 = scmp.ne.s32.totalorder %s237_s14, %s6615_s22  ;;  %p6623_p2 = scmp.lt.s32.totalorder %s237_s14, %s237_s14 }
  0x23   : > { %p6624_p6 = scmp.lt.s32.totalorder %s6615_s22, %s6615_s22 }
  0x24   : > { %p6618_p13 = pnand %p6616_p1, %p6580_p12 }
  0x25   : > { %p6625_p5 = por %p6624_p6, %p6623_p2 }
  0x26   : > { %p6619_p0 = pneg %p6618_p13 }
  0x27   : > { %6330 = dma.hbm_to_vmem [thread:$0]  (!%p6860_p11), %s9335_s1, 9216, %s221_s11, [#allocation7], %s6761_s18, %s6761_s18, %s6762_s19  }
  0x28   : > { %p6626_p3 = pnand %p6625_p5, %p6619_p0 }
  0x2a   : > { %6629 = shalt.err (!%p6626_p3)
}
  0x2b   : > { %6333 = dma.hbm_to_vmem [thread:$0]  (!%p6860_p11), %s9278_s3, 9216, %s237_s14, [#allocation7], %s6761_s18, %s6761_s18, %s6762_s19  }
  0x2c   : > { %s6641_s10 = scalar_lea.vmem %s253_s16, 1024  ;;  %p6649_p9 = scmp.lt.s32.totalorder %s253_s16, %s253_s16 }
  0x2d   : > { %p6642_p10 = scmp.ne.s32.totalorder %s253_s16, %s6641_s10  ;;  %p6650_p13 = scmp.lt.s32.totalorder %s6641_s10, %s6641_s10 }
  0x2f   : > { %p6644_p7 = pnand %p6642_p10, %p6580_p12  ;;  %p6651_p4 = por %p6650_p13, %p6649_p9 }
  0x31   : > { %p6645_p1 = pneg %p6644_p7 }
  0x33   : > { %p6652_p2 = pnand %p6651_p4, %p6645_p1 }
  0x35   : > { %6655 = shalt.err (!%p6652_p2)
}
  0x36   : > { %6336 = dma.hbm_to_vmem [thread:$0]  (!%p6860_p11), %s9280_s5, 1024, %s253_s16, [#allocation10], %s6761_s18, %s6761_s18, %s6762_s19  }
  0x37   : > { %s6891_s14 = sadd.s32 1, %s6756_s27   ;;  %s32_s12 = sadd.s32 1, %s6752_s26 }
  0x38   : > { %s29_s15 = ssub.s32 %s6756_s27, %s6891_s14  ;;  %p39_p6 = scmp.ne.s32.totalorder %s6752_s26, %s6748_s25 }
  0x39   : > { %p30_p4 = scmp.eq.s32.totalorder %s29_s15, 0  ;;  %p40_p12 = scmp.eq.s32.totalorder %s6756_s27, 0 }
  0x3a   : > { %p6348_p0 = scmp.lt.s32.totalorder %s6756_s27, 2  ;;  %p9336_p3 = scmp.eq.s32.totalorder %s6832_s28, 1 }
  0x3b   : > { %s6901_s17 = scalar_select %p30_p4, %s6752_s26, %s32_s12  }
  0x3c   : > { %p41_p5 = por %p40_p12, %p39_p6  ;;  %p6905_p10 = por %p9336_p3, %p39_p6 }
  0x3d   : > { %s269_s21 = sand.u32 1, %s6752_s26   ;;  %s5181_s22 = sshll.u32 %s6756_s27, 12 }
  0x3e   : > { %s9337_s20 = scalar_select %p6905_p10, 1, 0 }
  0x3f   : > { %s4460_s16 = sshll.u32 %s269_s21, 8  ;;  %s6914_s23 = scalar_lea.hbm %s9275_s0, %s5181_s22 }
  0x40   : > { %s273_s29 = scalar_lea.vmem [#allocation3], %s4460_s16  ;;  %p6916_p11 = pnand %p6348_p0, %p41_p5 }
  0x41   : > { %s280_s10 = sshll.u32 %s273_s29, 4  ;;  %s6922_s13 = scalar_lea.sflag [#allocation4], %s269_s21  ;;  %s6920_s10 = int_to_ptr.vmem [resolvable:$true] %s280_s10 }
  0x42   : > { %s6656_s15 = scalar_lea.hbm %s6914_s23, 4096  ;;  %p6658_p1 = pneg %p6916_p11 }
  0x43   : > { %p6657_p7 = scmp.ne.s32.totalorder %s6914_s23, %s6656_s15  ;;  %s6661_s16 = scalar_lea.hbm %s9275_s0, 8192 }
  0x44   : > { %p6662_p2 = scmp.lt.s32.totalorder %s6914_s23, %s9275_s0  ;;  %p6663_p4 = scmp.lt.s32.totalorder %s6661_s16, %s6656_s15 }
  0x45   : > { %p6659_p9 = pnand %p6658_p1, %p6657_p7 }
  0x46   : > { %p6664_p6 = por %p6663_p4, %p6662_p2 }
  0x47   : > { %p6660_p13 = pneg %p6659_p9 }
  0x49   : > { %p6665_p12 = pnand %p6664_p6, %p6660_p13 }
  0x4b   : > { %6668 = shalt.err (!%p6665_p12)
}
  0x4c   : > { %s6669_s21 = scalar_lea.vmem %s6920_s10, 4096  ;;  %s6763_s29 = smov [#allocation3]  }
  0x4d   : > { %p6670_p0 = scmp.ne.s32.totalorder %s6920_s10, %s6669_s21  ;;  %s6674_s1 = sshll.u32 %s6763_s29, 4  ;;  %s6675_s1 = int_to_ptr.vmem [resolvable:$false] %s6674_s1 }
  0x4e   : > { %s6676_s12 = scalar_lea.vmem %s6675_s1, 8192  ;;  %p6677_p7 = scmp.lt.s32.totalorder %s6920_s10, %s6675_s1 }
  0x4f   : > { %p6672_p5 = pnand %p6670_p0, %p6658_p1  ;;  %p6678_p9 = scmp.lt.s32.totalorder %s6676_s12, %s6669_s21 }
  0x51   : > { %p6673_p3 = pneg %p6672_p5  ;;  %p6679_p10 = por %p6678_p9, %p6677_p7 }
  0x53   : > { %p6680_p8 = pnand %p6679_p10, %p6673_p3 }
  0x55   : > { %6683 = shalt.err (!%p6680_p8)
}
  0x56   : > { %s6764_s15 = smov 128   ;;  %s6765_s22 = smov 8  }
  0x57   : > { %6340 = dma.hbm_to_vmem [thread:$0]  (!%p6916_p11), %s6914_s23, 4096, %s6920_s10, %s6922_s13, %s6764_s15, %s6764_s15, %s6765_s22  }
  0x58   : > { %p9339_p1 = scmp.ne.s32.totalorder %s9333_s9, 0 }
  0x5a   : > { %292 = sbr.rel (%p9339_p1) target bundleno = 1118 (0x45e), region = 48 }
  0x5f   : > { %s6946_s16 = sand.u32 1, %s6748_s25   ;;  %p9340_p8 = scmp.ne.s32.totalorder %s9331_s30, 0 }
  0x60   : > { %s4464_s1 = sshll.u32 %s6946_s16, 8  ;;  %s295_s18 = scalar_lea.sflag [#allocation4], %s6946_s16 }
  0x61   : > { %s6950_s19 = scalar_lea.vmem [#allocation3], %s4464_s1 }
  0x62   : > { %6727 = dma.done.wait (%p9340_p8), %s295_s18, 4096  }
  0x63   : > { %6729 = vsyncadd (%p9340_p8), %s295_s18, 4294963200  ;;  %p9341_p10 = scmp.eq.s32.totalorder %s6832_s28, 0 }
  0x65   : > { %6731 = dma.done.wait (%p9341_p10), [#allocation7], 18432   ;;  %p9342_p11 = pmov %p9341_p10 }
  0x66   : > { %p9343_p13 = pmov %p9341_p10 }
  0x67   : > { %6733 = vsyncadd (%p9342_p11), [#allocation7], 4294948864 }
  0x68   : > { %6735 = dma.done.wait (%p9343_p13), [#allocation10], 1024   ;;  %p9344_p2 = pmov %p9341_p10 }
  0x69   : > { %v9288_v0 = vmov 0.0|0.0   ;;  %v6396_v1 = vld [vmem:[#allocation6 + $0x78] sm:$0xff]   ;;  %v6398_v3 = vld [vmem:[#allocation6 + $0x70] sm:$0xff]   ;;  %v6400_v5 = vld [vmem:[#allocation6 + $0x68] sm:$0xff]   ;;  %v406_v10 = vlaneseq  ;;  %vm538_vm0 = vcmask 1046528   ;;  %vm441_vm1 = vcmask 1040384  }
  0x6a   : > { %6737 = vsyncadd (%p9344_p2), [#allocation10], 4294966272  ;;  %1379 = vmatprep.mubr.bf16.mxu0 %v9288_v0  ;;  %v6397_v2 = vld [vmem:[#allocation6 + $0x38] sm:$0xff]   ;;  %5183 = vmatprep.subr.bf16.mxu0 %v6396_v1  ;;  %v6399_v4 = vld [vmem:[#allocation6 + $0x30] sm:$0xff]   ;;  %vm6767_vm3 = vmmov 1   ;;  %v9346_v51 = vmov 0 }
  0x6b   : > { %6295 = vmatprep.subr.bf16.mxu1 %v6396_v1  ;;  %5184 = vmatpush3.bf16.msra.mxu0 %v6397_v2  ;;  %v6401_v6 = vld [vmem:[#allocation6 + $0x28] sm:$0xff]   ;;  %v6402_v7 = vld [vmem:[#allocation6 + $0x60] sm:$0xff]   ;;  %v6404_v9 = vld [vmem:[#allocation6 + $0x58] sm:$0xff]   ;;  %v6974_v19 = vshrl.u32 %v406_v10, 7  ;;  %s4468_s21 = sshll.u32 %s6946_s16, 6  ;;  %s5182_s12 = sshll.u32 %s6832_s28, 10 }
  0x6c   : > { %6303 = vmatpush3.bf16.msra.mxu1 %v6397_v2  ;;  %5185 = vmatprep.subr.bf16.mxu0 %v6398_v3  ;;  %v6403_v8 = vld [vmem:[#allocation6 + $0x20] sm:$0xff]   ;;  %v6405_v11 = vld [vmem:[#allocation6 + $0x18] sm:$0xff]   ;;  %v6406_v12 = vld [vmem:[#allocation6 + $0x50] sm:$0xff]   ;;  %s9169_s29 = scalar_lea.vmem [#allocation11], %s4468_s21  ;;  %s9229_s18 = scalar_lea.hbm %s9282_s7, %s5182_s12 }
  0x6d   : > { %6296 = vmatprep.subr.bf16.mxu1 %v6398_v3  ;;  %v364_v13 = vld [vmem:[%s6950_s19 + $0xb0] sm:$0xff]  ;;  %v365_v14 = vld [vmem:[%s6950_s19 + $0xb8] sm:$0xff]  ;;  %v363_v15 = vld [vmem:[%s6950_s19 + $0xa8] sm:$0xff]  ;;  %v635_v27 = vadd.s32 4294967295, %v6974_v19  ;;  %s4337_s15 = sshll.u32 %s9169_s29, 4  ;;  %p9466_p6 = scmp.ne.s32.totalorder %s9337_s20, 0  ;;  %s9231_s15 = int_to_ptr.vmem [resolvable:$true] %s4337_s15 }
  0x6e   : > { %v6968_v16 = vmax.f32 %v364_v13, 0.0  ;;  %v6970_v17 = vmax.f32 %v365_v14, 0.0  ;;  %v6972_v18 = vmax.f32 %v363_v15, 0.0  ;;  %v6407_v20 = vld [vmem:[#allocation6 + $0x10] sm:$0xff]   ;;  %v6408_v22 = vld [vmem:[#allocation6 + $0x48] sm:$0xff]   ;;  %v6410_v26 = vld [vmem:[#allocation6 + $0x40] sm:$0xff]  }
  0x6f   : > { %5186 = vmatpush3.bf16.msra.mxu0 %v6399_v4  ;;  %v6409_v24 = vld [vmem:[#allocation6 + $0x8] sm:$0xff]   ;;  %v342_v31 = vld [vmem:[%s6950_s19] sm:$0xff]  ;;  %vm637_vm2 = vcmp.ge.s32.totalorder %v635_v27, 0  ;;  %v6412_v43 = vld [vmem:[#allocation6 + $0xf8] sm:$0xff]   ;;  %s6684_s30 = scalar_lea.vmem %s9231_s15, 1024  ;;  %s6768_s28 = smov [#allocation11]  }
  0x70   : > { %6304 = vmatpush3.bf16.msra.mxu1 %v6399_v4  ;;  %5187 = vmatprep.subr.bf16.mxu0 %v6400_v5  ;;  %v6978_v21 = vpack.c.bf16 %v6970_v17, %v6968_v16  ;;  %v9291_v23 = vrot.slane %v6972_v18, 1  ;;  %v582_v25 = vrot.slane %v6968_v16, 1  ;;  %v9290_v28 = vrot.slane %v6972_v18, 7  ;;  %v343_v33 = vld [vmem:[%s6950_s19 + $0x8] sm:$0xff]  ;;  %v366_v35 = vld [vmem:[%s6950_s19 + $0xc0] sm:$0xff]  ;;  %v6413_v44 = vld [vmem:[#allocation6 + $0x178] sm:$0xff]   ;;  %p6685_p4 = scmp.ne.s32.totalorder %s9231_s15, %s6684_s30 }
  0x71   : > { %6297 = vmatprep.subr.bf16.mxu1 %v6400_v5  ;;  %v485_v29 = vrot.slane %v6968_v16, 7  ;;  %v487_v30 = vrot.slane %v6970_v17, 7  ;;  %v6996_v34 = vmax.f32 %v342_v31, 0.0  ;;  %v367_v36 = vld [vmem:[%s6950_s19 + $0xc8] sm:$0xff]  ;;  %v7000_v37 = vmax.f32 %v343_v33, 0.0  ;;  %v6411_v38 = vld [vmem:[#allocation6] sm:$0xff]   ;;  %vm7016_vm4 = vmpackc.low %vm6767_vm3, %vm637_vm2 }
  0x72   : > { %9345 = vst [vmem:[#allocation16_spill] sm:$0xff] %v6978_v21  ;;  %1475 = vmatprep.mubr.bf16.mxu1 %v6978_v21  ;;  %v6993_v32 = vsel %vm538_vm0, %v9291_v23, %v582_v25  ;;  %v7006_v41 = vmax.f32 %v366_v35, 0.0  ;;  %v7008_v42 = vmax.f32 %v367_v36, 0.0  ;;  %v6414_v47 = vld [vmem:[#allocation6 + $0xb8] sm:$0xff]   ;;  %v6416_v50 = vld [vmem:[#allocation6 + $0xf0] sm:$0xff]   ;;  %v9347_v51 = vsel %vm7016_vm4, 4294967295, %v9346_v51  ;;  %p6686_p12 = pnand %p6685_p4, %p9466_p6 }
  0x73   : > { %5188 = vmatpush3.bf16.msra.mxu0 %v6401_v6  ;;  %v486_v39 = vsel %vm441_vm1, %v9290_v28, %v485_v29  ;;  %v488_v40 = vsel %vm441_vm1, %v485_v29, %v487_v30  ;;  %v442_v45 = vrot.slane %v6996_v34, 7  ;;  %v443_v46 = vrot.slane %v7000_v37, 7  ;;  %v6415_v48 = vld [vmem:[#allocation6 + $0x138] sm:$0xff]   ;;  %9348 = vst [vmem:[#allocation17_spill] sm:$0xff] %v9347_v51  ;;  %v7023_v54 = vld [vmem:[%s6950_s19 + $0x10] sm:$0xff]  ;;  %v6418_v13 = vld [vmem:[#allocation6 + $0xe8] sm:$0xff]  }
  0x74   : > { %6305 = vmatpush3.bf16.msra.mxu1 %v6401_v6  ;;  %5189 = vmatprep.subr.bf16.mxu0 %v6402_v7  ;;  %v7012_v49 = vpack.c.bf16 %v488_v40, %v486_v39  ;;  %v489_v52 = vrot.slane %v7006_v41, 7  ;;  %v491_v53 = vrot.slane %v7008_v42, 7  ;;  %9349 = vst [vmem:[#allocation18_spill] sm:$0xff] %v7023_v54  ;;  %v584_v55 = vrot.slane %v6970_v17, 1  ;;  %v7031_v57 = vld [vmem:[%s6950_s19 + $0x18] sm:$0xff]  ;;  %v368_v58 = vld [vmem:[%s6950_s19 + $0xd0] sm:$0xff]  ;;  %p6687_p0 = pneg %p6686_p12 }
  0x75   : > { %6298 = vmatprep.subr.bf16.mxu1 %v6402_v7  ;;  %v7028_v56 = vpack.c.bf16 %v7000_v37, %v6996_v34  ;;  %9350 = vst [vmem:[#allocation19_spill] sm:$0xff] %v7031_v57  ;;  %v369_v59 = vld [vmem:[%s6950_s19 + $0xd8] sm:$0xff]  ;;  %v586_v60 = vrot.slane %v7006_v41, 1  ;;  %v6417_v61 = vld [vmem:[#allocation6 + $0xb0] sm:$0xff]   ;;  %v7038_v62 = vpack.c.bf16 %v7008_v42, %v7006_v41  ;;  %v444_v63 = vsel %vm441_vm1, %v442_v45, %v443_v46  ;;  %v6419_v17 = vld [vmem:[#allocation6 + $0xa8] sm:$0xff]   ;;  %s6688_s9 = sshll.u32 %s6768_s28, 4  ;;  %s6689_s9 = int_to_ptr.vmem [resolvable:$false] %s6688_s9 }
  0x76   : > { %v537_v1 = vsel %vm441_vm1, 0.0, %v442_v45  ;;  %v6421_v2 = vld [vmem:[#allocation6 + $0x170] sm:$0xff]   ;;  %v7051_v5 = vmax.f32 %v7023_v54, 0.0  ;;  %v7054_v6 = vmax.f32 %v7031_v57, 0.0  ;;  %v585_v7 = vsel %vm538_vm0, %v582_v25, %v584_v55  ;;  %v346_v25 = vld [vmem:[%s6950_s19 + $0x20] sm:$0xff]  ;;  %v347_v31 = vld [vmem:[%s6950_s19 + $0x28] sm:$0xff]  ;;  %p6691_p5 = scmp.lt.s32.totalorder %s9231_s15, %s6689_s9 }
  0x77   : > { %5190 = vmatpush3.bf16.msra.mxu0 %v6403_v8  ;;  %9351 = vst [vmem:[#allocation20_spill] sm:$0xff] %v7038_v62  ;;  %v6423_v3 = vld [vmem:[#allocation6 + $0x130] sm:$0xff]   ;;  %v492_v10 = vsel %vm441_vm1, %v489_v52, %v491_v53  ;;  %v7070_v15 = vpack.c.bf16 %v444_v63, %v537_v1  ;;  %v370_v33 = vld [vmem:[%s6950_s19 + $0xe0] sm:$0xff]  ;;  %v371_v36 = vld [vmem:[%s6950_s19 + $0xe8] sm:$0xff]  ;;  %v7090_v40 = vmax.f32 %v346_v25, 0.0  ;;  %s6690_s23 = scalar_lea.vmem %s6689_s9, 2048 }
  0x78   : > { %6306 = vmatpush3.bf16.msra.mxu1 %v6403_v8  ;;  %5191 = vmatprep.subr.bf16.mxu0 %v6404_v9  ;;  %v587_v8 = vsel %vm538_vm0, %v584_v55, %v586_v60  ;;  %v7080_v27 = vpack.c.bf16 %v7054_v6, %v7051_v5  ;;  %v6422_v39 = vld [vmem:[#allocation6 + $0xa0] sm:$0xff]   ;;  %v6429_v41 = vld [vmem:[#allocation6 + $0x168] sm:$0xff]   ;;  %v7103_v45 = vmax.f32 %v370_v33, 0.0  ;;  %v6427_v25 = vld [vmem:[#allocation6 + $0x90] sm:$0xff]   ;;  %p6692_p3 = scmp.lt.s32.totalorder %s6690_s23, %s6684_s30 }
  0x79   : > { %6299 = vmatprep.subr.bf16.mxu1 %v6404_v9  ;;  %v490_v9 = vsel %vm441_vm1, %v487_v30, %v489_v52  ;;  %v7067_v14 = vpack.c.bf16 %v587_v8, %v585_v7  ;;  %v7111_v52 = vmax.f32 %v371_v36, 0.0  ;;  %v6431_v55 = vld [vmem:[#allocation6 + $0x128] sm:$0xff]   ;;  %v6434_v7 = vld [vmem:[#allocation6 + $0x160] sm:$0xff]   ;;  %v6447_v28 = vld [vmem:[#allocation6 + $0x1f0] sm:$0xff]  }
  0x7a   : > { %v7072_v16 = vpack.c.bf16 %v492_v10, %v490_v9  ;;  %v497_v1 = vrot.slane %v7103_v45, 7  ;;  %v6426_v10 = vld [vmem:[#allocation6 + $0xd0] sm:$0xff]   ;;  %v6443_v23 = vld [vmem:[#allocation6 + $0x100] sm:$0xff]   ;;  %p6693_p7 = por %p6692_p3, %p6691_p5 }
  0x7b   : > { %5192 = vmatpush3.bf16.msra.mxu0 %v6405_v11  ;;  %v372_v54 = vld [vmem:[%s6950_s19 + $0xf0] sm:$0xff] }
  0x7c   : > { %6307 = vmatpush3.bf16.msra.mxu1 %v6405_v11  ;;  %5193 = vmatprep.subr.bf16.mxu0 %v6406_v12  ;;  %v400_v11 = vmax.f32 %v368_v58, 0.0  ;;  %v6425_v58 = vld [vmem:[#allocation6 + $0x98] sm:$0xff]   ;;  %v7329_v57 = vmax.f32 %v372_v54, 0.0  ;;  %p6694_p9 = pnand %p6693_p7, %p6687_p0 }
  0x7d   : > { %6300 = vmatprep.subr.bf16.mxu1 %v6406_v12  ;;  %v7064_v12 = vmax.f32 %v369_v59, 0.0  ;;  %v449_v59 = vrot.slane %v7090_v40, 7 }
  0x7e   : > { %v493_v29 = vrot.slane %v400_v11, 7 }
  0x7f   : > { %5194 = vmatpush3.bf16.msra.mxu0 %v6407_v20  ;;  %v495_v30 = vrot.slane %v7064_v12, 7  ;;  %v7086_v35 = vpack.c.bf16 %v7064_v12, %v400_v11 }
  0x80   : > { %6308 = vmatpush3.bf16.msra.mxu1 %v6407_v20  ;;  %5195 = vmatprep.subr.bf16.mxu0 %v6408_v22  ;;  %v6420_v20 = vld [vmem:[#allocation6 + $0xe0] sm:$0xff]  }
  0x81   : > { %6301 = vmatprep.subr.bf16.mxu1 %v6408_v22  ;;  %v445_v22 = vrot.slane %v7051_v5, 7  ;;  %9352 = vst [vmem:[#allocation21_spill] sm:$0xff] %v7086_v35  ;;  %v498_v33 = vsel %vm441_vm1, %v495_v30, %v497_v1 }
  0x83   : > { %5196 = vmatpush3.bf16.msra.mxu0 %v6409_v24 }
  0x84   : > { %6309 = vmatpush3.bf16.msra.mxu1 %v6409_v24  ;;  %5197 = vmatprep.subr.bf16.mxu0 %v6410_v26  ;;  %v447_v24 = vrot.slane %v7054_v6, 7 }
  0x85   : > { %6302 = vmatprep.subr.bf16.mxu1 %v6410_v26  ;;  %v588_v26 = vrot.slane %v7008_v42, 1 }
  0x87   : > { %5198 = vmatpush3.bf16.msra.mxu0 %v6411_v38 }
  0x88   : > { %6310 = vmatpush3.bf16.msra.mxu1 %v6411_v38  ;;  %5407 = vmatprep.subr.bf16.mxu0 %v6413_v44  ;;  %v589_v38 = vsel %vm538_vm0, %v586_v60, %v588_v26  ;;  %v7101_v44 = vmax.f32 %v347_v31, 0.0  ;;  %v590_v60 = vrot.slane %v400_v11, 1  ;;  %v7135_v11 = vpack.c.bf16 %v7111_v52, %v7103_v45 }
  0x89   : > { %5295 = vmatprep.subr.bf16.mxu1 %v6412_v43  ;;  %v446_v43 = vsel %vm441_vm1, %v443_v46, %v445_v22  ;;  %v6424_v46 = vld [vmem:[#allocation6 + $0xd8] sm:$0xff]  }
  0x8a   : > { %1380 = vmatmul.mubr.bf16.vlgmr.msra.gmra.mxu0 %v9288_v0  ;;  %v451_v63 = vrot.slane %v7101_v44, 7  ;;  %v591_v8 = vsel %vm538_vm0, %v588_v26, %v590_v60  ;;  %9353 = vst [vmem:[#allocation22_spill] sm:$0xff] %v7135_v11  ;;  %v6435_v26 = vld [vmem:[#allocation6 + $0x120] sm:$0xff]  }
  0x8b   : > { %4577 = vmatmul.mubr.msk.bf16.vlgmr.msra.gmra.mxu1 %vm7016_vm4, %v7012_v49  ;;  %5408 = vmatpush3.bf16.msra.mxu0 %v6415_v48  ;;  %v494_v48 = vsel %vm441_vm1, %v491_v53, %v493_v29 }
  0x8c   : > { %5296 = vmatpush3.bf16.msra.mxu1 %v6414_v47  ;;  %1387 = vmatprep.mubr.bf16.mxu0 %v7028_v56  ;;  %v448_v47 = vsel %vm441_vm1, %v445_v22, %v447_v24  ;;  %v7140_v22 = vpack.c.bf16 %v591_v8, %v589_v38  ;;  %v452_v31 = vsel %vm441_vm1, %v449_v59, %v451_v63  ;;  %v9293_v8 = vrot.slane %v7051_v5, 1 }
  0x8d   : > { %5297 = vmatprep.subr.bf16.mxu1 %v6416_v50  ;;  %1483 = vmatprep.mubr.bf16.mxu1 %v7038_v62  ;;  %v496_v50 = vsel %vm441_vm1, %v493_v29, %v495_v30  ;;  %v7116_v42 = vpack.c.bf16 %v448_v47, %v446_v43  ;;  %v450_v29 = vsel %vm441_vm1, %v447_v24, %v449_v59  ;;  %v6428_v24 = vld [vmem:[#allocation6 + $0xc8] sm:$0xff]   ;;  %v6437_v43 = vld [vmem:[#allocation6 + $0x118] sm:$0xff]   ;;  %v6459_v62 = vld [vmem:[#allocation6 + $0x190] sm:$0xff]  }
  0x8e   : > { %5409 = vmatprep.subr.bf16.mxu0 %v6421_v2  ;;  %v7118_v53 = vpack.c.bf16 %v496_v50, %v494_v48  ;;  %v7124_v2 = vpack.c.bf16 %v7101_v44, %v7090_v40  ;;  %v7162_v47 = vpack.c.bf16 %v452_v31, %v450_v29  ;;  %v6430_v48 = vld [vmem:[#allocation6 + $0x88] sm:$0xff]   ;;  %v353_v31 = vld [vmem:[%s6950_s19 + $0x58] sm:$0xff] }
  0x8f   : > { %5410 = vmatpush3.bf16.msra.mxu0 %v6423_v3  ;;  %v9287_v3 = vrot.slane %v7111_v52, 7  ;;  %v351_v59 = vld [vmem:[%s6950_s19 + $0x48] sm:$0xff]  ;;  %v7209_v4 = vmax.f32 %v353_v31, 0.0  ;;  %v6442_v31 = vld [vmem:[#allocation6 + $0x140] sm:$0xff]  }
  0x90   : > { %5298 = vmatpush3.bf16.msra.mxu1 %v6417_v61  ;;  %5411 = vmatprep.subr.bf16.mxu0 %v6429_v41  ;;  %v9292_v61 = vrot.slane %v7064_v12, 1 }
  0x91   : > { %5299 = vmatprep.subr.bf16.mxu1 %v6418_v13  ;;  %v348_v13 = vld [vmem:[%s6950_s19 + $0x30] sm:$0xff]  ;;  %v500_v36 = vsel %vm441_vm1, %v497_v1, %v9287_v3  ;;  %v539_v1 = vrot.slane %v6996_v34, 1  ;;  %v594_v3 = vrot.slane %v7103_v45, 1 }
  0x92   : > { %4544 = vmatmul.mubr.msk.bf16.gmra.mxu0 %vm7016_vm4, %v7070_v15  ;;  %v7131_v9 = vsel %vm538_vm0, %v590_v60, %v9292_v61  ;;  %v7157_v38 = vmax.f32 %v348_v13, 0.0  ;;  %v7164_v30 = vpack.c.bf16 %v500_v36, %v498_v33  ;;  %v6432_v60 = vld [vmem:[#allocation6 + $0xc0] sm:$0xff]   ;;  %v544_v13 = vrot.slane %v7054_v6, 1  ;;  %v6440_v36 = vld [vmem:[#allocation6 + $0x148] sm:$0xff]  }
  0x93   : > { %4580 = vmatmul.mubr.msk.bf16.gmra.mxu1 %vm7016_vm4, %v7072_v16  ;;  %1395 = vmatprep.mubr.bf16.mxu0 %v7080_v27  ;;  %v358_v61 = vld [vmem:[%s6950_s19 + $0x80] sm:$0xff]  ;;  %v359_v33 = vld [vmem:[%s6950_s19 + $0x88] sm:$0xff] }
  0x94   : > { %5300 = vmatpush3.bf16.msra.mxu1 %v6419_v17  ;;  %1491 = vmatprep.mubr.bf16.mxu1 %v7086_v35  ;;  %v349_v17 = vld [vmem:[%s6950_s19 + $0x38] sm:$0xff] }
  0x95   : > { %5301 = vmatprep.subr.bf16.mxu1 %v6420_v20  ;;  %5412 = vmatpush3.bf16.msra.mxu0 %v6431_v55  ;;  %v408_v20 = vadd.s32 8, %v6974_v19  ;;  %v6436_v19 = vld [vmem:[#allocation6 + $0x158] sm:$0xff]   ;;  %v453_v55 = vrot.slane %v7157_v38, 7 }
  0x96   : > { %5413 = vmatprep.subr.bf16.mxu0 %v6434_v7  ;;  %v540_v7 = vrot.slane %v7000_v37, 1  ;;  %v7186_v37 = vmax.f32 %v351_v59, 0.0 }
  0x97   : > { %v674_v41 = vadd.s32 1, %v408_v20  ;;  %v352_v20 = vld [vmem:[%s6950_s19 + $0x50] sm:$0xff] }
  0x98   : > { %5302 = vmatpush3.bf16.msra.mxu1 %v6422_v39  ;;  %v7159_v39 = vmax.f32 %v349_v17, 0.0  ;;  %v6438_v17 = vld [vmem:[#allocation6 + $0x150] sm:$0xff]   ;;  %v459_v59 = vrot.slane %v7186_v37, 7 }
  0x99   : > { %5303 = vmatprep.subr.bf16.mxu1 %v6424_v46  ;;  %5414 = vmatpush3.bf16.msra.mxu0 %v6435_v26  ;;  %vm678_vm5 = vcmp.le.s32.totalorder %v674_v41, 15  ;;  %v454_v26 = vsel %vm441_vm1, %v451_v63, %v453_v55  ;;  %v541_v41 = vsel %vm538_vm0, %v539_v1, %v540_v7 }
  0x9a   : > { %4547 = vmatmul.mubr.msk.bf16.gmra.mxu0 %vm7016_vm4, %v7116_v42  ;;  %5415 = vmatprep.subr.bf16.mxu0 %v6436_v19  ;;  %v7168_v50 = vpack.c.bf16 %v7159_v39, %v7157_v38  ;;  %v455_v46 = vrot.slane %v7159_v39, 7  ;;  %vm7217_vm6 = vmpackc.low %vm678_vm5, %vm6767_vm3  ;;  %v6448_v19 = vld [vmem:[#allocation6 + $0x1b0] sm:$0xff]  }
  0x9b   : > { %4583 = vmatmul.mubr.msk.bf16.gmra.mxu1 %vm7016_vm4, %v7118_v53  ;;  %1403 = vmatprep.mubr.bf16.mxu0 %v7124_v2 }
  0x9c   : > { %5304 = vmatpush3.bf16.msra.mxu1 %v6425_v58  ;;  %1499 = vmatprep.mubr.bf16.mxu1 %v7135_v11  ;;  %v350_v58 = vld [vmem:[%s6950_s19 + $0x40] sm:$0xff]  ;;  %v456_v29 = vsel %vm441_vm1, %v453_v55, %v455_v46 }
  0x9d   : > { %5305 = vmatprep.subr.bf16.mxu1 %v6426_v10  ;;  %v6433_v10 = vld [vmem:[#allocation6 + $0x80] sm:$0xff]   ;;  %5416 = vmatpush3.bf16.msra.mxu0 %v6437_v43  ;;  %v7184_v34 = vmax.f32 %v350_v58, 0.0  ;;  %v355_v58 = vld [vmem:[%s6950_s19 + $0x68] sm:$0xff]  ;;  %v7205_v63 = vpack.c.bf16 %v456_v29, %v454_v26 }
  0x9e   : > { %5417 = vmatprep.subr.bf16.mxu0 %v6438_v17  ;;  %v9355_v17 = vmov 0  ;;  %v6441_v26 = vld [vmem:[#allocation6 + $0x108] sm:$0xff]   ;;  %v7223_v29 = vmax.f32 %v355_v58, 0.0  ;;  %v362_v58 = vld [vmem:[%s6950_s19 + $0xa0] sm:$0xff] }
  0x9f   : > { %9354 = vst [vmem:[#allocation23_spill] sm:$0xff] %v7205_v63  ;;  %v457_v55 = vrot.slane %v7184_v34, 7  ;;  %v9356_v17 = vsel %vm7217_vm6, 4294967295, %v9355_v17  ;;  %v6450_v43 = vld [vmem:[#allocation6 + $0x1e8] sm:$0xff]  }
  0xa0   : > { %5306 = vmatpush3.bf16.msra.mxu1 %v6427_v25  ;;  %v6439_v25 = vld [vmem:[#allocation6 + $0x110] sm:$0xff]   ;;  %9357 = vst [vmem:[#allocation24_spill] sm:$0xff] %v9356_v17 }
  0xa1   : > { %5307 = vmatprep.subr.bf16.mxu1 %v6428_v24  ;;  %v354_v24 = vld [vmem:[%s6950_s19 + $0x60] sm:$0xff]  ;;  %5418 = vmatpush3.bf16.msra.mxu0 %v6439_v25  ;;  %v356_v25 = vld [vmem:[%s6950_s19 + $0x70] sm:$0xff]  ;;  %v458_v45 = vsel %vm441_vm1, %v455_v46, %v457_v55  ;;  %v7248_v46 = vmax.f32 %v362_v58, 0.0  ;;  %v6451_v58 = vld [vmem:[#allocation6 + $0x1a8] sm:$0xff]  }
  0xa2   : > { %4550 = vmatmul.mubr.msk.bf16.gmra.mxu0 %vm7016_vm4, %v7162_v47  ;;  %5419 = vmatprep.subr.bf16.mxu0 %v6440_v36  ;;  %v357_v36 = vld [vmem:[%s6950_s19 + $0x78] sm:$0xff] }
  0xa3   : > { %4586 = vmatmul.mubr.msk.bf16.gmra.mxu1 %vm7016_vm4, %v7164_v30  ;;  %1411 = vmatprep.mubr.bf16.mxu0 %v7168_v50 }
  0xa4   : > { %5308 = vmatpush3.bf16.msra.mxu1 %v6430_v48  ;;  %4589 = vmatprep.mubr.msk.bf16.mxu1 %vm7016_vm4, %v7070_v15  ;;  %v7202_v48 = vmax.f32 %v352_v20, 0.0  ;;  %v7213_v15 = vpack.c.bf16 %v7186_v37, %v7184_v34  ;;  %v7221_v20 = vmax.f32 %v354_v24, 0.0 }
  0xa5   : > { %5309 = vmatprep.subr.bf16.mxu1 %v6432_v60  ;;  %v6444_v60 = vld [vmem:[#allocation6 + $0x1f8] sm:$0xff]   ;;  %5420 = vmatpush3.bf16.msra.mxu0 %v6441_v26 }
  0xa6   : > { %v461_v24 = vrot.slane %v7202_v48, 7  ;;  %5421 = vmatprep.subr.bf16.mxu0 %v6442_v31  ;;  %v7260_v26 = vpack.c.bf16 %v7209_v4, %v7202_v48  ;;  %v9294_v31 = vrot.slane %v7248_v46, 1  ;;  %v558_v54 = vrot.slane %v7202_v48, 1 }
  0xa7   : > { %v9367_v48 = vrot.slane %v7223_v29, 7  ;;  %v562_v35 = vrot.slane %v7221_v20, 1 }
  0xa8   : > { %5310 = vmatpush3.bf16.msra.mxu1 %v6433_v10  ;;  %v6445_v10 = vld [vmem:[#allocation6 + $0x1b8] sm:$0xff]  }
  0xa9   : > { %5519 = vmatprep.subr.bf16.mxu1 %v6444_v60  ;;  %v460_v60 = vsel %vm441_vm1, %v457_v55, %v459_v59  ;;  %v7250_v55 = vld [vmem:[#allocation6 + $0x238] sm:$0xff]   ;;  %5422 = vmatpush3.bf16.msra.mxu0 %v6443_v23 }
  0xaa   : > { %4553 = vmatmul.mubr.msk.bf16.gmra.mxu0 %vm7016_vm4, %v7205_v63  ;;  %6151 = vmatprep.subr.bf16.mxu0 %v7250_v55 }
  0xab   : > { %1541 = vmatmul.mubr.bf16.vlgmr.msra.gmra.mxu1 %v9288_v0  ;;  %1419 = vmatprep.mubr.bf16.mxu0 %v7213_v15  ;;  %v543_v0 = vsel %vm538_vm0, %v540_v7, %v9293_v8  ;;  %v7252_v7 = vpack.c.bf16 %v460_v60, %v458_v45  ;;  %v7256_v8 = vmax.f32 %v356_v25, 0.0  ;;  %v9359_v25 = vrot.slane %v7064_v12, 1  ;;  %v6453_v12 = vld [vmem:[#allocation6 + $0x1e0] sm:$0xff]  }
  0xac   : > { %4592 = vmatprep.mubr.msk.bf16.mxu1 %vm7016_vm4, %v7116_v42  ;;  %5520 = vmatpush3.bf16.msra.mxu1 %v6445_v10  ;;  %v7254_v1 = vpack.c.bf16 %v543_v0, %v541_v41  ;;  %v7262_v10 = vmax.f32 %v357_v36, 0.0  ;;  %v462_v45 = vsel %vm441_vm1, %v459_v59, %v461_v24  ;;  %v9360_v36 = vrot.slane %v7090_v40, 1 }
  0xad   : > { %5521 = vmatprep.subr.bf16.mxu1 %v6447_v28  ;;  %v9358_v28 = vrot.slane %v7051_v5, 1  ;;  %v595_v41 = vsel %vm538_vm0, %v9359_v25, %v594_v3  ;;  %v9361_v5 = vrot.slane %v6972_v18, 1 }
  0xae   : > { %v547_v60 = vsel %vm538_vm0, %v544_v13, %v9360_v36  ;;  %v7310_v36 = vmax.f32 %v359_v33, 0.0  ;;  %v7323_v33 = vpack.c.bf16 %v7223_v29, %v7221_v20 }
  0xaf   : > { %v545_v0 = vsel %vm538_vm0, %v9358_v28, %v544_v13  ;;  %v581_v23 = vsel %vm538_vm0, %v9294_v31, %v9361_v5  ;;  %v7294_v13 = vmax.f32 %v358_v61, 0.0  ;;  %v9362_v28 = vrot.slane %v7209_v4, 7  ;;  %v361_v61 = vld [vmem:[%s6950_s19 + $0x98] sm:$0xff] }
  0xb0   : > { %5522 = vmatpush3.bf16.msra.mxu1 %v6448_v19  ;;  %v596_v19 = vrot.slane %v7111_v52, 1  ;;  %v7297_v59 = vpack.c.bf16 %v6993_v32, %v581_v23  ;;  %v471_v5 = vrot.slane %v7262_v10, 7  ;;  %v6455_v23 = vld [vmem:[#allocation6 + $0x1d8] sm:$0xff]   ;;  %v7317_v6 = vpack.c.bf16 %v547_v60, %v545_v0 }
  0xb1   : > { %5523 = vmatprep.subr.bf16.mxu1 %v6450_v43  ;;  %v7300_v43 = vpack.c.bf16 %v595_v41, %v7131_v9  ;;  %v464_v25 = vsel %vm441_vm1, %v461_v24, %v9362_v28  ;;  %v469_v9 = vrot.slane %v7256_v8, 7  ;;  %v6454_v41 = vld [vmem:[#allocation6 + $0x1a0] sm:$0xff]   ;;  %v360_v28 = vld [vmem:[%s6950_s19 + $0x90] sm:$0xff]  ;;  %v9363_v0 = vrot.slane %v7101_v44, 1 }
  0xb2   : > { %4556 = vmatmul.mubr.msk.bf16.gmra.mxu0 %vm7016_vm4, %v7252_v7  ;;  %v597_v32 = vsel %vm538_vm0, %v594_v3, %v596_v19  ;;  %v7315_v31 = vpack.c.bf16 %v464_v25, %v462_v45  ;;  %v9364_v45 = vrot.slane %v7090_v40, 1  ;;  %v7336_v25 = vmax.f32 %v360_v28, 0.0  ;;  %v6458_v24 = vld [vmem:[#allocation6 + $0x1d0] sm:$0xff]  }
  0xb3   : > { %4595 = vmatmul.mubr.msk.bf16.gmra.mxu1 %vm7217_vm6, %v7254_v1  ;;  %1427 = vmatprep.mubr.bf16.mxu0 %v7260_v26  ;;  %v560_v40 = vrot.slane %v7209_v4, 1  ;;  %v9366_v28 = vrot.slane %v7209_v4, 7  ;;  %v9369_v3 = vrot.slane %v7157_v38, 1  ;;  %v9370_v4 = vrot.slane %v7329_v57, 1 }
  0xb4   : > { %4598 = vmatprep.mubr.msk.bf16.mxu1 %vm7016_vm4, %v7162_v47  ;;  %5524 = vmatpush3.bf16.msra.mxu1 %v6451_v58  ;;  %v549_v60 = vsel %vm538_vm0, %v9364_v45, %v9363_v0 }
  0xb5   : > { %5525 = vmatprep.subr.bf16.mxu1 %v6453_v12  ;;  %v6457_v12 = vld [vmem:[#allocation6 + $0x198] sm:$0xff]   ;;  %v551_v11 = vsel %vm538_vm0, %v9363_v0, %v9369_v3  ;;  %v6461_v3 = vld [vmem:[#allocation6 + $0x188] sm:$0xff]   ;;  %v9374_v0 = vrot.slane %v7184_v34, 1  ;;  %v561_v34 = vsel %vm538_vm0, %v558_v54, %v560_v40 }
  0xb8   : > { %5526 = vmatpush3.bf16.msra.mxu1 %v6454_v41  ;;  %v7345_v41 = vmax.f32 %v361_v61, 0.0 }
  0xb9   : > { %5527 = vmatprep.subr.bf16.mxu1 %v6455_v23  ;;  %v9365_v23 = vrot.slane %v7221_v20, 7  ;;  %v7382_v20 = vpack.c.bf16 %v7262_v10, %v7256_v8 }
  0xba   : > { %4559 = vmatmul.mubr.msk.bf16.gmra.mxu0 %vm7016_vm4, %v7315_v31  ;;  %v479_v44 = vrot.slane %v7345_v41, 7 }
  0xbb   : > { %4601 = vmatmul.mubr.msk.bf16.gmra.mxu1 %vm7217_vm6, %v7317_v6  ;;  %1435 = vmatprep.mubr.bf16.mxu0 %v7323_v33  ;;  %v466_v45 = vsel %vm441_vm1, %v9366_v28, %v9365_v23  ;;  %v9368_v61 = vmov %v9365_v23  ;;  %v599_v23 = vsel %vm538_vm0, %v596_v19, %v9370_v4  ;;  %v477_v28 = vrot.slane %v7336_v25, 7 }
  0xbc   : > { %4604 = vmatprep.mubr.msk.bf16.mxu1 %vm7016_vm4, %v7205_v63  ;;  %v468_v58 = vsel %vm441_vm1, %v9368_v61, %v9367_v48  ;;  %5528 = vmatpush3.bf16.msra.mxu1 %v6457_v12  ;;  %v7373_v21 = vpack.c.bf16 %v599_v23, %v597_v32  ;;  %v6460_v48 = vld [vmem:[#allocation6 + $0x1c8] sm:$0xff]   ;;  %v7377_v63 = vpack.c.bf16 %v551_v11, %v549_v60  ;;  %v6462_v12 = vld [vmem:[#allocation6 + $0x1c0] sm:$0xff]   ;;  %v9371_v11 = vrot.slane %v7159_v39, 1 }
  0xbd   : > { %5529 = vmatprep.subr.bf16.mxu1 %v6458_v24  ;;  %v7375_v61 = vpack.c.bf16 %v468_v58, %v466_v45  ;;  %v9372_v19 = vrot.slane %v7157_v38, 1  ;;  %v6463_v24 = vld [vmem:[#allocation6 + $0x180] sm:$0xff]   ;;  %v472_v60 = vsel %vm441_vm1, %v469_v9, %v471_v5  ;;  %v481_v39 = vrot.slane %v7248_v46, 7 }
  0xbe   : > { %v9375_v45 = vmov %v9371_v11 }
  0xbf   : > { %v553_v32 = vsel %vm538_vm0, %v9372_v19, %v9371_v11  ;;  %v555_v38 = vsel %vm538_vm0, %v9375_v45, %v9374_v0  ;;  %v9376_v11 = vrot.slane %v7294_v13, 7  ;;  %v568_v19 = vrot.slane %v7262_v10, 1 }
  0xc0   : > { %5530 = vmatpush3.bf16.msra.mxu1 %v6459_v62  ;;  %v9373_v62 = vrot.slane %v7223_v29, 7  ;;  %v7410_v23 = vpack.c.bf16 %v555_v38, %v553_v32  ;;  %v7452_v45 = vpack.c.bf16 %v7345_v41, %v7336_v25 }
  0xc1   : > { %5531 = vmatprep.subr.bf16.mxu1 %v6460_v48  ;;  %v7414_v48 = vpack.c.bf16 %v7310_v36, %v7294_v13  ;;  %v9378_v32 = vmov %v9376_v11 }
  0xc2   : > { %4562 = vmatmul.mubr.msk.bf16.gmra.mxu0 %vm7016_vm4, %v7375_v61  ;;  %v470_v58 = vsel %vm441_vm1, %v9373_v62, %v469_v9  ;;  %v474_v9 = vsel %vm441_vm1, %v471_v5, %v9376_v11  ;;  %v9377_v5 = vrot.slane %v7310_v36, 7  ;;  %v9379_v62 = vrot.slane %v7186_v37, 1 }
  0xc3   : > { %4607 = vmatmul.mubr.msk.bf16.gmra.mxu1 %vm7217_vm6, %v7377_v63  ;;  %1443 = vmatprep.mubr.bf16.mxu0 %v7382_v20  ;;  %v7408_v4 = vpack.c.bf16 %v472_v60, %v470_v58  ;;  %v480_v11 = vsel %vm441_vm1, %v477_v28, %v479_v44 }
  0xc4   : > { %4610 = vmatprep.mubr.msk.bf16.mxu1 %vm7016_vm4, %v7252_v7  ;;  %5532 = vmatpush3.bf16.msra.mxu1 %v6461_v3  ;;  %v564_v3 = vrot.slane %v7223_v29, 1  ;;  %v9380_v29 = vmov %v9374_v0  ;;  %v9381_v10 = vmov %v9379_v62  ;;  %v9382_v37 = vmov %v9377_v5 }
  0xc5   : > { %5533 = vmatprep.subr.bf16.mxu1 %v6462_v12  ;;  %v566_v12 = vrot.slane %v7256_v8, 1  ;;  %v557_v8 = vsel %vm538_vm0, %v9380_v29, %v9379_v62  ;;  %v559_v58 = vsel %vm538_vm0, %v9381_v10, %v558_v54  ;;  %v478_v38 = vsel %vm441_vm1, %v9382_v37, %v477_v28  ;;  %v373_v10 = vld [vmem:[%s6950_s19 + $0xf8] sm:$0xff] }
  0xc6   : > { %v7448_v0 = vpack.c.bf16 %v559_v58, %v557_v8  ;;  %v7476_v54 = vpack.c.bf16 %v6972_v18, %v7248_v46  ;;  %v565_v28 = vsel %vm538_vm0, %v562_v35, %v564_v3  ;;  %v570_v8 = vrot.slane %v7294_v13, 1 }
  0xc7   : > { %v567_v29 = vsel %vm538_vm0, %v564_v3, %v566_v12  ;;  %v572_v58 = vrot.slane %v7310_v36, 1  ;;  %v569_v13 = vsel %vm538_vm0, %v566_v12, %v568_v19 }
  0xc8   : > { %5534 = vmatpush3.bf16.msra.mxu1 %v6463_v24  ;;  %v476_v24 = vsel %vm441_vm1, %v9378_v32, %v9377_v5  ;;  %v7470_v5 = vpack.c.bf16 %v480_v11, %v478_v38  ;;  %v7500_v37 = vpack.c.bf16 %v567_v29, %v565_v28  ;;  %v576_v38 = vrot.slane %v7345_v41, 1  ;;  %v6449_v41 = vld [vmem:[#allocation6 + $0x230] sm:$0xff]  }
  0xc9   : > { %v7446_v60 = vpack.c.bf16 %v476_v24, %v474_v9  ;;  %v563_v9 = vsel %vm538_vm0, %v560_v40, %v562_v35  ;;  %v482_v40 = vsel %vm441_vm1, %v479_v44, %v481_v39  ;;  %v9383_v24 = vrot.slane %v6972_v18, 7 }
  0xca   : > { %4565 = vmatmul.mubr.msk.bf16.gmra.mxu0 %vm7016_vm4, %v7408_v4  ;;  %v7472_v32 = vpack.c.bf16 %v563_v9, %v561_v34  ;;  %v574_v35 = vrot.slane %v7336_v25, 1  ;;  %v7503_v44 = vmax.f32 %v373_v10, 0.0  ;;  %v571_v36 = vsel %vm538_vm0, %v568_v19, %v570_v8  ;;  %v6464_v9 = vld [vmem:[#allocation6 + $0x218] sm:$0xff]  }
  0xcb   : > { %4613 = vmatmul.mubr.msk.bf16.gmra.mxu1 %vm7217_vm6, %v7410_v23  ;;  %1451 = vmatprep.mubr.bf16.mxu0 %v7414_v48  ;;  %v484_v62 = vsel %vm441_vm1, %v481_v39, %v9383_v24  ;;  %v7523_v25 = vpack.c.bf16 %v571_v36, %v569_v13  ;;  %v6452_v39 = vld [vmem:[#allocation6 + $0x228] sm:$0xff]   ;;  %v9384_v19 = vrot.slane %v7248_v46, 1  ;;  %v6467_v24 = vld [vmem:[#allocation6 + $0x200] sm:$0xff]  }
  0xcc   : > { %4616 = vmatprep.mubr.msk.bf16.mxu1 %vm7016_vm4, %v7315_v31  ;;  %v7498_v34 = vpack.c.bf16 %v484_v62, %v482_v40  ;;  %v7507_v18 = vpack.c.bf16 %v7503_v44, %v7329_v57  ;;  %v575_v3 = vsel %vm538_vm0, %v572_v58, %v574_v35  ;;  %v6465_v40 = vld [vmem:[#allocation6 + $0x210] sm:$0xff]   ;;  %v6466_v46 = vld [vmem:[#allocation6 + $0x208] sm:$0xff]   ;;  %v501_v62 = vrot.slane %v7329_v57, 7 }
  0xcd   : > { %v579_v11 = vsel %vm538_vm0, %v576_v38, %v9384_v19  ;;  %v503_v29 = vrot.slane %v7503_v44, 7 }
  0xd2   : > { %4568 = vmatmul.mubr.msk.bf16.gmra.mxu0 %vm7016_vm4, %v7446_v60 }
  0xd3   : > { %4619 = vmatmul.mubr.msk.bf16.gmra.mxu1 %vm7217_vm6, %v7448_v0  ;;  %1459 = vmatprep.mubr.bf16.mxu0 %v7452_v45 }
  0xd4   : > { %4622 = vmatprep.mubr.msk.bf16.mxu1 %vm7016_vm4, %v7375_v61 }
  0xda   : > { %4571 = vmatmul.mubr.msk.bf16.gmra.mxu0 %vm7016_vm4, %v7470_v5 }
  0xdb   : > { %4625 = vmatmul.mubr.msk.bf16.gmra.mxu1 %vm7217_vm6, %v7472_v32  ;;  %1467 = vmatprep.mubr.bf16.mxu0 %v7476_v54 }
  0xdc   : > { %4628 = vmatprep.mubr.msk.bf16.mxu1 %vm7016_vm4, %v7408_v4 }
  0xe2   : > { %4574 = vmatmul.mubr.msk.bf16.gmra.mxu0 %vm7016_vm4, %v7498_v34 }
  0xe3   : > { %4631 = vmatmul.mubr.msk.bf16.gmra.mxu1 %vm7217_vm6, %v7500_v37  ;;  %4682 = vmatprep.mubr.msk.bf16.mxu0 %vm7217_vm6, %v7254_v1  ;;  %v573_v1 = vsel %vm538_vm0, %v570_v8, %v572_v58  ;;  %v9385_v8 = vrot.slane %v7111_v52, 7  ;;  %v504_v58 = vsel %vm441_vm1, %v501_v62, %v503_v29  ;;  %v6468_v52 = vld [vmem:[#allocation8 + $0x78] sm:$0xff]  }
  0xe4   : > { %4634 = vmatprep.mubr.msk.bf16.mxu1 %vm7016_vm4, %v7446_v60  ;;  %v7538_v12 = vpack.c.bf16 %v575_v3, %v573_v1  ;;  %5655 = vmatprep.subr.bf16.mxu1 %v6468_v52  ;;  %v6471_v1 = vld [vmem:[#allocation8 + $0x30] sm:$0xff]  }
  0xe5   : > { %v502_v10 = vsel %vm441_vm1, %v9385_v8, %v501_v62 }
  0xea   : > { %1702 = vmatmul.mubr.bf16.vlgmr.msra.gmra.mxu0 %v7028_v56  ;;  %v6456_v56 = vld [vmem:[#allocation6 + $0x220] sm:$0xff]  }
  0xeb   : > { %4637 = vmatmul.mubr.msk.bf16.gmra.mxu1 %vm7217_vm6, %v7523_v25  ;;  %6152 = vmatpush3.bf16.msra.mxu0 %v7250_v55  ;;  %v577_v55 = vsel %vm538_vm0, %v574_v35, %v576_v38  ;;  %v7602_v35 = vpack.c.bf16 %v504_v58, %v502_v10  ;;  %v9388_v38 = vld [vmem:[#allocation20_spill] sm:$0xff] }
  0xec   : > { %4640 = vmatprep.mubr.msk.bf16.mxu1 %vm7016_vm4, %v7470_v5  ;;  %4685 = vmatprep.mubr.msk.bf16.mxu0 %vm7217_vm6, %v7317_v6  ;;  %v7554_v28 = vpack.c.bf16 %v579_v11, %v577_v55 }
  0xed   : > { %6153 = vmatprep.subr.bf16.mxu0 %v6449_v41 }
  0xef   : > { %6154 = vmatpush3.bf16.msra.mxu0 %v6449_v41 }
  0xf0   : > { %6155 = vmatprep.subr.bf16.mxu0 %v6452_v39 }
  0xf2   : > { %1710 = vmatmul.mubr.bf16.gmra.mxu0 %v7080_v27 }
  0xf3   : > { %4643 = vmatmul.mubr.msk.bf16.gmra.mxu1 %vm7217_vm6, %v7538_v12  ;;  %4688 = vmatprep.mubr.msk.bf16.mxu0 %vm7217_vm6, %v7377_v63 }
  0xf4   : > { %4646 = vmatprep.mubr.msk.bf16.mxu1 %vm7016_vm4, %v7498_v34  ;;  %6156 = vmatpush3.bf16.msra.mxu0 %v6452_v39 }
  0xf5   : > { %6157 = vmatprep.subr.bf16.mxu0 %v6456_v56 }
  0xf8   : > { %6158 = vmatpush3.bf16.msra.mxu0 %v6456_v56 }
  0xf9   : > { %6159 = vmatprep.subr.bf16.mxu0 %v6464_v9 }
  0xfa   : > { %1718 = vmatmul.mubr.bf16.gmra.mxu0 %v7124_v2 }
  0xfb   : > { %4649 = vmatmul.mubr.msk.bf16.gmra.mxu1 %vm7217_vm6, %v7554_v28  ;;  %4691 = vmatprep.mubr.msk.bf16.mxu0 %vm7217_vm6, %v7410_v23 }
  0xfc   : > { %4652 = vmatprep.mubr.msk.bf16.mxu1 %vm7016_vm4, %v7012_v49  ;;  %6160 = vmatpush3.bf16.msra.mxu0 %v6464_v9  ;;  %v9389_v9 = vld [vmem:[#allocation21_spill] sm:$0xff] }
  0xfd   : > { %6161 = vmatprep.subr.bf16.mxu0 %v6465_v40 }
 0x100   : > { %6162 = vmatpush3.bf16.msra.mxu0 %v6465_v40 }
 0x101   : > { %6163 = vmatprep.subr.bf16.mxu0 %v6466_v46 }
 0x102   : > { %1726 = vmatmul.mubr.bf16.gmra.mxu0 %v7168_v50 }
 0x103   : > { %4655 = vmatmul.mubr.msk.bf16.gmra.mxu1 %vm7217_vm6, %v7297_v59  ;;  %4694 = vmatprep.mubr.msk.bf16.mxu0 %vm7217_vm6, %v7448_v0 }
 0x104   : > { %4658 = vmatprep.mubr.msk.bf16.mxu1 %vm7016_vm4, %v7072_v16  ;;  %6164 = vmatpush3.bf16.msra.mxu0 %v6466_v46  ;;  %v9390_v46 = vrot.slane %v7329_v57, 1 }
 0x105   : > { %6165 = vmatprep.subr.bf16.mxu0 %v6467_v24 }
 0x108   : > { %6166 = vmatpush3.bf16.msra.mxu0 %v6467_v24 }
 0x10a   : > { %1734 = vmatmul.mubr.bf16.gmra.mxu0 %v7213_v15 }
 0x10b   : > { %4661 = vmatmul.mubr.msk.bf16.gmra.mxu1 %vm7217_vm6, %v7067_v14  ;;  %4697 = vmatprep.mubr.msk.bf16.mxu0 %vm7217_vm6, %v7472_v32 }
 0x10c   : > { %4664 = vmatprep.mubr.msk.bf16.mxu1 %vm7016_vm4, %v7118_v53 }
 0x112   : > { %1742 = vmatmul.mubr.bf16.gmra.mxu0 %v7260_v26 }
 0x113   : > { %4667 = vmatmul.mubr.msk.bf16.gmra.mxu1 %vm7217_vm6, %v7140_v22  ;;  %4700 = vmatprep.mubr.msk.bf16.mxu0 %vm7217_vm6, %v7500_v37 }
 0x114   : > { %4670 = vmatprep.mubr.msk.bf16.mxu1 %vm7016_vm4, %v7164_v30 }
 0x11a   : > { %1750 = vmatmul.mubr.bf16.gmra.mxu0 %v7323_v33 }
 0x11b   : > { %4673 = vmatmul.mubr.msk.bf16.gmra.mxu1 %vm7217_vm6, %v7300_v43  ;;  %4703 = vmatprep.mubr.msk.bf16.mxu0 %vm7217_vm6, %v7523_v25 }
 0x11c   : > { %4676 = vmatprep.mubr.msk.bf16.mxu1 %vm7016_vm4, %v7602_v35 }
 0x122   : > { %1758 = vmatmul.mubr.bf16.gmra.mxu0 %v7382_v20 }
 0x123   : > { %4679 = vmatmul.mubr.msk.bf16.gmra.mxu1 %vm7217_vm6, %v7373_v21  ;;  %4706 = vmatprep.mubr.msk.bf16.mxu0 %vm7217_vm6, %v7538_v12 }
 0x124   : > { %1862 = vmatprep.mubr.bf16.mxu1 %v7080_v27  ;;  %v9386_v27 = vld [vmem:[#allocation23_spill] sm:$0xff] }
 0x12a   : > { %1766 = vmatmul.mubr.bf16.gmra.mxu0 %v7414_v48 }
 0x12b   : > { %4730 = vmatmul.mubr.msk.bf16.vlgmr.msra.gmra.mxu1 %vm7016_vm4, %v7116_v42  ;;  %4709 = vmatprep.mubr.msk.bf16.mxu0 %vm7217_vm6, %v7554_v28  ;;  %v6469_v42 = vld [vmem:[#allocation8 + $0x38] sm:$0xff]  }
 0x12c   : > { %1870 = vmatprep.mubr.bf16.mxu1 %v7124_v2  ;;  %5656 = vmatpush3.bf16.msra.mxu1 %v6469_v42  ;;  %v9387_v2 = vld [vmem:[#allocation16_spill] sm:$0xff] }
 0x132   : > { %1774 = vmatmul.mubr.bf16.gmra.mxu0 %v7452_v45 }
 0x133   : > { %4733 = vmatmul.mubr.msk.bf16.gmra.mxu1 %vm7016_vm4, %v7162_v47  ;;  %4712 = vmatprep.mubr.msk.bf16.mxu0 %vm7217_vm6, %v7297_v59 }
 0x134   : > { %1878 = vmatprep.mubr.bf16.mxu1 %v7168_v50 }
 0x13a   : > { %1782 = vmatmul.mubr.bf16.gmra.mxu0 %v7476_v54 }
 0x13b   : > { %4736 = vmatmul.mubr.msk.bf16.gmra.mxu1 %vm7016_vm4, %v9386_v27  ;;  %4715 = vmatprep.mubr.msk.bf16.mxu0 %vm7217_vm6, %v7067_v14 }
 0x13c   : > { %1886 = vmatprep.mubr.bf16.mxu1 %v7213_v15  ;;  %v6470_v15 = vld [vmem:[#allocation8 + $0x70] sm:$0xff]  }
 0x13d   : > { %5657 = vmatprep.subr.bf16.mxu1 %v6470_v15  ;;  %v6472_v15 = vld [vmem:[#allocation8 + $0x68] sm:$0xff]  }
 0x13e   : > { %5658 = vmatpush3.bf16.msra.mxu1 %v6471_v1 }
 0x13f   : > { %5659 = vmatprep.subr.bf16.mxu1 %v6472_v15  ;;  %v6474_v15 = vld [vmem:[#allocation8 + $0x60] sm:$0xff]  }
 0x142   : > { %1790 = vmatmul.mubr.bf16.gmra.mxu0 %v9387_v2 }
 0x143   : > { %4739 = vmatmul.mubr.msk.bf16.gmra.mxu1 %vm7016_vm4, %v7252_v7  ;;  %4718 = vmatprep.mubr.msk.bf16.mxu0 %vm7217_vm6, %v7140_v22 }
 0x144   : > { %1894 = vmatprep.mubr.bf16.mxu1 %v7260_v26 }
 0x14a   : > { %v5199_v47 = vpop.f32.mrf.mxu0  ;;  %1798 = vmatmul.mubr.bf16.gmra.mxu0 %v9388_v38 }
 0x14b   : > { %v5271_v50 = vpop.f32.mrf.mxu1  ;;  %4742 = vmatmul.mubr.msk.bf16.gmra.mxu1 %vm7016_vm4, %v7315_v31  ;;  %4721 = vmatprep.mubr.msk.bf16.mxu0 %vm7217_vm6, %v7300_v43  ;;  %v600_v31 = vrot.slane %v7503_v44, 1 }
 0x14c   : > { %1902 = vmatprep.mubr.bf16.mxu1 %v7323_v33  ;;  %v5200_v7 = vpop.f32.mrf.mxu0 }
 0x14d   : > { %v5272_v13 = vpop.f32.mrf.mxu1  ;;  %v7662_v36 = vadd.f32 %v5200_v7, %v5199_v47  ;;  %v601_v24 = vsel %vm538_vm0, %v9390_v46, %v600_v31  ;;  %v634_v62 = vsel %vm538_vm0, %v600_v31, 0.0 }
 0x14e   : > { %v7664_v26 = vadd.f32 %v5272_v13, %v5271_v50  ;;  %v5202_v41 = vpop.f32.mrf.mxu0  ;;  %v7687_v58 = vpack.c.bf16 %v634_v62, %v601_v24  ;;  %v9391_v50 = vld [vmem:[#allocation22_spill] sm:$0xff] }
 0x14f   : > { %v5274_v39 = vpop.f32.mrf.mxu1 }
 0x150   : > { %v5203_v3 = vpop.f32.mrf.mxu0 }
 0x151   : > { %v5275_v56 = vpop.f32.mrf.mxu1  ;;  %v7667_v55 = vadd.f32 %v5203_v3, %v5202_v41 }
 0x152   : > { %v7669_v19 = vadd.f32 %v5275_v56, %v5274_v39  ;;  %v5205_v33 = vpop.f32.mrf.mxu0  ;;  %1806 = vmatmul.mubr.bf16.gmra.mxu0 %v9389_v9  ;;  %v6473_v56 = vld [vmem:[#allocation8 + $0x28] sm:$0xff]  }
 0x153   : > { %v5277_v11 = vpop.f32.mrf.mxu1  ;;  %4745 = vmatmul.mubr.msk.bf16.gmra.mxu1 %vm7016_vm4, %v7375_v61  ;;  %4724 = vmatprep.mubr.msk.bf16.mxu0 %vm7217_vm6, %v7373_v21 }
 0x154   : > { %1910 = vmatprep.mubr.bf16.mxu1 %v7382_v20  ;;  %v5206_v44 = vpop.f32.mrf.mxu0  ;;  %5660 = vmatpush3.bf16.msra.mxu1 %v6473_v56 }
 0x155   : > { %v5278_v40 = vpop.f32.mrf.mxu1  ;;  %v7683_v29 = vadd.f32 %v5206_v44, %v5205_v33  ;;  %5661 = vmatprep.subr.bf16.mxu1 %v6474_v15 }
 0x156   : > { %v7685_v8 = vadd.f32 %v5278_v40, %v5277_v11  ;;  %v5208_v10 = vpop.f32.mrf.mxu0 }
 0x157   : > { %v5280_v61 = vpop.f32.mrf.mxu1 }
 0x158   : > { %v5209_v27 = vpop.f32.mrf.mxu0 }
 0x159   : > { %v5281_v52 = vpop.f32.mrf.mxu1  ;;  %v7689_v42 = vadd.f32 %v5209_v27, %v5208_v10 }
 0x15a   : > { %v7691_v20 = vadd.f32 %v5281_v52, %v5280_v61  ;;  %v5211_v47 = vpop.f32.mrf.mxu0  ;;  %1814 = vmatmul.mubr.bf16.gmra.mxu0 %v9391_v50 }
 0x15b   : > { %v5283_v57 = vpop.f32.mrf.mxu1  ;;  %4748 = vmatmul.mubr.msk.bf16.gmra.mxu1 %vm7016_vm4, %v7408_v4  ;;  %4727 = vmatprep.mubr.msk.bf16.mxu0 %vm7217_vm6, %v7687_v58 }
 0x15c   : > { %1918 = vmatprep.mubr.bf16.mxu1 %v7414_v48  ;;  %v5212_v7 = vpop.f32.mrf.mxu0 }
 0x15d   : > { %v5284_v13 = vpop.f32.mrf.mxu1  ;;  %v7701_v41 = vadd.f32 %v5212_v7, %v5211_v47 }
 0x15e   : > { %v7703_v39 = vadd.f32 %v5284_v13, %v5283_v57  ;;  %v5214_v1 = vpop.f32.mrf.mxu0 }
 0x15f   : > { %v5286_v3 = vpop.f32.mrf.mxu1 }
 0x160   : > { %v5215_v31 = vpop.f32.mrf.mxu0 }
 0x161   : > { %v5287_v33 = vpop.f32.mrf.mxu1  ;;  %v7705_v4 = vadd.f32 %v5215_v31, %v5214_v1 }
 0x162   : > { %v7707_v11 = vadd.f32 %v5287_v33, %v5286_v3  ;;  %v5217_v44 = vpop.f32.mrf.mxu0  ;;  %1822 = vmatmul.mubr.bf16.gmra.mxu0 %v7507_v18 }
 0x163   : > { %v5289_v48 = vpop.f32.mrf.mxu1  ;;  %4751 = vmatmul.mubr.msk.bf16.gmra.mxu1 %vm7016_vm4, %v7446_v60  ;;  %6167 = vmatprep.mubr.msk.bf16.mxu0 %vm7217_vm6, %v7317_v6  ;;  %v7728_v60 = vld [vmem:[%s9277_s2] ss:$0 sm:$0xff] }
 0x164   : > { %1926 = vmatprep.mubr.bf16.mxu1 %v7452_v45  ;;  %v5218_v40 = vpop.f32.mrf.mxu0  ;;  %v1382_v1 = vadd.f32 %v7662_v36, %v7728_v60 }
 0x165   : > { %v5290_v46 = vpop.f32.mrf.mxu1  ;;  %v7717_v24 = vadd.f32 %v5218_v40, %v5217_v44 }
 0x166   : > { %v7719_v62 = vadd.f32 %v5290_v46, %v5289_v48  ;;  %v5220_v10 = vpop.f32.mrf.mxu0 }
 0x167   : > { %v5292_v61 = vpop.f32.mrf.mxu1 }
 0x168   : > { %v5221_v27 = vpop.f32.mrf.mxu0 }
 0x169   : > { %v5293_v52 = vpop.f32.mrf.mxu1  ;;  %v7721_v47 = vadd.f32 %v5221_v27, %v5220_v10  ;;  %v1390_v27 = vadd.f32 %v7683_v29, %v7728_v60 }
 0x16a   : > { %v7723_v57 = vadd.f32 %v5293_v52, %v5292_v61  ;;  %v5223_v6 = vpop.f32.mrf.mxu0  ;;  %6168 = vmatmul.mubr.msk.bf16.vlgmr.msra.gmra.mxu0 %vm7217_vm6, %v7377_v63  ;;  %v6475_v63 = vld [vmem:[#allocation8 + $0x20] sm:$0xff]  }
 0x16b   : > { %v5311_v45 = vpop.f32.mrf.mxu1  ;;  %4754 = vmatmul.mubr.msk.bf16.gmra.mxu1 %vm7016_vm4, %v7470_v5  ;;  %6171 = vmatprep.mubr.msk.bf16.mxu0 %vm7217_vm6, %v7410_v23  ;;  %v1385_v23 = vadd.f32 %v7667_v55, %v7728_v60 }
 0x16c   : > { %1934 = vmatprep.mubr.bf16.mxu1 %v7476_v54  ;;  %v5224_v7 = vpop.f32.mrf.mxu0  ;;  %5662 = vmatpush3.bf16.msra.mxu1 %v6475_v63 }
 0x16d   : > { %v5312_v13 = vpop.f32.mrf.mxu1  ;;  %v7742_v3 = vadd.f32 %v5224_v7, %v5223_v6 }
 0x16e   : > { %v5313_v56 = vadd.f32 %v5312_v13, %v5311_v45  ;;  %v5226_v5 = vpop.f32.mrf.mxu0 }
 0x16f   : > { %v5314_v31 = vpop.f32.mrf.mxu1 }
 0x170   : > { %v7744_v33 = vadd.f32 %v5313_v56, %v1382_v1  ;;  %v5227_v54 = vpop.f32.mrf.mxu0 }
 0x171   : > { %v5315_v44 = vpop.f32.mrf.mxu1  ;;  %v7748_v48 = vadd.f32 %v5227_v54, %v5226_v5  ;;  %v6477_v5 = vld [vmem:[#allocation8 + $0xf8] sm:$0xff]   ;;  %v1398_v54 = vadd.f32 %v7701_v41, %v7728_v60 }
 0x172   : > { %v5316_v40 = vadd.f32 %v5315_v44, %v5314_v31  ;;  %v5229_v46 = vpop.f32.mrf.mxu0  ;;  %6172 = vmatmul.mubr.msk.bf16.gmra.mxu0 %vm7217_vm6, %v7448_v0  ;;  %5767 = vmatprep.subr.bf16.mxu0 %v6477_v5 }
 0x173   : > { %v5317_v36 = vpop.f32.mrf.mxu1  ;;  %4757 = vmatmul.mubr.msk.bf16.gmra.mxu1 %vm7016_vm4, %v7498_v34  ;;  %6175 = vmatprep.mubr.msk.bf16.mxu0 %vm7217_vm6, %v7472_v32 }
 0x174   : > { %v7756_v10 = vadd.f32 %v5316_v40, %v1385_v23  ;;  %1942 = vmatprep.mubr.bf16.mxu1 %v9387_v2  ;;  %v5230_v55 = vpop.f32.mrf.mxu0  ;;  %v1393_v2 = vadd.f32 %v7689_v42, %v7728_v60  ;;  %v6476_v42 = vld [vmem:[#allocation8 + $0x58] sm:$0xff]  }
 0x175   : > { %v5318_v61 = vpop.f32.mrf.mxu1  ;;  %v7764_v52 = vadd.f32 %v5230_v55, %v5229_v46  ;;  %5663 = vmatprep.subr.bf16.mxu1 %v6476_v42  ;;  %v6479_v46 = vld [vmem:[#allocation8 + $0xb8] sm:$0xff]   ;;  %v1401_v55 = vadd.f32 %v7705_v4, %v7728_v60  ;;  %v6480_v4 = vld [vmem:[#allocation8 + $0xf0] sm:$0xff]  }
 0x176   : > { %v5319_v34 = vadd.f32 %v5318_v61, %v5317_v36  ;;  %v5232_v6 = vpop.f32.mrf.mxu0  ;;  %5768 = vmatpush3.bf16.msra.mxu0 %v6479_v46 }
 0x177   : > { %v5320_v45 = vpop.f32.mrf.mxu1  ;;  %5769 = vmatprep.subr.bf16.mxu0 %v6480_v4 }
 0x178   : > { %v7766_v15 = vadd.f32 %v5319_v34, %v1390_v27  ;;  %v5233_v0 = vpop.f32.mrf.mxu0 }
 0x179   : > { %v5321_v7 = vpop.f32.mrf.mxu1  ;;  %v7770_v13 = vadd.f32 %v5233_v0, %v5232_v6 }
 0x17a   : > { %v5322_v32 = vadd.f32 %v5321_v7, %v5320_v45  ;;  %v5235_v1 = vpop.f32.mrf.mxu0  ;;  %6176 = vmatmul.mubr.msk.bf16.gmra.mxu0 %vm7217_vm6, %v7500_v37  ;;  %v1406_v7 = vadd.f32 %v7717_v24, %v7728_v60 }
 0x17b   : > { %v5323_v56 = vpop.f32.mrf.mxu1  ;;  %4760 = vmatmul.mubr.msk.bf16.gmra.mxu1 %vm7016_vm4, %v7012_v49  ;;  %6179 = vmatprep.mubr.msk.bf16.mxu0 %vm7217_vm6, %v7523_v25 }
 0x17c   : > { %v7778_v29 = vadd.f32 %v5322_v32, %v1393_v2  ;;  %1950 = vmatprep.mubr.bf16.mxu1 %v9388_v38  ;;  %v5236_v31 = vpop.f32.mrf.mxu0  ;;  %v6478_v38 = vld [vmem:[#allocation8 + $0x18] sm:$0xff]  }
 0x17d   : > { %v5324_v63 = vpop.f32.mrf.mxu1  ;;  %v7786_v49 = vadd.f32 %v5236_v31, %v5235_v1  ;;  %5664 = vmatpush3.bf16.msra.mxu1 %v6478_v38  ;;  %v1414_v38 = vadd.f32 %v7742_v3, %v7728_v60 }
 0x17e   : > { %v5325_v44 = vadd.f32 %v5324_v63, %v5323_v56  ;;  %v5238_v37 = vpop.f32.mrf.mxu0  ;;  %v6481_v56 = vld [vmem:[#allocation8 + $0xb0] sm:$0xff]  }
 0x17f   : > { %v5326_v23 = vpop.f32.mrf.mxu1  ;;  %5770 = vmatpush3.bf16.msra.mxu0 %v6481_v56 }
 0x180   : > { %v7788_v40 = vadd.f32 %v5325_v44, %v1398_v54  ;;  %v5239_v36 = vpop.f32.mrf.mxu0  ;;  %v6483_v44 = vld [vmem:[#allocation8 + $0xe8] sm:$0xff]  }
 0x181   : > { %v5327_v25 = vpop.f32.mrf.mxu1  ;;  %v7792_v61 = vadd.f32 %v5239_v36, %v5238_v37  ;;  %5771 = vmatprep.subr.bf16.mxu0 %v6483_v44 }
 0x182   : > { %v5328_v27 = vadd.f32 %v5327_v25, %v5326_v23  ;;  %v5241_v41 = vpop.f32.mrf.mxu0  ;;  %6180 = vmatmul.mubr.msk.bf16.gmra.mxu0 %vm7217_vm6, %v7538_v12  ;;  %v6484_v25 = vld [vmem:[#allocation8 + $0x10] sm:$0xff]  }
 0x183   : > { %v5329_v34 = vpop.f32.mrf.mxu1  ;;  %4763 = vmatmul.mubr.msk.bf16.gmra.mxu1 %vm7016_vm4, %v7072_v16  ;;  %6183 = vmatprep.mubr.msk.bf16.mxu0 %vm7217_vm6, %v7554_v28  ;;  %v1409_v28 = vadd.f32 %v7721_v47, %v7728_v60  ;;  %v6482_v47 = vld [vmem:[#allocation8 + $0x50] sm:$0xff]  }
 0x184   : > { %v7800_v6 = vadd.f32 %v5328_v27, %v1401_v55  ;;  %1958 = vmatprep.mubr.bf16.mxu1 %v9389_v9  ;;  %v5242_v45 = vpop.f32.mrf.mxu0  ;;  %5665 = vmatprep.subr.bf16.mxu1 %v6482_v47  ;;  %v6485_v55 = vld [vmem:[#allocation8 + $0xa8] sm:$0xff]   ;;  %v6489_v47 = vld [vmem:[#allocation8 + $0xd8] sm:$0xff]  }
 0x185   : > { %v5330_v0 = vpop.f32.mrf.mxu1  ;;  %v7808_v2 = vadd.f32 %v5242_v45, %v5241_v41  ;;  %v1417_v41 = vadd.f32 %v7748_v48, %v7728_v60  ;;  %5666 = vmatpush3.bf16.msra.mxu1 %v6484_v25  ;;  %5772 = vmatpush3.bf16.msra.mxu0 %v6485_v55  ;;  %v6486_v48 = vld [vmem:[#allocation8 + $0xe0] sm:$0xff]   ;;  %v6490_v25 = vld [vmem:[#allocation8 + $0x8] sm:$0xff]   ;;  %v6491_v55 = vld [vmem:[#allocation8 + $0x98] sm:$0xff]  }
 0x186   : > { %v5331_v16 = vadd.f32 %v5330_v0, %v5329_v34  ;;  %v5244_v32 = vpop.f32.mrf.mxu0  ;;  %5773 = vmatprep.subr.bf16.mxu0 %v6486_v48  ;;  %v6492_v48 = vld [vmem:[#allocation8 + $0xd0] sm:$0xff]  }
 0x187   : > { %v5332_v12 = vpop.f32.mrf.mxu1 }
 0x188   : > { %v7810_v1 = vadd.f32 %v5331_v16, %v1406_v7  ;;  %v5245_v9 = vpop.f32.mrf.mxu0  ;;  %v1422_v16 = vadd.f32 %v7764_v52, %v7728_v60 }
 0x189   : > { %v5333_v42 = vpop.f32.mrf.mxu1  ;;  %v7814_v5 = vadd.f32 %v5245_v9, %v5244_v32 }
 0x18a   : > { %v5334_v31 = vadd.f32 %v5333_v42, %v5332_v12  ;;  %v5247_v63 = vpop.f32.mrf.mxu0  ;;  %6184 = vmatmul.mubr.msk.bf16.gmra.mxu0 %vm7217_vm6, %v7297_v59 }
 0x18b   : > { %v5335_v24 = vpop.f32.mrf.mxu1  ;;  %4766 = vmatmul.mubr.msk.bf16.gmra.mxu1 %vm7016_vm4, %v7118_v53  ;;  %6187 = vmatprep.mubr.msk.bf16.mxu0 %vm7217_vm6, %v7067_v14 }
 0x18c   : > { %v7822_v54 = vadd.f32 %v5334_v31, %v1409_v28  ;;  %1966 = vmatprep.mubr.bf16.mxu1 %v9391_v50  ;;  %v5248_v37 = vpop.f32.mrf.mxu0 }
 0x18d   : > { %v5336_v23 = vpop.f32.mrf.mxu1  ;;  %v7830_v53 = vadd.f32 %v5248_v37, %v5247_v63 }
 0x18e   : > { %v5337_v46 = vadd.f32 %v5336_v23, %v5335_v24  ;;  %v7832_v59 = vpop.f32.mrf.mxu0  ;;  %v9392_v24 = vmov 0.0|0.0   ;;  %v1430_v23 = vadd.f32 %v7786_v49, %v7728_v60 }
 0x18f   : > { %v5338_v36 = vpop.f32.mrf.mxu1 }
 0x190   : > { %v7834_v50 = vadd.f32 %v5337_v46, %v1414_v38  ;;  %v7836_v14 = vpop.f32.mrf.mxu0 }
 0x191   : > { %v5339_v27 = vpop.f32.mrf.mxu1 }
 0x192   : > { %v5340_v34 = vadd.f32 %v5339_v27, %v5338_v36  ;;  %v5253_v3 = vpop.f32.mrf.mxu0  ;;  %6188 = vmatmul.mubr.msk.bf16.gmra.mxu0 %vm7217_vm6, %v7140_v22 }
 0x193   : > { %v5341_v4 = vpop.f32.mrf.mxu1  ;;  %4769 = vmatmul.mubr.msk.bf16.gmra.mxu1 %vm7016_vm4, %v7164_v30  ;;  %6191 = vmatprep.mubr.msk.bf16.mxu0 %vm7217_vm6, %v7300_v43  ;;  %v1425_v43 = vadd.f32 %v7770_v13, %v7728_v60  ;;  %v6488_v13 = vld [vmem:[#allocation8 + $0x48] sm:$0xff]  }
 0x194   : > { %v7846_v45 = vadd.f32 %v5340_v34, %v1417_v41  ;;  %1974 = vmatprep.mubr.bf16.mxu1 %v7507_v18  ;;  %v5254_v0 = vpop.f32.mrf.mxu0  ;;  %v6487_v18 = vld [vmem:[#allocation8 + $0xa0] sm:$0xff]   ;;  %5667 = vmatprep.subr.bf16.mxu1 %v6488_v13  ;;  %v1433_v41 = vadd.f32 %v7792_v61, %v7728_v60 }
 0x195   : > { %v5342_v7 = vpop.f32.mrf.mxu1  ;;  %v7854_v32 = vadd.f32 %v5254_v0, %v5253_v3  ;;  %5774 = vmatpush3.bf16.msra.mxu0 %v6487_v18  ;;  %5668 = vmatpush3.bf16.msra.mxu1 %v6490_v25  ;;  %v5252_v25 = vadd.f32 %v7836_v14, %v7832_v59 }
 0x196   : > { %v5343_v30 = vadd.f32 %v5342_v7, %v5341_v4  ;;  %v7856_v12 = vpop.f32.mrf.mxu0  ;;  %5775 = vmatprep.subr.bf16.mxu0 %v6489_v47 }
 0x197   : > { %v5344_v22 = vpop.f32.mrf.mxu1 }
 0x198   : > { %v7858_v56 = vadd.f32 %v5343_v30, %v1422_v16  ;;  %v7860_v9 = vpop.f32.mrf.mxu0  ;;  %v1438_v16 = vadd.f32 %v7808_v2, %v7728_v60 }
 0x199   : > { %v5345_v42 = vpop.f32.mrf.mxu1  ;;  %5776 = vmatpush3.bf16.msra.mxu0 %v6491_v55 }
 0x19a   : > { %v5346_v28 = vadd.f32 %v5345_v42, %v5344_v22  ;;  %v5259_v31 = vpop.f32.mrf.mxu0  ;;  %6192 = vmatmul.mubr.msk.bf16.gmra.mxu0 %vm7217_vm6, %v7373_v21  ;;  %5777 = vmatprep.subr.bf16.mxu0 %v6492_v48  ;;  %v6495_v48 = vld [vmem:[#allocation8 + $0xc8] sm:$0xff]  }
 0x19b   : > { %v5347_v52 = vpop.f32.mrf.mxu1  ;;  %4772 = vmatmul.mubr.msk.bf16.gmra.mxu1 %vm7016_vm4, %v7602_v35  ;;  %6195 = vmatprep.mubr.msk.bf16.mxu0 %vm7217_vm6, %v7687_v58 }
 0x19c   : > { %v7870_v63 = vadd.f32 %v5346_v28, %v1425_v43  ;;  %1982 = vmatprep.mubr.bf16.mxu1 %v9392_v24  ;;  %v5260_v44 = vpop.f32.mrf.mxu0  ;;  %v6493_v43 = vld [vmem:[#allocation8 + $0x90] sm:$0xff]  }
 0x19d   : > { %v5348_v37 = vpop.f32.mrf.mxu1  ;;  %v7878_v35 = vadd.f32 %v5260_v44, %v5259_v31  ;;  %5778 = vmatpush3.bf16.msra.mxu0 %v6493_v43 }
 0x19e   : > { %v5349_v38 = vadd.f32 %v5348_v37, %v5347_v52  ;;  %v7880_v21 = vpop.f32.mrf.mxu0  ;;  %v1441_v52 = vadd.f32 %v7814_v5, %v7728_v60  ;;  %5779 = vmatprep.subr.bf16.mxu0 %v6495_v48 }
 0x19f   : > { %v5350_v46 = vpop.f32.mrf.mxu1 }
 0x1a0   : > { %v7882_v36 = vadd.f32 %v5349_v38, %v1430_v23  ;;  %v7884_v58 = vpop.f32.mrf.mxu0  ;;  %v6494_v38 = vld [vmem:[#allocation8 + $0x40] sm:$0xff]  }
 0x1a1   : > { %v5351_v27 = vpop.f32.mrf.mxu1  ;;  %5669 = vmatprep.subr.bf16.mxu1 %v6494_v38 }
 0x1a2   : > { %v5352_v34 = vadd.f32 %v5351_v27, %v5350_v46  ;;  %v5265_v49 = vpop.f32.mrf.mxu0  ;;  %6196 = vmatmul.mubr.bf16.gmra.mxu0 %v9392_v24  ;;  %v1446_v46 = vadd.f32 %v7830_v53, %v7728_v60  ;;  %v1449_v53 = vadd.f32 %v5252_v25, %v7728_v60 }
 0x1a3   : > { %v5353_v3 = vpop.f32.mrf.mxu1  ;;  %1983 = vmatmul.mubr.bf16.gmra.mxu1 %v9392_v24 }
 0x1a4   : > { %v7890_v4 = vadd.f32 %v5352_v34, %v1433_v41  ;;  %3135 = vmatprep.mubr.bf16.mxu1 %v9392_v24  ;;  %v5266_v0 = vpop.f32.mrf.mxu0  ;;  %v6496_v41 = vld [vmem:[#allocation8] sm:$0xff]  }
 0x1a5   : > { %v5354_v7 = vpop.f32.mrf.mxu1  ;;  %v7895_v61 = vadd.f32 %v5266_v0, %v5265_v49  ;;  %5670 = vmatpush3.bf16.msra.mxu1 %v6496_v41 }
 0x1a6   : > { %v5355_v30 = vadd.f32 %v5354_v7, %v5353_v3  ;;  %v7897_v22 = vpop.f32.mrf.mxu0 }
 0x1a7   : > { %v5356_v18 = vpop.f32.mrf.mxu1 }
 0x1a8   : > { %v7899_v42 = vadd.f32 %v5355_v30, %v1438_v16  ;;  %v7901_v28 = vpop.f32.mrf.mxu0 }
 0x1a9   : > { %v5357_v31 = vpop.f32.mrf.mxu1 }
 0x1aa   : > { %v5358_v13 = vadd.f32 %v5357_v31, %v5356_v18  ;;  %v5423_v2 = vpop.f32.mrf.mxu0  ;;  %v6497_v18 = vld [vmem:[#allocation8 + $0x88] sm:$0xff]  }
 0x1ab   : > { %v5359_v47 = vpop.f32.mrf.mxu1  ;;  %3136 = vmatmul.mubr.bf16.vlgmr.msra.gmra.mxu1 %v9392_v24  ;;  %5780 = vmatpush3.bf16.msra.mxu0 %v6497_v18 }
 0x1ac   : > { %v7905_v44 = vadd.f32 %v5358_v13, %v1441_v52  ;;  %v5424_v23 = vpop.f32.mrf.mxu0  ;;  %v1454_v13 = vadd.f32 %v7854_v32, %v7728_v60 }
 0x1ad   : > { %v5360_v37 = vpop.f32.mrf.mxu1  ;;  %v5425_v27 = vadd.f32 %v5424_v23, %v5423_v2 }
 0x1ae   : > { %v5361_v55 = vadd.f32 %v5360_v37, %v5359_v47  ;;  %v5426_v5 = vpop.f32.mrf.mxu0  ;;  %v5258_v47 = vadd.f32 %v7860_v9, %v7856_v12 }
 0x1af   : > { %v5362_v34 = vpop.f32.mrf.mxu1  ;;  %v7914_v3 = vadd.f32 %v5425_v27, %v7744_v33 }
 0x1b0   : > { %v7911_v49 = vadd.f32 %v5361_v55, %v1446_v46  ;;  %v5427_v7 = vpop.f32.mrf.mxu0  ;;  %v6498_v46 = vld [vmem:[#allocation8 + $0xc0] sm:$0xff]  }
 0x1b1   : > { %v5363_v0 = vpop.f32.mrf.mxu1  ;;  %v5428_v30 = vadd.f32 %v5427_v7, %v5426_v5  ;;  %5781 = vmatprep.subr.bf16.mxu0 %v6498_v46 }
 0x1b2   : > { %v5364_v16 = vadd.f32 %v5363_v0, %v5362_v34  ;;  %v5429_v14 = vpop.f32.mrf.mxu0  ;;  %v1457_v34 = vadd.f32 %v5258_v47, %v7728_v60  ;;  %v6500_v47 = vld [vmem:[#allocation8 + $0x178] sm:$0xff]  }
 0x1b3   : > { %v5365_v59 = vpop.f32.mrf.mxu1  ;;  %v7921_v31 = vadd.f32 %v5428_v30, %v7756_v10  ;;  %v6499_v10 = vld [vmem:[#allocation8 + $0x80] sm:$0xff]   ;;  %5879 = vmatprep.subr.bf16.mxu1 %v6500_v47 }
 0x1b4   : > { %v7918_v43 = vadd.f32 %v5364_v16, %v1449_v53  ;;  %v5430_v52 = vpop.f32.mrf.mxu0  ;;  %5782 = vmatpush3.bf16.msra.mxu0 %v6499_v10  ;;  %v5264_v16 = vadd.f32 %v7884_v58, %v7880_v21 }
 0x1b5   : > { %v5366_v33 = vpop.f32.mrf.mxu1  ;;  %v5431_v37 = vadd.f32 %v5430_v52, %v5429_v14 }
 0x1b6   : > { %v5367_v2 = vadd.f32 %v5366_v33, %v5365_v59  ;;  %v5432_v38 = vpop.f32.mrf.mxu0 }
 0x1b7   : > { %v5368_v23 = vpop.f32.mrf.mxu1  ;;  %v7930_v55 = vadd.f32 %v5431_v37, %v7766_v15  ;;  %v1462_v15 = vadd.f32 %v7878_v35, %v7728_v60  ;;  %v1465_v37 = vadd.f32 %v5264_v16, %v7728_v60 }
 0x1b8   : > { %v7927_v25 = vadd.f32 %v5367_v2, %v1454_v13  ;;  %v5433_v41 = vpop.f32.mrf.mxu0  ;;  %v6501_v2 = vld [vmem:[#allocation8 + $0x1f8] sm:$0xff]  }
 0x1b9   : > { %v5369_v27 = vpop.f32.mrf.mxu1  ;;  %v5434_v5 = vadd.f32 %v5433_v41, %v5432_v38  ;;  %5991 = vmatprep.subr.bf16.mxu0 %v6501_v2  ;;  %v1470_v41 = vadd.f32 %v7895_v61, %v7728_v60 }
 0x1ba   : > { %v5370_v32 = vadd.f32 %v5369_v27, %v5368_v23  ;;  %v5435_v9 = vpop.f32.mrf.mxu0  ;;  %v6502_v27 = vld [vmem:[#allocation8 + $0x138] sm:$0xff]  }
 0x1bb   : > { %v5371_v12 = vpop.f32.mrf.mxu1  ;;  %v7936_v0 = vadd.f32 %v5434_v5, %v7778_v29  ;;  %5880 = vmatpush3.bf16.msra.mxu1 %v6502_v27 }
 0x1bc   : > { %v7933_v48 = vadd.f32 %v5370_v32, %v1457_v34  ;;  %v5436_v53 = vpop.f32.mrf.mxu0  ;;  %v5270_v34 = vadd.f32 %v7901_v28, %v7897_v22 }
 0x1bd   : > { %v5372_v7 = vpop.f32.mrf.mxu1  ;;  %v5437_v59 = vadd.f32 %v5436_v53, %v5435_v9 }
 0x1be   : > { %v5373_v30 = vadd.f32 %v5372_v7, %v5371_v12  ;;  %v5438_v18 = vpop.f32.mrf.mxu0  ;;  %v1473_v16 = vadd.f32 %v5270_v34, %v7728_v60 }
 0x1bf   : > { %v5374_v14 = vpop.f32.mrf.mxu1  ;;  %v7945_v52 = vadd.f32 %v5437_v59, %v7788_v40 }
 0x1c0   : > { %v7942_v33 = vadd.f32 %v5373_v30, %v1462_v15  ;;  %v5439_v29 = vpop.f32.mrf.mxu0 }
 0x1c1   : > { %v5375_v13 = vpop.f32.mrf.mxu1  ;;  %v5440_v35 = vadd.f32 %v5439_v29, %v5438_v18  ;;  %v1478_v29 = vadd.f32 %v7664_v26, %v7728_v60 }
 0x1c2   : > { %v5376_v23 = vadd.f32 %v5375_v13, %v5374_v14  ;;  %v5441_v46 = vpop.f32.mrf.mxu0 }
 0x1c3   : > { %v5377_v38 = vpop.f32.mrf.mxu1  ;;  %v7951_v58 = vadd.f32 %v5440_v35, %v7800_v6 }
 0x1c4   : > { %v7948_v21 = vadd.f32 %v5376_v23, %v1465_v37  ;;  %v5442_v40 = vpop.f32.mrf.mxu0 }
 0x1c5   : > { %v5378_v10 = vpop.f32.mrf.mxu1  ;;  %v5443_v5 = vadd.f32 %v5442_v40, %v5441_v46 }
 0x1c6   : > { %v5379_v32 = vadd.f32 %v5378_v10, %v5377_v38  ;;  %v5444_v9 = vpop.f32.mrf.mxu0  ;;  %v6504_v10 = vld [vmem:[#allocation8 + $0x170] sm:$0xff]  }
 0x1c7   : > { %v5380_v12 = vpop.f32.mrf.mxu1  ;;  %v7960_v53 = vadd.f32 %v5443_v5, %v7810_v1  ;;  %5881 = vmatprep.subr.bf16.mxu1 %v6504_v10 }
 0x1c8   : > { %v7957_v7 = vadd.f32 %v5379_v32, %v1470_v41  ;;  %v5445_v15 = vpop.f32.mrf.mxu0 }
 0x1c9   : > { %v5381_v6 = vpop.f32.mrf.mxu1  ;;  %v5446_v59 = vadd.f32 %v5445_v15, %v5444_v9  ;;  %v1486_v9 = vadd.f32 %v7685_v8, %v7728_v60 }
 0x1ca   : > { %v5382_v30 = vadd.f32 %v5381_v6, %v5380_v12  ;;  %v5447_v14 = vpop.f32.mrf.mxu0 }
 0x1cb   : > { %v5383_v61 = vpop.f32.mrf.mxu1  ;;  %v7966_v22 = vadd.f32 %v5446_v59, %v7822_v54  ;;  %v1481_v54 = vadd.f32 %v7669_v19, %v7728_v60 }
 0x1cc   : > { %v7963_v18 = vadd.f32 %v5382_v30, %v1473_v16  ;;  %v5448_v13 = vpop.f32.mrf.mxu0 }
 0x1cd   : > { %v5384_v28 = vpop.f32.mrf.mxu1  ;;  %v5449_v47 = vadd.f32 %v5448_v13, %v5447_v14 }
 0x1ce   : > { %v5385_v1 = vadd.f32 %v5384_v28, %v5383_v61  ;;  %v5450_v37 = vpop.f32.mrf.mxu0 }
 0x1cf   : > { %v5386_v2 = vpop.f32.mrf.mxu1  ;;  %v7973_v35 = vadd.f32 %v5449_v47, %v7834_v50  ;;  %v6506_v50 = vld [vmem:[#allocation8 + $0x130] sm:$0xff]  }
 0x1d0   : > { %v7970_v23 = vadd.f32 %v5385_v1, %v1478_v29  ;;  %v5451_v46 = vpop.f32.mrf.mxu0  ;;  %5882 = vmatpush3.bf16.msra.mxu1 %v6506_v50 }
 0x1d1   : > { %v5387_v38 = vpop.f32.mrf.mxu1  ;;  %v5452_v27 = vadd.f32 %v5451_v46, %v5450_v37 }
 0x1d2   : > { %v5388_v40 = vadd.f32 %v5387_v38, %v5386_v2  ;;  %v5453_v34 = vpop.f32.mrf.mxu0 }
 0x1d3   : > { %v5389_v41 = vpop.f32.mrf.mxu1  ;;  %v7980_v32 = vadd.f32 %v5452_v27, %v7846_v45  ;;  %v1489_v45 = vadd.f32 %v7691_v20, %v7728_v60 }
 0x1d4   : > { %v7977_v26 = vadd.f32 %v5388_v40, %v1481_v54  ;;  %v5454_v12 = vpop.f32.mrf.mxu0 }
 0x1d5   : > { %v5390_v5 = vpop.f32.mrf.mxu1  ;;  %v5455_v15 = vadd.f32 %v5454_v12, %v5453_v34  ;;  %v6508_v34 = vld [vmem:[#allocation8 + $0x168] sm:$0xff]  }
 0x1d6   : > { %v5391_v6 = vadd.f32 %v5390_v5, %v5389_v41  ;;  %v5456_v19 = vpop.f32.mrf.mxu0  ;;  %5883 = vmatprep.subr.bf16.mxu1 %v6508_v34 }
 0x1d7   : > { %v5392_v16 = vpop.f32.mrf.mxu1  ;;  %v7987_v59 = vadd.f32 %v5455_v15, %v7858_v56  ;;  %v1494_v56 = vadd.f32 %v7703_v39, %v7728_v60 }
 0x1d8   : > { %v7984_v30 = vadd.f32 %v5391_v6, %v1486_v9  ;;  %v5457_v14 = vpop.f32.mrf.mxu0 }
 0x1d9   : > { %v5393_v61 = vpop.f32.mrf.mxu1  ;;  %v5458_v13 = vadd.f32 %v5457_v14, %v5456_v19  ;;  %v1502_v19 = vadd.f32 %v7719_v62, %v7728_v60 }
 0x1da   : > { %v5394_v28 = vadd.f32 %v5393_v61, %v5392_v16  ;;  %v5459_v1 = vpop.f32.mrf.mxu0 }
 0x1db   : > { %v5395_v29 = vpop.f32.mrf.mxu1  ;;  %v7994_v47 = vadd.f32 %v5458_v13, %v7870_v63  ;;  %v1497_v63 = vadd.f32 %v7707_v11, %v7728_v60 }
 0x1dc   : > { %v7991_v8 = vadd.f32 %v5394_v28, %v1489_v45  ;;  %v5460_v37 = vpop.f32.mrf.mxu0 }
 0x1dd   : > { %v5396_v2 = vpop.f32.mrf.mxu1  ;;  %v5461_v46 = vadd.f32 %v5460_v37, %v5459_v1 }
 0x1de   : > { %v5397_v38 = vadd.f32 %v5396_v2, %v5395_v29  ;;  %v5462_v54 = vpop.f32.mrf.mxu0 }
 0x1df   : > { %v5398_v10 = vpop.f32.mrf.mxu1  ;;  %v8001_v20 = vadd.f32 %v5461_v46, %v7882_v36  ;;  %v6510_v36 = vld [vmem:[#allocation8 + $0x128] sm:$0xff]  }
 0x1e0   : > { %v7998_v40 = vadd.f32 %v5397_v38, %v1494_v56  ;;  %v5463_v41 = vpop.f32.mrf.mxu0  ;;  %5884 = vmatpush3.bf16.msra.mxu1 %v6510_v36 }
 0x1e1   : > { %v5399_v27 = vpop.f32.mrf.mxu1  ;;  %v5464_v12 = vadd.f32 %v5463_v41, %v5462_v54 }
 0x1e2   : > { %v5400_v5 = vadd.f32 %v5399_v27, %v5398_v10  ;;  %v5465_v9 = vpop.f32.mrf.mxu0 }
 0x1e3   : > { %v5401_v50 = vpop.f32.mrf.mxu1  ;;  %v8008_v6 = vadd.f32 %v5464_v12, %v7890_v4  ;;  %v1505_v4 = vadd.f32 %v7723_v57, %v7728_v60  ;;  %v6514_v12 = vld [vmem:[#allocation8 + $0x120] sm:$0xff]  }
 0x1e4   : > { %v8005_v39 = vadd.f32 %v5400_v5, %v1497_v63  ;;  %v5466_v16 = vpop.f32.mrf.mxu0  ;;  %v6512_v5 = vld [vmem:[#allocation8 + $0x160] sm:$0xff]  }
 0x1e5   : > { %v5402_v15 = vpop.f32.mrf.mxu1  ;;  %v5467_v14 = vadd.f32 %v5466_v16, %v5465_v9  ;;  %5885 = vmatprep.subr.bf16.mxu1 %v6512_v5 }
 0x1e6   : > { %v5403_v61 = vadd.f32 %v5402_v15, %v5401_v50  ;;  %v5468_v11 = vpop.f32.mrf.mxu0  ;;  %5886 = vmatpush3.bf16.msra.mxu1 %v6514_v12 }
 0x1e7   : > { %v5404_v45 = vpop.f32.mrf.mxu1  ;;  %v8015_v13 = vadd.f32 %v5467_v14, %v7899_v42 }
 0x1e8   : > { %v8012_v28 = vadd.f32 %v5403_v61, %v1502_v19  ;;  %v5469_v1 = vpop.f32.mrf.mxu0 }
 0x1e9   : > { %v5405_v29 = vpop.f32.mrf.mxu1  ;;  %v5470_v37 = vadd.f32 %v5469_v1, %v5468_v11 }
 0x1ea   : > { %v5406_v2 = vadd.f32 %v5405_v29, %v5404_v45  ;;  %v5471_v56 = vpop.f32.mrf.mxu0 }
 0x1eb   : > { %v8019_v38 = vpop.f32.mrf.mxu1  ;;  %v8024_v46 = vadd.f32 %v5470_v37, %v7905_v44 }
 0x1ec   : > { %v8021_v62 = vadd.f32 %v5406_v2, %v1505_v4  ;;  %v5472_v10 = vpop.f32.mrf.mxu0 }
 0x1ed   : > { %v8026_v54 = vpop.f32.mrf.mxu1  ;;  %v5473_v42 = vadd.f32 %v5472_v10, %v5471_v56  ;;  %v6516_v56 = vld [vmem:[#allocation8 + $0x158] sm:$0xff]  }
 0x1ee   : > { %v5474_v27 = vpop.f32.mrf.mxu0  ;;  %5887 = vmatprep.subr.bf16.mxu1 %v6516_v56 }
 0x1ef   : > { %v8028_v41 = vpop.f32.mrf.mxu1  ;;  %v8031_v34 = vadd.f32 %v5473_v42, %v7911_v49 }
 0x1f0   : > { %v5475_v57 = vpop.f32.mrf.mxu0 }
 0x1f1   : > { %v8033_v60 = vpop.f32.mrf.mxu1  ;;  %v5476_v63 = vadd.f32 %v5475_v57, %v5474_v27 }
 0x1f2   : > { %v5477_v50 = vpop.f32.mrf.mxu0 }
 0x1f3   : > { %v8035_v9 = vpop.f32.mrf.mxu1  ;;  %v8038_v44 = vadd.f32 %v5476_v63, %v7918_v43 }
 0x1f4   : > { %v5478_v15 = vpop.f32.mrf.mxu0 }
 0x1f5   : > { %v8040_v16 = vpop.f32.mrf.mxu1  ;;  %v5479_v36 = vadd.f32 %v5478_v15, %v5477_v50 }
 0x1f6   : > { %v5480_v49 = vpop.f32.mrf.mxu0 }
 0x1f7   : > { %v8042_v19 = vpop.f32.mrf.mxu1  ;;  %v8045_v61 = vadd.f32 %v5479_v36, %v7927_v25  ;;  %v6518_v25 = vld [vmem:[#allocation8 + $0x118] sm:$0xff]  }
 0x1f8   : > { %v5481_v14 = vpop.f32.mrf.mxu0  ;;  %5888 = vmatpush3.bf16.msra.mxu1 %v6518_v25 }
 0x1f9   : > { %9393 = vst [vmem:[#allocation23_spill] sm:$0xff] %v8045_v61  ;;  %v8047_v45 = vpop.f32.mrf.mxu1  ;;  %v5482_v11 = vadd.f32 %v5481_v14, %v5480_v49 }
 0x1fa   : > { %v5483_v29 = vpop.f32.mrf.mxu0 }
 0x1fb   : > { %v8049_v1 = vpop.f32.mrf.mxu1  ;;  %v8052_v43 = vadd.f32 %v5482_v11, %v7933_v48 }
 0x1fc   : > { %v5484_v4 = vpop.f32.mrf.mxu0 }
 0x1fd   : > { %9394 = vst [vmem:[#allocation16_spill] sm:$0xff] %v8052_v43  ;;  %v8054_v2 = vpop.f32.mrf.mxu1  ;;  %v5485_v37 = vadd.f32 %v5484_v4, %v5483_v29 }
 0x1fe   : > { %v5486_v10 = vpop.f32.mrf.mxu0 }
 0x1ff   : > { %v8056_v42 = vpop.f32.mrf.mxu1  ;;  %v8059_v27 = vadd.f32 %v5485_v37, %v7942_v33 }
 0x200   : > { %v5487_v57 = vpop.f32.mrf.mxu0 }
 0x201   : > { %9395 = vst [vmem:[#allocation20_spill] sm:$0xff] %v8059_v27  ;;  %v8061_v63 = vpop.f32.mrf.mxu1  ;;  %v5488_v5 = vadd.f32 %v5487_v57, %v5486_v10  ;;  %v6522_v27 = vld [vmem:[#allocation8 + $0x110] sm:$0xff]  }
 0x202   : > { %v5489_v48 = vpop.f32.mrf.mxu0 }
 0x203   : > { %v8063_v12 = vpop.f32.mrf.mxu1  ;;  %v8066_v50 = vadd.f32 %v5488_v5, %v7948_v21 }
 0x204   : > { %v5490_v15 = vpop.f32.mrf.mxu0 }
 0x205   : > { %9396 = vst [vmem:[#allocation21_spill] sm:$0xff] %v8066_v50  ;;  %v8068_v36 = vpop.f32.mrf.mxu1  ;;  %v5491_v49 = vadd.f32 %v5490_v15, %v5489_v48  ;;  %v6520_v48 = vld [vmem:[#allocation8 + $0x150] sm:$0xff]  }
 0x206   : > { %v5492_v14 = vpop.f32.mrf.mxu0  ;;  %5889 = vmatprep.subr.bf16.mxu1 %v6520_v48 }
 0x207   : > { %v8070_v11 = vpop.f32.mrf.mxu1  ;;  %v8073_v33 = vadd.f32 %v5491_v49, %v7957_v7  ;;  %5890 = vmatpush3.bf16.msra.mxu1 %v6522_v27 }
 0x208   : > { %v5493_v29 = vpop.f32.mrf.mxu0 }
 0x209   : > { %9397 = vst [vmem:[#allocation22_spill] sm:$0xff] %v8073_v33  ;;  %v8075_v4 = vpop.f32.mrf.mxu1  ;;  %v5494_v37 = vadd.f32 %v5493_v29, %v5492_v14 }
 0x20a   : > { %v5495_v56 = vpop.f32.mrf.mxu0 }
 0x20b   : > { %v8077_v10 = vpop.f32.mrf.mxu1  ;;  %v8080_v21 = vadd.f32 %v5494_v37, %v7963_v18 }
 0x20c   : > { %v5496_v25 = vpop.f32.mrf.mxu0 }
 0x20d   : > { %9398 = vst [vmem:[#allocation25_spill] sm:$0xff] %v8080_v21  ;;  %v5560_v57 = vpop.f32.mrf.mxu1  ;;  %v5497_v5 = vadd.f32 %v5496_v25, %v5495_v56 }
 0x20e   : > { %v5498_v15 = vpop.f32.mrf.mxu0 }
 0x20f   : > { %v8082_v50 = vpop.f32.mrf.mxu1  ;;  %v8085_v7 = vadd.f32 %v5497_v5, %v7970_v23 }
 0x210   : > { %v5499_v49 = vpop.f32.mrf.mxu0 }
 0x211   : > { %9399 = vst [vmem:[#allocation26_spill] sm:$0xff] %v8085_v7  ;;  %v5563_v14 = vpop.f32.mrf.mxu1  ;;  %v5500_v29 = vadd.f32 %v5499_v49, %v5498_v15 }
 0x212   : > { %v5501_v33 = vpop.f32.mrf.mxu0 }
 0x213   : > { %v5565_v17 = vpop.f32.mrf.mxu1  ;;  %v8088_v18 = vadd.f32 %v5500_v29, %v7977_v26  ;;  %v6524_v29 = vld [vmem:[#allocation8 + $0x148] sm:$0xff]  }
 0x214   : > { %v5502_v37 = vpop.f32.mrf.mxu0  ;;  %5891 = vmatprep.subr.bf16.mxu1 %v6524_v29 }
 0x215   : > { %9400 = vst [vmem:[#allocation27_spill] sm:$0xff] %v8088_v18  ;;  %v5566_v56 = vpop.f32.mrf.mxu1  ;;  %v5503_v25 = vadd.f32 %v5502_v37, %v5501_v33  ;;  %v6526_v33 = vld [vmem:[#allocation8 + $0x108] sm:$0xff]  }
 0x216   : > { %v5504_v21 = vpop.f32.mrf.mxu0  ;;  %5892 = vmatpush3.bf16.msra.mxu1 %v6526_v33 }
 0x217   : > { %v5568_v43 = vpop.f32.mrf.mxu1  ;;  %v8091_v61 = vadd.f32 %v5503_v25, %v7984_v30 }
 0x218   : > { %v5505_v23 = vpop.f32.mrf.mxu0 }
 0x219   : > { %9401 = vst [vmem:[#allocation28_spill] sm:$0xff] %v8091_v61  ;;  %v5569_v5 = vpop.f32.mrf.mxu1  ;;  %v5506_v48 = vadd.f32 %v5505_v23, %v5504_v21 }
 0x21a   : > { %v5507_v7 = vpop.f32.mrf.mxu0 }
 0x21b   : > { %v5571_v24 = vpop.f32.mrf.mxu1  ;;  %v8094_v27 = vadd.f32 %v5506_v48, %v7991_v8 }
 0x21c   : > { %v5508_v15 = vpop.f32.mrf.mxu0 }
 0x21d   : > { %9402 = vst [vmem:[#allocation29_spill] sm:$0xff] %v8094_v27  ;;  %v5572_v49 = vpop.f32.mrf.mxu1  ;;  %v5509_v26 = vadd.f32 %v5508_v15, %v5507_v7  ;;  %v5537_v7 = vadd.f32 %v8026_v54, %v8019_v38  ;;  %v5543_v27 = vadd.f32 %v8040_v16, %v8035_v9  ;;  %v5552_v9 = vadd.f32 %v8061_v63, %v8056_v42 }
 0x21e   : > { %v5510_v18 = vpop.f32.mrf.mxu0 }
 0x21f   : > { %v5574_v51 = vpop.f32.mrf.mxu1  ;;  %v8097_v37 = vadd.f32 %v5509_v26, %v7998_v40  ;;  %v5540_v26 = vadd.f32 %v8033_v60, %v8028_v41  ;;  %v5555_v41 = vadd.f32 %v8068_v36, %v8063_v12  ;;  %v1873_v16 = vadd.f32 %v5543_v27, %v7930_v55 }
 0x220   : > { %v5511_v30 = vpop.f32.mrf.mxu0  ;;  %v5567_v55 = vadd.f32 %v5566_v56, %v5565_v17  ;;  %v5570_v36 = vadd.f32 %v5569_v5, %v5568_v43  ;;  %v5573_v27 = vadd.f32 %v5572_v49, %v5571_v24 }
 0x221   : > { %v5575_v25 = vpop.f32.mrf.mxu1  ;;  %v5512_v21 = vadd.f32 %v5511_v30, %v5510_v18  ;;  %v5546_v18 = vadd.f32 %v8047_v45, %v8042_v19  ;;  %v5558_v19 = vadd.f32 %v8075_v4, %v8070_v11  ;;  %v5561_v45 = vadd.f32 %v5560_v57, %v8077_v10 }
 0x222   : > { %v5513_v23 = vpop.f32.mrf.mxu0  ;;  %v5576_v11 = vadd.f32 %v5575_v25, %v5574_v51  ;;  %v6530_v51 = vld [vmem:[#allocation8 + $0x100] sm:$0xff]   ;;  %v1905_v5 = vadd.f32 %v5567_v55, %v7987_v59  ;;  %v8144_v49 = vadd.f32 %v5570_v36, %v7994_v47 }
 0x223   : > { %v5577_v61 = vpop.f32.mrf.mxu1  ;;  %v8100_v8 = vadd.f32 %v5512_v21, %v8005_v39  ;;  %v5549_v39 = vadd.f32 %v8054_v2, %v8049_v1  ;;  %v1865_v21 = vadd.f32 %v5537_v7, %v7914_v3  ;;  %v1876_v2 = vadd.f32 %v5546_v18, %v7936_v0 }
 0x224   : > { %v5514_v48 = vpop.f32.mrf.mxu0  ;;  %v1868_v3 = vadd.f32 %v5540_v26, %v7921_v31  ;;  %v1889_v0 = vadd.f32 %v5555_v41, %v7960_v53  ;;  %v8133_v31 = vadd.f32 %v5552_v9, %v7951_v58  ;;  %v8137_v17 = vadd.f32 %v5561_v45, %v7973_v35 }
 0x225   : > { %v5578_v15 = vpop.f32.mrf.mxu1  ;;  %v5515_v40 = vadd.f32 %v5514_v48, %v5513_v23  ;;  %v5564_v23 = vadd.f32 %v5563_v14, %v8082_v50  ;;  %v1881_v12 = vadd.f32 %v5549_v39, %v7945_v52  ;;  %v6528_v50 = vld [vmem:[#allocation8 + $0x140] sm:$0xff]   ;;  %v1892_v52 = vadd.f32 %v5558_v19, %v7966_v22 }
 0x226   : > { %v5516_v29 = vpop.f32.mrf.mxu0  ;;  %v5579_v57 = vadd.f32 %v5578_v15, %v5577_v61  ;;  %5893 = vmatprep.subr.bf16.mxu1 %v6528_v50  ;;  %v8147_v22 = vadd.f32 %v5573_v27, %v8001_v20  ;;  %v8150_v35 = vadd.f32 %v5576_v11, %v8008_v6 }
 0x227   : > { %v5580_v33 = vpop.f32.mrf.mxu1  ;;  %v8113_v30 = vadd.f32 %v5515_v40, %v8012_v28  ;;  %v8140_v56 = vadd.f32 %v5564_v23, %v7980_v32  ;;  %5894 = vmatpush3.bf16.msra.mxu1 %v6530_v51 }
 0x228   : > { %v5517_v38 = vpop.f32.mrf.mxu0  ;;  %v8155_v26 = vadd.f32 %v5579_v57, %v8015_v13 }
 0x229   : > { %v5581_v54 = vpop.f32.mrf.mxu1  ;;  %v5518_v60 = vadd.f32 %v5517_v38, %v5516_v29 }
 0x22a   : > { %v6169_v1 = vpop.f32.mrf.mxu0  ;;  %v5582_v14 = vadd.f32 %v5581_v54, %v5580_v33 }
 0x22b   : > { %v5583_v28 = vpop.f32.mrf.mxu1  ;;  %v8128_v42 = vadd.f32 %v5518_v60, %v8021_v62  ;;  %v2034_v63 = vadd.f32 %v6169_v1, %v1873_v16 }
 0x22c   : > { %v2025_v10 = vpop.f32.mrf.mxu0  ;;  %v8158_v39 = vadd.f32 %v5582_v14, %v8024_v46 }
 0x22d   : > { %v5584_v4 = vpop.f32.mrf.mxu1  ;;  %v2026_v7 = vadd.f32 %v2025_v10, %v1865_v21  ;;  %v2154_v62 = vmax.f32 %v2034_v63, 0.0 }
 0x22e   : > { %v6170_v40 = vpop.f32.mrf.mxu0  ;;  %v5585_v24 = vadd.f32 %v5584_v4, %v5583_v28 }
 0x22f   : > { %v5586_v48 = vpop.f32.mrf.mxu1  ;;  %v2152_v43 = vmax.f32 %v2026_v7, 0.0  ;;  %v2037_v61 = vadd.f32 %v6170_v40, %v1876_v2  ;;  %v2219_v18 = vrot.slane %v2154_v62, 7  ;;  %v2315_v29 = vrot.slane %v2154_v62, 1 }
 0x230   : > { %v2028_v53 = vpop.f32.mrf.mxu0  ;;  %v8163_v54 = vadd.f32 %v5585_v24, %v8031_v34 }
 0x231   : > { %v5587_v58 = vpop.f32.mrf.mxu1  ;;  %v2216_v25 = vrot.slane %v2152_v43, 7  ;;  %v8152_v15 = vmax.f32 %v2037_v61, 0.0  ;;  %v2029_v59 = vadd.f32 %v2028_v53, %v1868_v3  ;;  %v2312_v13 = vrot.slane %v2152_v43, 1 }
 0x232   : > { %v5588_v32 = vadd.f32 %v5587_v58, %v5586_v48  ;;  %v6173_v47 = vpop.f32.mrf.mxu0 }
 0x233   : > { %v5589_v33 = vpop.f32.mrf.mxu1  ;;  %v2221_v20 = vrot.slane %v8152_v15, 7  ;;  %v2317_v6 = vrot.slane %v8152_v15, 1  ;;  %v2050_v38 = vadd.f32 %v6173_v47, %v1889_v0  ;;  %v2311_v21 = vsel %vm441_vm1, 0.0, %v2216_v25 }
 0x234   : > { %v2153_v9 = vmax.f32 %v2029_v59, 0.0  ;;  %v2041_v60 = vpop.f32.mrf.mxu0  ;;  %v8167_v16 = vpack.c.bf16 %v8152_v15, %v2154_v62  ;;  %v8173_v28 = vadd.f32 %v5588_v32, %v8038_v44  ;;  %v6505_v32 = vld [vmem:[#allocation8 + $0x1f0] sm:$0xff]  }
 0x235   : > { %v5590_v41 = vpop.f32.mrf.mxu1  ;;  %v2318_v46 = vsel %vm538_vm0, %v2315_v29, %v2317_v6  ;;  %v8170_v19 = vmax.f32 %v2050_v38, 0.0  ;;  %v2042_v45 = vadd.f32 %v2041_v60, %v1881_v12  ;;  %v2222_v63 = vsel %vm441_vm1, %v2219_v18, %v2221_v20  ;;  %v8211_v60 = vld [vmem:[#allocation8 + $0x238] sm:$0xff]  }
 0x236   : > { %v2217_v1 = vrot.slane %v2153_v9, 7  ;;  %v2313_v34 = vrot.slane %v2153_v9, 1  ;;  %v6174_v3 = vpop.f32.mrf.mxu0  ;;  %v8175_v23 = vpack.c.bf16 %v2153_v9, %v2152_v43  ;;  %v5591_v36 = vadd.f32 %v5590_v41, %v5589_v33  ;;  %v6503_v43 = vld [vmem:[#allocation8 + $0x1b8] sm:$0xff]   ;;  %6199 = vmatprep.subr.bf16.mxu1 %v8211_v60 }
 0x237   : > { %v5592_v2 = vpop.f32.mrf.mxu1  ;;  %v2227_v55 = vrot.slane %v8170_v19, 7  ;;  %v2156_v27 = vmax.f32 %v2042_v45, 0.0  ;;  %v2053_v11 = vadd.f32 %v6174_v3, %v1892_v52  ;;  %v2323_v0 = vrot.slane %v8170_v19, 1  ;;  %v9405_v9 = vld [vmem:[#allocation23_spill] sm:$0xff] }
 0x238   : > { %v2218_v4 = vsel %vm441_vm1, %v2216_v25, %v2217_v1  ;;  %v2314_v12 = vsel %vm538_vm0, %v2312_v13, %v2313_v34  ;;  %v2316_v44 = vsel %vm538_vm0, %v2313_v34, %v2315_v29  ;;  %3143 = vmatprep.mubr.bf16.mxu1 %v8175_v23  ;;  %v2044_v57 = vpop.f32.mrf.mxu0  ;;  %v2220_v7 = vsel %vm441_vm1, %v2217_v1, %v2219_v18 }
 0x239   : > { %v5593_v10 = vpop.f32.mrf.mxu1  ;;  %v2223_v50 = vrot.slane %v2156_v27, 7  ;;  %v2319_v14 = vrot.slane %v2156_v27, 1  ;;  %v8185_v62 = vmax.f32 %v2053_v11, 0.0  ;;  %v2045_v48 = vadd.f32 %v2044_v57, %v8133_v31 }
 0x23a   : > { %v6177_v52 = vpop.f32.mrf.mxu0  ;;  %v4892_v51 = vpack.c.bf16 %v2218_v4, %v2311_v21  ;;  %v8188_v24 = vpack.c.bf16 %v2222_v63, %v2220_v7  ;;  %v8190_v61 = vpack.c.bf16 %v2316_v44, %v2314_v12  ;;  %v5594_v25 = vadd.f32 %v5593_v10, %v5592_v2  ;;  %v6509_v4 = vld [vmem:[#allocation8 + $0x1e8] sm:$0xff]  }
 0x23b   : > { %v5595_v40 = vpop.f32.mrf.mxu1  ;;  %v2320_v58 = vsel %vm538_vm0, %v2317_v6, %v2319_v14  ;;  %v2325_v53 = vrot.slane %v8185_v62, 1  ;;  %v2066_v15 = vadd.f32 %v6177_v52, %v1905_v5  ;;  %v2229_v29 = vrot.slane %v8185_v62, 7 }
 0x23c   : > { %v8194_v18 = vpack.c.bf16 %v2320_v58, %v2318_v46  ;;  %v2157_v31 = vmax.f32 %v2045_v48, 0.0  ;;  %4893 = vmatmul.mubr.msk.bf16.gmra.mxu1 %vm7016_vm4, %v4892_v51  ;;  %4938 = vmatprep.mubr.msk.bf16.mxu0 %vm7016_vm4, %v4892_v51  ;;  %v2057_v47 = vpop.f32.mrf.mxu0  ;;  %v2224_v6 = vsel %vm441_vm1, %v2221_v20, %v2223_v50  ;;  %v9404_v5 = vmov 0.0|0.0  }
 0x23d   : > { %v5596_v33 = vpop.f32.mrf.mxu1  ;;  %v2326_v38 = vsel %vm538_vm0, %v2323_v0, %v2325_v53  ;;  %v8203_v21 = vmax.f32 %v2066_v15, 0.0  ;;  %3151 = vmatprep.mubr.bf16.mxu1 %v8167_v16  ;;  %3297 = vmatmul.mubr.bf16.vlgmr.msra.gmra.mxu0 %v9404_v5  ;;  %v2058_v13 = vadd.f32 %v2057_v47, %v8137_v17  ;;  %v8209_v41 = vadd.f32 %v5591_v36, %v9405_v9  ;;  %v6507_v17 = vld [vmem:[#allocation8 + $0x1b0] sm:$0xff]   ;;  %v6511_v15 = vld [vmem:[#allocation8 + $0x1a8] sm:$0xff]   ;;  %v9409_v47 = vld [vmem:[#allocation16_spill] sm:$0xff] }
 0x23e   : > { %v2225_v46 = vrot.slane %v2157_v31, 7  ;;  %v2321_v45 = vrot.slane %v2157_v31, 1  ;;  %4941 = vmatprep.mubr.msk.bf16.mxu0 %vm7016_vm4, %v8188_v24  ;;  %5992 = vmatpush3.bf16.msra.mxu0 %v6503_v43  ;;  %v6178_v1 = vpop.f32.mrf.mxu0  ;;  %v8216_v34 = vpack.c.bf16 %v2157_v31, %v2156_v27  ;;  %v8220_v2 = vpack.c.bf16 %v8185_v62, %v8170_v19 }
 0x23f   : > { %v5598_v20 = vpop.f32.mrf.mxu1  ;;  %v2235_v3 = vrot.slane %v8203_v21, 7  ;;  %v5597_v63 = vadd.f32 %v5596_v33, %v5595_v40  ;;  %v8223_v36 = vmax.f32 %v2058_v13, 0.0  ;;  %v2069_v11 = vadd.f32 %v6178_v1, %v8144_v49  ;;  %5993 = vmatprep.subr.bf16.mxu0 %v6505_v32 }
 0x240   : > { %9406 = vst [vmem:[#allocation17_spill] sm:$0xff] %v8216_v34  ;;  %9407 = vst [vmem:[#allocation23_spill] sm:$0xff] %v8220_v2  ;;  %v2322_v12 = vsel %vm538_vm0, %v2319_v14, %v2321_v45  ;;  %v2324_v27 = vsel %vm538_vm0, %v2321_v45, %v2323_v0  ;;  %v2060_v10 = vpop.f32.mrf.mxu0  ;;  %v2226_v57 = vsel %vm441_vm1, %v2223_v50, %v2225_v46  ;;  %v2331_v48 = vrot.slane %v8203_v21, 1 }
 0x241   : > { %v5599_v44 = vpop.f32.mrf.mxu1  ;;  %v2228_v7 = vsel %vm441_vm1, %v2225_v46, %v2227_v55  ;;  %v2231_v49 = vrot.slane %v8223_v36, 7  ;;  %v2327_v40 = vrot.slane %v8223_v36, 1  ;;  %v8236_v52 = vmax.f32 %v2069_v11, 0.0 }
 0x242   : > { %v8238_v51 = vadd.f32 %v5599_v44, %v5598_v20  ;;  %v2061_v0 = vadd.f32 %v2060_v10, %v8140_v56  ;;  %v6181_v43 = vpop.f32.mrf.mxu0  ;;  %v8241_v58 = vpack.c.bf16 %v2226_v57, %v2224_v6  ;;  %v2230_v50 = vsel %vm441_vm1, %v2227_v55, %v2229_v29  ;;  %5994 = vmatpush3.bf16.msra.mxu0 %v6507_v17  ;;  %v6513_v6 = vld [vmem:[#allocation8 + $0x1e0] sm:$0xff]  }
 0x243   : > { %v5601_v14 = vpop.f32.mrf.mxu1  ;;  %v2328_v32 = vsel %vm538_vm0, %v2325_v53, %v2327_v40  ;;  %v2333_v31 = vrot.slane %v8236_v52, 1  ;;  %v2082_v33 = vadd.f32 %v6181_v43, %v8155_v26  ;;  %v8252_v56 = vadd.f32 %v5594_v25, %v9409_v47  ;;  %5995 = vmatprep.subr.bf16.mxu0 %v6509_v4  ;;  %v6515_v44 = vld [vmem:[#allocation8 + $0x1a0] sm:$0xff]  }
 0x244   : > { %9408 = vst [vmem:[#allocation30_spill] sm:$0xff] %v8241_v58  ;;  %v8254_v13 = vpack.c.bf16 %v2328_v32, %v2326_v38  ;;  %v8256_v9 = vmax.f32 %v2061_v0, 0.0  ;;  %4896 = vmatmul.mubr.msk.bf16.gmra.mxu1 %vm7016_vm4, %v8188_v24  ;;  %v2073_v55 = vpop.f32.mrf.mxu0  ;;  %v8261_v53 = vpack.c.bf16 %v2230_v50, %v2228_v7  ;;  %v8263_v46 = vpack.c.bf16 %v2324_v27, %v2322_v12  ;;  %v9414_v7 = vld [vmem:[#allocation20_spill] sm:$0xff] }
 0x245   : > { %v5602_v19 = vpop.f32.mrf.mxu1  ;;  %v2334_v26 = vsel %vm538_vm0, %v2331_v48, %v2333_v31  ;;  %v8266_v25 = vmax.f32 %v2082_v33, 0.0  ;;  %3159 = vmatprep.mubr.bf16.mxu1 %v8216_v34  ;;  %4944 = vmatmul.mubr.msk.bf16.gmra.mxu0 %vm7217_vm6, %v8190_v61  ;;  %v2074_v20 = vadd.f32 %v2073_v55, %v8147_v22  ;;  %v2237_v1 = vrot.slane %v8236_v52, 7 }
 0x246   : > { %9410 = vst [vmem:[#allocation16_spill] sm:$0xff] %v8254_v13  ;;  %9411 = vst [vmem:[#allocation31_spill] sm:$0xff] %v8261_v53  ;;  %v5603_v45 = vadd.f32 %v5602_v19, %v5601_v14  ;;  %v2233_v17 = vrot.slane %v8256_v9, 7  ;;  %v2329_v11 = vrot.slane %v8256_v9, 1  ;;  %4947 = vmatprep.mubr.msk.bf16.mxu0 %vm7016_vm4, %v8241_v58  ;;  %v6182_v12 = vpop.f32.mrf.mxu0  ;;  %v8281_v27 = vpack.c.bf16 %v8256_v9, %v8223_v36  ;;  %v6517_v14 = vld [vmem:[#allocation8 + $0x1d8] sm:$0xff]  }
 0x247   : > { %v5604_v4 = vpop.f32.mrf.mxu1  ;;  %5996 = vmatpush3.bf16.msra.mxu0 %v6511_v15  ;;  %v8284_v10 = vmax.f32 %v2074_v20, 0.0  ;;  %v2085_v57 = vadd.f32 %v6182_v12, %v8158_v39  ;;  %v8288_v0 = vadd.f32 %v5597_v63, %v9414_v7  ;;  %v2339_v36 = vrot.slane %v8266_v25, 1 }
 0x248   : > { %9413 = vst [vmem:[#allocation24_spill] sm:$0xff] %v8281_v27  ;;  %5997 = vmatprep.subr.bf16.mxu0 %v6513_v6  ;;  %v8291_v43 = vsel %vm538_vm0, %v2327_v40, %v2329_v11  ;;  %v8294_v50 = vsel %vm538_vm0, %v2329_v11, %v2331_v48  ;;  %v2076_v32 = vpop.f32.mrf.mxu0  ;;  %v2232_v33 = vsel %vm441_vm1, %v2229_v29, %v2231_v49  ;;  %v9415_v6 = vld [vmem:[#allocation22_spill] sm:$0xff]  ;;  %v6519_v29 = vld [vmem:[#allocation8 + $0x198] sm:$0xff]  }
 0x249   : > { %v5605_v15 = vpop.f32.mrf.mxu1  ;;  %v2239_v39 = vrot.slane %v8284_v10, 7  ;;  %v2335_v63 = vrot.slane %v8284_v10, 1  ;;  %v8302_v47 = vmax.f32 %v2085_v57, 0.0  ;;  %v8305_v40 = vadd.f32 %v5603_v45, %v9415_v6  ;;  %v9417_v57 = vld [vmem:[#allocation21_spill] sm:$0xff] }
 0x24a   : > { %v5606_v9 = vadd.f32 %v5605_v15, %v5604_v4  ;;  %v2077_v48 = vadd.f32 %v2076_v32, %v8150_v35  ;;  %v6185_v55 = vpop.f32.mrf.mxu0  ;;  %v2234_v20 = vsel %vm441_vm1, %v2231_v49, %v2233_v17  ;;  %v8311_v62 = vpack.c.bf16 %v8236_v52, %v8203_v21  ;;  %v6521_v35 = vld [vmem:[#allocation8 + $0x1d0] sm:$0xff]  }
 0x24b   : > { %v5607_v19 = vpop.f32.mrf.mxu1  ;;  %5998 = vmatpush3.bf16.msra.mxu0 %v6515_v44  ;;  %v2336_v11 = vsel %vm538_vm0, %v2333_v31, %v2335_v63  ;;  %v2341_v12 = vrot.slane %v8302_v47, 1  ;;  %v2098_v45 = vadd.f32 %v6185_v55, %v8209_v41  ;;  %v8318_v4 = vadd.f32 %v8238_v51, %v9417_v57  ;;  %v9419_v55 = vld [vmem:[#allocation25_spill] sm:$0xff] }
 0x24c   : > { %9416 = vst [vmem:[#allocation20_spill] sm:$0xff] %v8311_v62  ;;  %5999 = vmatprep.subr.bf16.mxu0 %v6517_v14  ;;  %v8320_v7 = vpack.c.bf16 %v2336_v11, %v2334_v26  ;;  %v8323_v15 = vmax.f32 %v2077_v48, 0.0  ;;  %4899 = vmatmul.mubr.msk.bf16.gmra.mxu1 %vm7016_vm4, %v8241_v58  ;;  %v2089_v44 = vpop.f32.mrf.mxu0  ;;  %v8328_v32 = vpack.c.bf16 %v2234_v20, %v2232_v33 }
 0x24d   : > { %v5608_v31 = vpop.f32.mrf.mxu1  ;;  %v2342_v41 = vsel %vm538_vm0, %v2339_v36, %v2341_v12  ;;  %v8331_v51 = vmax.f32 %v2098_v45, 0.0  ;;  %3167 = vmatprep.mubr.bf16.mxu1 %v8220_v2  ;;  %4950 = vmatmul.mubr.msk.bf16.gmra.mxu0 %vm7217_vm6, %v8194_v18  ;;  %v2090_v14 = vadd.f32 %v2089_v44, %v8163_v54  ;;  %v1956_v20 = vadd.f32 %v5606_v9, %v9419_v55  ;;  %v6525_v44 = vld [vmem:[#allocation8 + $0x1c8] sm:$0xff]  }
 0x24e   : > { %9418 = vst [vmem:[#allocation22_spill] sm:$0xff] %v8328_v32  ;;  %v5609_v26 = vadd.f32 %v5608_v31, %v5607_v19  ;;  %v2337_v6 = vrot.slane %v8323_v15, 1  ;;  %4953 = vmatprep.mubr.msk.bf16.mxu0 %vm7016_vm4, %v8261_v53  ;;  %v6186_v48 = vpop.f32.mrf.mxu0  ;;  %v2236_v11 = vsel %vm441_vm1, %v2233_v17, %v2235_v3  ;;  %v2238_v54 = vsel %vm441_vm1, %v2235_v3, %v2237_v1  ;;  %v6523_v19 = vld [vmem:[#allocation8 + $0x190] sm:$0xff]  }
 0x24f   : > { %v5610_v33 = vpop.f32.mrf.mxu1  ;;  %6000 = vmatpush3.bf16.msra.mxu0 %v6519_v29  ;;  %v8353_v31 = vmax.f32 %v2090_v14, 0.0  ;;  %v2101_v9 = vadd.f32 %v6186_v48, %v8252_v56  ;;  %v2347_v21 = vrot.slane %v8331_v51, 1  ;;  %v8363_v49 = vpack.c.bf16 %v2238_v54, %v2236_v11  ;;  %v9421_v56 = vld [vmem:[#allocation26_spill] sm:$0xff] }
 0x250   : > { %6001 = vmatprep.subr.bf16.mxu0 %v6521_v35  ;;  %v8357_v17 = vsel %vm538_vm0, %v2335_v63, %v2337_v6  ;;  %v8360_v55 = vsel %vm538_vm0, %v2337_v6, %v2339_v36  ;;  %v2092_v29 = vpop.f32.mrf.mxu0  ;;  %v8369_v35 = vadd.f32 %v5609_v26, %v9421_v56  ;;  %v8374_v36 = vpack.c.bf16 %v8323_v15, %v8284_v10  ;;  %v6527_v26 = vld [vmem:[#allocation8 + $0x188] sm:$0xff]  }
 0x251   : > { %v5611_v3 = vpop.f32.mrf.mxu1  ;;  %9420 = vst [vmem:[#allocation21_spill] sm:$0xff] %v8363_v49  ;;  %v2343_v57 = vrot.slane %v8353_v31, 1  ;;  %v8366_v14 = vmax.f32 %v2101_v9, 0.0  ;;  %v2093_v63 = vadd.f32 %v2092_v29, %v8173_v28  ;;  %v8378_v6 = vpack.c.bf16 %v8294_v50, %v8291_v43  ;;  %v8427_v28 = vld [vmem:[#allocation9 + $0x38] sm:$0xff]  }
 0x252   : > { %v5612_v22 = vadd.f32 %v5611_v3, %v5610_v33  ;;  %v6189_v45 = vpop.f32.mrf.mxu0  ;;  %9422 = vst [vmem:[#allocation25_spill] sm:$0xff] %v8374_v36  ;;  %v2240_v33 = vsel %vm441_vm1, %v2237_v1, %v2239_v39  ;;  %v6529_v3 = vld [vmem:[#allocation8 + $0x1c0] sm:$0xff]  }
 0x253   : > { %v5613_v48 = vpop.f32.mrf.mxu1  ;;  %9423 = vst [vmem:[#allocation26_spill] sm:$0xff] %v8378_v6  ;;  %6002 = vmatpush3.bf16.msra.mxu0 %v6523_v19  ;;  %v2344_v11 = vsel %vm538_vm0, %v2341_v12, %v2343_v57  ;;  %v2349_v54 = vrot.slane %v8366_v14, 1  ;;  %v2114_v9 = vadd.f32 %v6189_v45, %v8305_v40  ;;  %v8392_v29 = vmax.f32 %v2093_v63, 0.0  ;;  %v9425_v63 = vld [vmem:[#allocation27_spill] sm:$0xff] }
 0x254   : > { %6003 = vmatprep.subr.bf16.mxu0 %v6525_v44  ;;  %v8389_v43 = vpack.c.bf16 %v2344_v11, %v2342_v41  ;;  %4902 = vmatmul.mubr.msk.bf16.gmra.mxu1 %vm7016_vm4, %v8261_v53  ;;  %v2105_v1 = vpop.f32.mrf.mxu0  ;;  %v9424_v12 = vrot.slane %v8323_v15, 7  ;;  %v8415_v11 = vadd.f32 %v5612_v22, %v9425_v63  ;;  %9426 = vst [vmem:[#allocation27_spill] sm:$0xff] %v8427_v28  ;;  %v9430_v53 = vrot.slane %v8302_v47, 7 }
 0x255   : > { %v5614_v52 = vpop.f32.mrf.mxu1  ;;  %v2350_v19 = vsel %vm538_vm0, %v2347_v21, %v2349_v54  ;;  %v8403_v41 = vmax.f32 %v2114_v9, 0.0  ;;  %3175 = vmatprep.mubr.bf16.mxu1 %v8281_v27  ;;  %4956 = vmatmul.mubr.msk.bf16.gmra.mxu0 %vm7217_vm6, %v8263_v46  ;;  %v2106_v44 = vadd.f32 %v2105_v1, %v8288_v0  ;;  %v2345_v56 = vrot.slane %v8392_v29, 1 }
 0x256   : > { %v2242_v40 = vsel %vm441_vm1, %v2239_v39, %v9424_v12  ;;  %v5615_v45 = vadd.f32 %v5614_v52, %v5613_v48  ;;  %4959 = vmatprep.mubr.msk.bf16.mxu0 %vm7016_vm4, %v8328_v32  ;;  %v6190_v39 = vpop.f32.mrf.mxu0  ;;  %v8421_v12 = vpack.c.bf16 %v8302_v47, %v8266_v25  ;;  %v6531_v48 = vld [vmem:[#allocation8 + $0x180] sm:$0xff]   ;;  %v9427_v0 = vrot.slane %v8266_v25, 7 }
 0x257   : > { %v5616_v10 = vpop.f32.mrf.mxu1  ;;  %v8417_v9 = vpack.c.bf16 %v2242_v40, %v2240_v33  ;;  %6004 = vmatpush3.bf16.msra.mxu0 %v6527_v26  ;;  %v8425_v1 = vmax.f32 %v2106_v44, 0.0  ;;  %v2117_v50 = vadd.f32 %v6190_v39, %v1956_v20  ;;  %v8430_v22 = vsel %vm538_vm0, %v2343_v57, %v2345_v56  ;;  %v9429_v57 = vld [vmem:[#allocation28_spill] sm:$0xff] }
 0x258   : > { %6005 = vmatprep.subr.bf16.mxu0 %v6529_v3  ;;  %v8433_v33 = vsel %vm538_vm0, %v2345_v56, %v2347_v21  ;;  %v2355_v40 = vrot.slane %v8403_v41, 1  ;;  %v2108_v63 = vpop.f32.mrf.mxu0  ;;  %v9428_v52 = vrot.slane %v8323_v15, 7  ;;  %v1969_v5 = vadd.f32 %v5615_v45, %v9429_v57 }
 0x259   : > { %v5617_v26 = vpop.f32.mrf.mxu1  ;;  %v2351_v20 = vrot.slane %v8425_v1, 1  ;;  %v8442_v3 = vmax.f32 %v2117_v50, 0.0  ;;  %v2109_v21 = vadd.f32 %v2108_v63, %v8318_v4  ;;  %v9431_v2 = vmov %v9427_v0 }
 0x25a   : > { %v2244_v44 = vsel %vm441_vm1, %v9428_v52, %v9427_v0  ;;  %v5618_v39 = vadd.f32 %v5617_v26, %v5616_v10  ;;  %v6193_v27 = vpop.f32.mrf.mxu0  ;;  %v2246_v58 = vsel %vm441_vm1, %v9431_v2, %v9430_v53  ;;  %v8453_v15 = vpack.c.bf16 %v8392_v29, %v8353_v31 }
 0x25b   : > { %v5619_v56 = vpop.f32.mrf.mxu1  ;;  %v8457_v50 = vpack.c.bf16 %v8360_v55, %v8357_v17  ;;  %6006 = vmatpush3.bf16.msra.mxu0 %v6531_v48  ;;  %v2352_v4 = vsel %vm538_vm0, %v2349_v54, %v2351_v20  ;;  %v2357_v10 = vrot.slane %v8442_v3, 1  ;;  %v2130_v0 = vadd.f32 %v6193_v27, %v1969_v5  ;;  %v9432_v55 = vld [vmem:[#allocation29_spill] sm:$0xff] }
 0x25c   : > { %6247 = vmatprep.subr.bf16.mxu0 %v8427_v28  ;;  %v8463_v25 = vpack.c.bf16 %v2352_v4, %v2350_v19  ;;  %v8465_v2 = vmax.f32 %v2109_v21, 0.0  ;;  %4905 = vmatmul.mubr.msk.bf16.gmra.mxu1 %vm7016_vm4, %v8328_v32  ;;  %v2121_v17 = vpop.f32.mrf.mxu0  ;;  %v1972_v48 = vadd.f32 %v5618_v39, %v9432_v55  ;;  %v8471_v52 = vpack.c.bf16 %v2246_v58, %v2244_v44 }
 0x25d   : > { %v5620_v53 = vpop.f32.mrf.mxu1  ;;  %v2358_v54 = vsel %vm538_vm0, %v2355_v40, %v2357_v10  ;;  %v8474_v26 = vmax.f32 %v2130_v0, 0.0  ;;  %3183 = vmatprep.mubr.bf16.mxu1 %v8311_v62  ;;  %4962 = vmatmul.mubr.msk.bf16.gmra.mxu0 %vm7217_vm6, %v8254_v13  ;;  %v2122_v27 = vadd.f32 %v2121_v17, %v8369_v35  ;;  %v9433_v39 = vrot.slane %v8353_v31, 7 }
 0x25e   : > { %v5621_v5 = vadd.f32 %v5620_v53, %v5619_v56  ;;  %v2353_v63 = vrot.slane %v8465_v2, 1  ;;  %4965 = vmatprep.mubr.msk.bf16.mxu0 %vm7016_vm4, %v8363_v49  ;;  %v6194_v44 = vpop.f32.mrf.mxu0  ;;  %v9434_v57 = vrot.slane %v8302_v47, 7  ;;  %v9435_v56 = vrot.slane %v8392_v29, 7 }
 0x25f   : > { %v5622_v58 = vpop.f32.mrf.mxu1  ;;  %v9436_v35 = vmov %v9433_v39  ;;  %v2257_v0 = vrot.slane %v8465_v2, 7  ;;  %v8498_v17 = vmax.f32 %v2122_v27, 0.0  ;;  %v2133_v55 = vadd.f32 %v6194_v44, %v1972_v48 }
 0x260   : > { %v2248_v21 = vsel %vm441_vm1, %v9434_v57, %v9433_v39  ;;  %v2250_v4 = vsel %vm441_vm1, %v9436_v35, %v9435_v56  ;;  %v2354_v19 = vsel %vm538_vm0, %v2351_v20, %v2353_v63  ;;  %v2356_v45 = vsel %vm538_vm0, %v2353_v63, %v2355_v40  ;;  %v2124_v57 = vpop.f32.mrf.mxu0 }
 0x261   : > { %v2363_v47 = vrot.slane %v8474_v26, 1  ;;  %v5623_v39 = vpop.f32.mrf.mxu1  ;;  %v8503_v62 = vpack.c.bf16 %v2250_v4, %v2248_v21  ;;  %v2359_v31 = vrot.slane %v8498_v17, 1  ;;  %v8506_v56 = vmax.f32 %v2133_v55, 0.0 }
 0x262   : > { %v5624_v35 = vadd.f32 %v5623_v39, %v5622_v58  ;;  %v1977_v53 = vadd.f32 %v5621_v5, %v8097_v37  ;;  %v2125_v27 = vadd.f32 %v2124_v57, %v8415_v11  ;;  %v6197_v44 = vpop.f32.mrf.mxu0  ;;  %v8512_v40 = vpack.c.bf16 %v8366_v14, %v8331_v51 }
 0x263   : > { %v5625_v48 = vpop.f32.mrf.mxu1  ;;  %v9437_v20 = vrot.slane %v8331_v51, 7  ;;  %v9438_v63 = vrot.slane %v8392_v29, 7  ;;  %v9439_v4 = vrot.slane %v8366_v14, 7  ;;  %v2263_v11 = vrot.slane %v8498_v17, 7 }
 0x264   : > { %v2360_v5 = vsel %vm538_vm0, %v2357_v10, %v2359_v31  ;;  %v2365_v55 = vrot.slane %v8506_v56, 1  ;;  %v1980_v39 = vadd.f32 %v5624_v35, %v8100_v8  ;;  %v2177_v32 = vmax.f32 %v2125_v27, 0.0  ;;  %4908 = vmatmul.mubr.msk.bf16.gmra.mxu1 %vm7016_vm4, %v8363_v49 }
 0x265   : > { %v2252_v21 = vsel %vm441_vm1, %v9438_v63, %v9437_v20  ;;  %v9440_v58 = vmov %v9437_v20  ;;  %v8528_v57 = vpack.c.bf16 %v2360_v5, %v2358_v54  ;;  %v5626_v29 = vpop.f32.mrf.mxu1  ;;  %v2137_v20 = vpop.f32.mrf.mxu0  ;;  %v8537_v63 = vpack.c.bf16 %v8465_v2, %v8425_v1  ;;  %3191 = vmatprep.mubr.bf16.mxu1 %v8374_v36  ;;  %4968 = vmatmul.mubr.msk.bf16.gmra.mxu0 %vm7217_vm6, %v8378_v6 }
 0x266   : > { %v2254_v37 = vsel %vm441_vm1, %v9440_v58, %v9439_v4  ;;  %v2269_v10 = vrot.slane %v8506_v56, 7  ;;  %v2366_v4 = vsel %vm538_vm0, %v2363_v47, %v2365_v55  ;;  %v5627_v8 = vadd.f32 %v5626_v29, %v5625_v48  ;;  %4971 = vmatprep.mubr.msk.bf16.mxu0 %vm7016_vm4, %v8417_v9 }
 0x267   : > { %v8533_v51 = vpack.c.bf16 %v2254_v37, %v2252_v21  ;;  %v2138_v54 = vadd.f32 %v2137_v20, %v1977_v53  ;;  %v2265_v35 = vrot.slane %v2177_v32, 7  ;;  %v2361_v27 = vrot.slane %v2177_v32, 1  ;;  %v5628_v2 = vpop.f32.mrf.mxu1  ;;  %v6198_v21 = vpop.f32.mrf.mxu0 }
 0x268   : > { %v8550_v58 = vpack.c.bf16 %v8433_v33, %v8430_v22  ;;  %v9441_v37 = vrot.slane %v8425_v1, 7  ;;  %v9442_v5 = vrot.slane %v8366_v14, 7  ;;  %v1985_v53 = vadd.f32 %v5627_v8, %v8113_v30 }
 0x269   : > { %v2180_v48 = vmax.f32 %v2138_v54, 0.0  ;;  %v8563_v49 = vpack.c.bf16 %v8442_v3, %v8403_v41  ;;  %v2362_v22 = vsel %vm538_vm0, %v2359_v31, %v2361_v27  ;;  %v2364_v33 = vsel %vm538_vm0, %v2361_v27, %v2363_v47  ;;  %v5629_v6 = vpop.f32.mrf.mxu1  ;;  %v2140_v13 = vpop.f32.mrf.mxu0 }
 0x26a   : > { %v2256_v36 = vsel %vm441_vm1, %v9442_v5, %v9441_v37  ;;  %v9443_v29 = vmov %v9441_v37  ;;  %v9444_v37 = vrot.slane %v8403_v41, 7  ;;  %v2146_v8 = vadd.f32 %v6197_v44, %v1985_v53 }
 0x26b   : > { %v2258_v20 = vsel %vm441_vm1, %v9443_v29, %v2257_v0  ;;  %v2271_v1 = vrot.slane %v2180_v48, 7  ;;  %v2367_v54 = vrot.slane %v2180_v48, 1  ;;  %v5630_v5 = vadd.f32 %v5629_v6, %v5628_v2 }
 0x26c   : > { %v8567_v14 = vpack.c.bf16 %v2258_v20, %v2256_v36  ;;  %v2260_v30 = vsel %vm441_vm1, %v2257_v0, %v9444_v37  ;;  %v2141_v29 = vadd.f32 %v2140_v13, %v1980_v39  ;;  %v9445_v28 = vrot.slane %v8442_v3, 7  ;;  %4911 = vmatmul.mubr.msk.bf16.gmra.mxu1 %vm7016_vm4, %v8417_v9 }
 0x26d   : > { %v9446_v34 = vmov %v9444_v37  ;;  %v8578_v47 = vpack.c.bf16 %v2177_v32, %v8498_v17  ;;  %v8580_v36 = vpack.c.bf16 %v2356_v45, %v2354_v19  ;;  %v2182_v27 = vmax.f32 %v2146_v8, 0.0  ;;  %3199 = vmatprep.mubr.bf16.mxu1 %v8421_v12  ;;  %4974 = vmatmul.mubr.msk.bf16.gmra.mxu0 %vm7217_vm6, %v8320_v7 }
 0x26e   : > { %v2262_v31 = vsel %vm441_vm1, %v9446_v34, %v9445_v28  ;;  %v2368_v20 = vsel %vm538_vm0, %v2365_v55, %v2367_v54  ;;  %v1988_v0 = vadd.f32 %v5630_v5, %v8128_v42  ;;  %v2181_v13 = vmax.f32 %v2141_v29, 0.0  ;;  %4977 = vmatprep.mubr.msk.bf16.mxu0 %vm7016_vm4, %v8471_v52 }
 0x26f   : > { %v8584_v44 = vpack.c.bf16 %v2262_v31, %v2260_v30  ;;  %v8586_v6 = vpack.c.bf16 %v2368_v20, %v2366_v4  ;;  %v9447_v34 = vmov %v9445_v28  ;;  %v2266_v28 = vsel %vm441_vm1, %v2263_v11, %v2265_v35 }
 0x270   : > { %v2264_v32 = vsel %vm441_vm1, %v9447_v34, %v2263_v11  ;;  %v2275_v41 = vrot.slane %v2182_v27, 7  ;;  %v2371_v45 = vrot.slane %v2182_v27, 1  ;;  %v2149_v19 = vadd.f32 %v6198_v21, %v1988_v0 }
 0x271   : > { %v8599_v42 = vpack.c.bf16 %v2266_v28, %v2264_v32  ;;  %v2273_v17 = vrot.slane %v2181_v13, 7  ;;  %v2369_v55 = vrot.slane %v2181_v13, 1  ;;  %v8606_v3 = vpack.c.bf16 %v8506_v56, %v8474_v26  ;;  %v6534_v32 = vld [vmem:[#allocation8 + $0x230] sm:$0xff]  }
 0x272   : > { %v9448_v11 = vrot.slane %v8474_v26, 7  ;;  %v2183_v4 = vmax.f32 %v2149_v19, 0.0  ;;  %v8614_v53 = vpack.c.bf16 %v2181_v13, %v2180_v48  ;;  %v8616_v37 = vpack.c.bf16 %v2364_v33, %v2362_v22  ;;  %v5671_v48 = vpop.f32.mrf.mxu1  ;;  %v6535_v28 = vld [vmem:[#allocation9 + $0x30] sm:$0xff]   ;;  %v6540_v19 = vld [vmem:[#allocation8 + $0x218] sm:$0xff]  }
 0x273   : > { %v2370_v30 = vsel %vm538_vm0, %v2367_v54, %v2369_v55  ;;  %v2372_v8 = vsel %vm538_vm0, %v2369_v55, %v2371_v45  ;;  %v2272_v56 = vsel %vm441_vm1, %v2269_v10, %v2271_v1  ;;  %v2276_v31 = vsel %vm441_vm1, %v2273_v17, %v2275_v41  ;;  %v9452_v55 = vld [vmem:[#allocation16_spill] sm:$0xff] }
 0x274   : > { %v2268_v39 = vsel %vm441_vm1, %v2265_v35, %v9448_v11  ;;  %v9449_v2 = vmov %v9448_v11  ;;  %v2277_v29 = vrot.slane %v2183_v4, 7  ;;  %v2274_v35 = vsel %vm441_vm1, %v2271_v1, %v2273_v17  ;;  %4914 = vmatmul.mubr.msk.bf16.gmra.mxu1 %vm7016_vm4, %v8471_v52  ;;  %v6542_v17 = vld [vmem:[#allocation8 + $0x210] sm:$0xff]   ;;  %v9454_v11 = vld [vmem:[#allocation23_spill] sm:$0xff] }
 0x275   : > { %v2270_v21 = vsel %vm441_vm1, %v9449_v2, %v2269_v10  ;;  %v8625_v26 = vpack.c.bf16 %v2372_v8, %v2370_v30  ;;  %v8627_v20 = vpack.c.bf16 %v2274_v35, %v2272_v56  ;;  %v2373_v22 = vrot.slane %v2183_v4, 1  ;;  %3207 = vmatprep.mubr.bf16.mxu1 %v8453_v15  ;;  %4980 = vmatmul.mubr.msk.bf16.gmra.mxu0 %vm7217_vm6, %v8457_v50  ;;  %v6543_v2 = vld [vmem:[#allocation9 + $0x10] sm:$0xff]   ;;  %v9456_v8 = vld [vmem:[#allocation31_spill] sm:$0xff]  ;;  %v9457_v56 = vld [vmem:[#allocation24_spill] sm:$0xff] }
 0x276   : > { %v8620_v5 = vpack.c.bf16 %v2270_v21, %v2268_v39  ;;  %v8629_v33 = vpack.c.bf16 %v2183_v4, %v2182_v27  ;;  %v2278_v54 = vsel %vm441_vm1, %v2275_v41, %v2277_v29  ;;  %v5672_v27 = vpop.f32.mrf.mxu1  ;;  %4983 = vmatprep.mubr.msk.bf16.mxu0 %vm7016_vm4, %v8503_v62  ;;  %v9450_v41 = vld [vmem:[#allocation17_spill] sm:$0xff]  ;;  %v6541_v39 = vld [vmem:[#allocation9 + $0x18] sm:$0xff]   ;;  %v6546_v21 = vld [vmem:[#allocation8 + $0x200] sm:$0xff]  }
 0x277   : > { %v8635_v10 = vpack.c.bf16 %v2278_v54, %v2276_v31  ;;  %v2374_v1 = vsel %vm538_vm0, %v2371_v45, %v2373_v22  ;;  %v2407_v0 = vsel %vm538_vm0, %v2373_v22, 0.0  ;;  %v8648_v34 = vadd.f32 %v5672_v27, %v5671_v48  ;;  %v9451_v45 = vld [vmem:[#allocation27_spill] sm:$0xff]  ;;  %v6544_v4 = vld [vmem:[#allocation8 + $0x208] sm:$0xff]   ;;  %v9455_v30 = vld [vmem:[#allocation26_spill] sm:$0xff] }
 0x278   : > { %v8643_v13 = vpack.c.bf16 %v2407_v0, %v2374_v1  ;;  %v6545_v29 = vld [vmem:[#allocation9 + $0x8] sm:$0xff]   ;;  %v6547_v35 = vld [vmem:[#allocation9] sm:$0xff]   ;;  %v9458_v31 = vld [vmem:[#allocation22_spill] sm:$0xff]  ;;  %v5674_v1 = vpop.f32.mrf.mxu1 }
 0x279   : > { %v9459_v48 = vld [vmem:[#allocation20_spill] sm:$0xff]  ;;  %v9460_v22 = vld [vmem:[#allocation21_spill] sm:$0xff] }
 0x27a   : > { %v9461_v54 = vld [vmem:[#allocation25_spill] sm:$0xff] }
 0x27c   : > { %4917 = vmatmul.mubr.msk.bf16.gmra.mxu1 %vm7016_vm4, %v8503_v62 }
 0x27d   : > { %3215 = vmatprep.mubr.bf16.mxu1 %v8512_v40  ;;  %4986 = vmatmul.mubr.msk.bf16.gmra.mxu0 %vm7217_vm6, %v8389_v43 }
 0x27e   : > { %4989 = vmatprep.mubr.msk.bf16.mxu0 %vm7016_vm4, %v8533_v51 }
 0x284   : > { %4920 = vmatmul.mubr.msk.bf16.gmra.mxu1 %vm7016_vm4, %v8533_v51 }
 0x285   : > { %3223 = vmatprep.mubr.bf16.mxu1 %v8537_v63  ;;  %4992 = vmatmul.mubr.msk.bf16.gmra.mxu0 %vm7217_vm6, %v8550_v58 }
 0x286   : > { %4995 = vmatprep.mubr.msk.bf16.mxu0 %vm7016_vm4, %v8567_v14 }
 0x28c   : > { %4923 = vmatmul.mubr.msk.bf16.gmra.mxu1 %vm7016_vm4, %v8567_v14 }
 0x28d   : > { %3231 = vmatprep.mubr.bf16.mxu1 %v8563_v49  ;;  %4998 = vmatmul.mubr.msk.bf16.gmra.mxu0 %vm7217_vm6, %v8463_v25 }
 0x28e   : > { %5001 = vmatprep.mubr.msk.bf16.mxu0 %vm7016_vm4, %v8584_v44 }
 0x294   : > { %4926 = vmatmul.mubr.msk.bf16.gmra.mxu1 %vm7016_vm4, %v8584_v44 }
 0x295   : > { %3239 = vmatprep.mubr.bf16.mxu1 %v8578_v47  ;;  %5004 = vmatmul.mubr.msk.bf16.gmra.mxu0 %vm7217_vm6, %v8580_v36 }
 0x296   : > { %5007 = vmatprep.mubr.msk.bf16.mxu0 %vm7016_vm4, %v8599_v42 }
 0x29c   : > { %4929 = vmatmul.mubr.msk.bf16.gmra.mxu1 %vm7016_vm4, %v8599_v42 }
 0x29d   : > { %3247 = vmatprep.mubr.bf16.mxu1 %v8606_v3  ;;  %5010 = vmatmul.mubr.msk.bf16.gmra.mxu0 %vm7217_vm6, %v8528_v57 }
 0x29e   : > { %5013 = vmatprep.mubr.msk.bf16.mxu0 %vm7016_vm4, %v8620_v5 }
 0x2a4   : > { %4932 = vmatmul.mubr.msk.bf16.gmra.mxu1 %vm7016_vm4, %v8620_v5 }
 0x2a5   : > { %3255 = vmatprep.mubr.bf16.mxu1 %v8614_v53  ;;  %5016 = vmatmul.mubr.msk.bf16.gmra.mxu0 %vm7217_vm6, %v8616_v37 }
 0x2a6   : > { %5019 = vmatprep.mubr.msk.bf16.mxu0 %vm7016_vm4, %v8627_v20 }
 0x2ac   : > { %4935 = vmatmul.mubr.msk.bf16.gmra.mxu1 %vm7016_vm4, %v8627_v20 }
 0x2ad   : > { %5022 = vmatmul.mubr.msk.bf16.gmra.mxu0 %vm7217_vm6, %v8586_v6  ;;  %5031 = vmatprep.mubr.msk.bf16.mxu1 %vm7217_vm6, %v8190_v61  ;;  %v6536_v61 = vld [vmem:[#allocation8 + $0x228] sm:$0xff]  }
 0x2ae   : > { %5025 = vmatprep.mubr.msk.bf16.mxu0 %vm7016_vm4, %v8635_v10 }
 0x2b4   : > { %3458 = vmatmul.mubr.bf16.vlgmr.msra.gmra.mxu1 %v8175_v23  ;;  %v6538_v23 = vld [vmem:[#allocation8 + $0x220] sm:$0xff]  }
 0x2b5   : > { %5028 = vmatmul.mubr.msk.bf16.gmra.mxu0 %vm7217_vm6, %v8625_v26  ;;  %5034 = vmatprep.mubr.msk.bf16.mxu1 %vm7217_vm6, %v8194_v18 }
 0x2b6   : > { %3618 = vmatprep.mubr.bf16.mxu0 %v8167_v16  ;;  %6200 = vmatpush3.bf16.msra.mxu1 %v8211_v60  ;;  %v6537_v60 = vld [vmem:[#allocation9 + $0x28] sm:$0xff]  }
 0x2b7   : > { %6201 = vmatprep.subr.bf16.mxu1 %v6534_v32 }
 0x2ba   : > { %6202 = vmatpush3.bf16.msra.mxu1 %v6534_v32 }
 0x2bb   : > { %6203 = vmatprep.subr.bf16.mxu1 %v6536_v61 }
 0x2bc   : > { %3466 = vmatmul.mubr.bf16.gmra.mxu1 %v8167_v16  ;;  %v6539_v16 = vld [vmem:[#allocation9 + $0x20] sm:$0xff]  }
 0x2bd   : > { %5037 = vmatprep.mubr.msk.bf16.mxu1 %vm7217_vm6, %v8263_v46  ;;  %5079 = vmatmul.mubr.msk.bf16.vlgmr.msra.gmra.mxu0 %vm7016_vm4, %v8188_v24  ;;  %v9453_v24 = vld [vmem:[#allocation30_spill] sm:$0xff] }
 0x2be   : > { %3626 = vmatprep.mubr.bf16.mxu0 %v9450_v41  ;;  %6248 = vmatpush3.bf16.msra.mxu0 %v9451_v45 }
 0x2bf   : > { %6249 = vmatprep.subr.bf16.mxu0 %v6535_v28  ;;  %6204 = vmatpush3.bf16.msra.mxu1 %v6536_v61 }
 0x2c0   : > { %6205 = vmatprep.subr.bf16.mxu1 %v6538_v23 }
 0x2c2   : > { %6250 = vmatpush3.bf16.msra.mxu0 %v6535_v28 }
 0x2c3   : > { %6251 = vmatprep.subr.bf16.mxu0 %v6537_v60  ;;  %6206 = vmatpush3.bf16.msra.mxu1 %v6538_v23 }
 0x2c4   : > { %3474 = vmatmul.mubr.bf16.gmra.mxu1 %v9450_v41  ;;  %6207 = vmatprep.subr.bf16.mxu1 %v6540_v19 }
 0x2c5   : > { %5040 = vmatprep.mubr.msk.bf16.mxu1 %vm7217_vm6, %v9452_v55  ;;  %5082 = vmatmul.mubr.msk.bf16.gmra.mxu0 %vm7016_vm4, %v9453_v24 }
 0x2c6   : > { %3634 = vmatprep.mubr.bf16.mxu0 %v9454_v11  ;;  %6252 = vmatpush3.bf16.msra.mxu0 %v6537_v60 }
 0x2c7   : > { %6253 = vmatprep.subr.bf16.mxu0 %v6539_v16  ;;  %6208 = vmatpush3.bf16.msra.mxu1 %v6540_v19 }
 0x2c8   : > { %6209 = vmatprep.subr.bf16.mxu1 %v6542_v17 }
 0x2ca   : > { %6254 = vmatpush3.bf16.msra.mxu0 %v6539_v16 }
 0x2cb   : > { %6255 = vmatprep.subr.bf16.mxu0 %v6541_v39  ;;  %6210 = vmatpush3.bf16.msra.mxu1 %v6542_v17 }
 0x2cc   : > { %3482 = vmatmul.mubr.bf16.gmra.mxu1 %v9454_v11  ;;  %6211 = vmatprep.subr.bf16.mxu1 %v6544_v4 }
 0x2cd   : > { %5043 = vmatprep.mubr.msk.bf16.mxu1 %vm7217_vm6, %v9455_v30  ;;  %5085 = vmatmul.mubr.msk.bf16.gmra.mxu0 %vm7016_vm4, %v9456_v8 }
 0x2ce   : > { %3642 = vmatprep.mubr.bf16.mxu0 %v9457_v56  ;;  %6256 = vmatpush3.bf16.msra.mxu0 %v6541_v39 }
 0x2cf   : > { %6257 = vmatprep.subr.bf16.mxu0 %v6543_v2  ;;  %6212 = vmatpush3.bf16.msra.mxu1 %v6544_v4 }
 0x2d0   : > { %6213 = vmatprep.subr.bf16.mxu1 %v6546_v21 }
 0x2d2   : > { %6258 = vmatpush3.bf16.msra.mxu0 %v6543_v2 }
 0x2d3   : > { %6259 = vmatprep.subr.bf16.mxu0 %v6545_v29  ;;  %6214 = vmatpush3.bf16.msra.mxu1 %v6546_v21 }
 0x2d4   : > { %3490 = vmatmul.mubr.bf16.gmra.mxu1 %v9457_v56 }
 0x2d5   : > { %5046 = vmatprep.mubr.msk.bf16.mxu1 %vm7217_vm6, %v8320_v7  ;;  %5088 = vmatmul.mubr.msk.bf16.gmra.mxu0 %vm7016_vm4, %v9458_v31 }
 0x2d6   : > { %3650 = vmatprep.mubr.bf16.mxu0 %v9459_v48  ;;  %6260 = vmatpush3.bf16.msra.mxu0 %v6545_v29 }
 0x2d7   : > { %6261 = vmatprep.subr.bf16.mxu0 %v6547_v35 }
 0x2da   : > { %6262 = vmatpush3.bf16.msra.mxu0 %v6547_v35 }
 0x2dc   : > { %3498 = vmatmul.mubr.bf16.gmra.mxu1 %v9459_v48 }
 0x2dd   : > { %5049 = vmatprep.mubr.msk.bf16.mxu1 %vm7217_vm6, %v8457_v50  ;;  %5091 = vmatmul.mubr.msk.bf16.gmra.mxu0 %vm7016_vm4, %v9460_v22 }
 0x2de   : > { %3658 = vmatprep.mubr.bf16.mxu0 %v9461_v54 }
 0x2e4   : > { %3506 = vmatmul.mubr.bf16.gmra.mxu1 %v9461_v54 }
 0x2e5   : > { %5052 = vmatprep.mubr.msk.bf16.mxu1 %vm7217_vm6, %v8389_v43  ;;  %5094 = vmatmul.mubr.msk.bf16.gmra.mxu0 %vm7016_vm4, %v8417_v9  ;;  %v5675_v9 = vpop.f32.mrf.mxu1 }
 0x2e6   : > { %3666 = vmatprep.mubr.bf16.mxu0 %v8421_v12  ;;  %v5676_v61 = vadd.f32 %v5675_v9, %v5674_v1 }
 0x2ec   : > { %3514 = vmatmul.mubr.bf16.gmra.mxu1 %v8421_v12  ;;  %v8799_v12 = vld [vmem:[%s9279_s4] ss:$0 sm:$0xff] }
 0x2ed   : > { %5055 = vmatprep.mubr.msk.bf16.mxu1 %vm7217_vm6, %v8550_v58  ;;  %5097 = vmatmul.mubr.msk.bf16.gmra.mxu0 %vm7016_vm4, %v8471_v52  ;;  %v3141_v16 = vadd.f32 %v5676_v61, %v8799_v12 }
 0x2ee   : > { %3674 = vmatprep.mubr.bf16.mxu0 %v8453_v15 }
 0x2f4   : > { %3522 = vmatmul.mubr.bf16.gmra.mxu1 %v8453_v15 }
 0x2f5   : > { %5058 = vmatprep.mubr.msk.bf16.mxu1 %vm7217_vm6, %v8463_v25  ;;  %5100 = vmatmul.mubr.msk.bf16.gmra.mxu0 %vm7016_vm4, %v8503_v62  ;;  %v3138_v62 = vadd.f32 %v8648_v34, %v8799_v12 }
 0x2f6   : > { %3682 = vmatprep.mubr.bf16.mxu0 %v8512_v40 }
 0x2fc   : > { %v5677_v52 = vpop.f32.mrf.mxu1  ;;  %3530 = vmatmul.mubr.bf16.gmra.mxu1 %v8512_v40 }
 0x2fd   : > { %v5783_v15 = vpop.f32.mrf.mxu0  ;;  %5061 = vmatprep.mubr.msk.bf16.mxu1 %vm7217_vm6, %v8580_v36  ;;  %5103 = vmatmul.mubr.msk.bf16.gmra.mxu0 %vm7016_vm4, %v8533_v51 }
 0x2fe   : > { %v5678_v0 = vpop.f32.mrf.mxu1  ;;  %3690 = vmatprep.mubr.bf16.mxu0 %v8537_v63 }
 0x2ff   : > { %v5679_v27 = vadd.f32 %v5678_v0, %v5677_v52  ;;  %v5784_v32 = vpop.f32.mrf.mxu0 }
 0x300   : > { %v5785_v28 = vadd.f32 %v5784_v32, %v5783_v15  ;;  %v5680_v40 = vpop.f32.mrf.mxu1 }
 0x301   : > { %v5786_v23 = vpop.f32.mrf.mxu0  ;;  %v3146_v2 = vadd.f32 %v5679_v27, %v8799_v12 }
 0x302   : > { %v8811_v41 = vadd.f32 %v5785_v28, %v3138_v62  ;;  %v5681_v45 = vpop.f32.mrf.mxu1 }
 0x303   : > { %v5682_v60 = vadd.f32 %v5681_v45, %v5680_v40  ;;  %v5787_v19 = vpop.f32.mrf.mxu0 }
 0x304   : > { %v5788_v51 = vadd.f32 %v5787_v19, %v5786_v23  ;;  %v5683_v17 = vpop.f32.mrf.mxu1  ;;  %3538 = vmatmul.mubr.bf16.gmra.mxu1 %v8537_v63 }
 0x305   : > { %v5789_v34 = vpop.f32.mrf.mxu0  ;;  %5064 = vmatprep.mubr.msk.bf16.mxu1 %vm7217_vm6, %v8528_v57  ;;  %5106 = vmatmul.mubr.msk.bf16.gmra.mxu0 %vm7016_vm4, %v8567_v14  ;;  %v3149_v48 = vadd.f32 %v5682_v60, %v8799_v12 }
 0x306   : > { %v8821_v24 = vadd.f32 %v5788_v51, %v3141_v16  ;;  %v5684_v11 = vpop.f32.mrf.mxu1  ;;  %3698 = vmatprep.mubr.bf16.mxu0 %v8563_v49 }
 0x307   : > { %v5685_v39 = vadd.f32 %v5684_v11, %v5683_v17  ;;  %v5790_v4 = vpop.f32.mrf.mxu0 }
 0x308   : > { %v5791_v21 = vadd.f32 %v5790_v4, %v5789_v34  ;;  %v5686_v63 = vpop.f32.mrf.mxu1 }
 0x309   : > { %v5792_v8 = vpop.f32.mrf.mxu0  ;;  %v3154_v62 = vadd.f32 %v5685_v39, %v8799_v12 }
 0x30a   : > { %v8825_v56 = vadd.f32 %v5791_v21, %v3146_v2  ;;  %v5687_v29 = vpop.f32.mrf.mxu1 }
 0x30b   : > { %v5688_v35 = vadd.f32 %v5687_v29, %v5686_v63  ;;  %v5793_v31 = vpop.f32.mrf.mxu0 }
 0x30c   : > { %v5794_v14 = vadd.f32 %v5793_v31, %v5792_v8  ;;  %v5689_v22 = vpop.f32.mrf.mxu1  ;;  %3546 = vmatmul.mubr.bf16.gmra.mxu1 %v8563_v49 }
 0x30d   : > { %v5795_v54 = vpop.f32.mrf.mxu0  ;;  %5067 = vmatprep.mubr.msk.bf16.mxu1 %vm7217_vm6, %v8616_v37  ;;  %5109 = vmatmul.mubr.msk.bf16.gmra.mxu0 %vm7016_vm4, %v8584_v44  ;;  %v3157_v23 = vadd.f32 %v5688_v35, %v8799_v12 }
 0x30e   : > { %v8835_v1 = vadd.f32 %v5794_v14, %v3149_v48  ;;  %v5690_v9 = vpop.f32.mrf.mxu1  ;;  %3706 = vmatprep.mubr.bf16.mxu0 %v8578_v47 }
 0x30f   : > { %v5691_v52 = vadd.f32 %v5690_v9, %v5689_v22  ;;  %v5796_v15 = vpop.f32.mrf.mxu0 }
 0x310   : > { %v5797_v0 = vadd.f32 %v5796_v15, %v5795_v54  ;;  %v5692_v49 = vpop.f32.mrf.mxu1 }
 0x311   : > { %v5798_v27 = vpop.f32.mrf.mxu0  ;;  %v3162_v34 = vadd.f32 %v5691_v52, %v8799_v12 }
 0x312   : > { %v8839_v32 = vadd.f32 %v5797_v0, %v3154_v62  ;;  %v5693_v61 = vpop.f32.mrf.mxu1 }
 0x313   : > { %v5694_v28 = vadd.f32 %v5693_v61, %v5692_v49  ;;  %v5799_v40 = vpop.f32.mrf.mxu0 }
 0x314   : > { %v5800_v44 = vadd.f32 %v5799_v40, %v5798_v27  ;;  %v5695_v45 = vpop.f32.mrf.mxu1  ;;  %3554 = vmatmul.mubr.bf16.gmra.mxu1 %v8578_v47 }
 0x315   : > { %v5801_v60 = vpop.f32.mrf.mxu0  ;;  %5070 = vmatprep.mubr.msk.bf16.mxu1 %vm7217_vm6, %v8586_v6  ;;  %5112 = vmatmul.mubr.msk.bf16.gmra.mxu0 %vm7016_vm4, %v8599_v42  ;;  %v3165_v8 = vadd.f32 %v5694_v28, %v8799_v12 }
 0x316   : > { %v8849_v19 = vadd.f32 %v5800_v44, %v3157_v23  ;;  %v5696_v16 = vpop.f32.mrf.mxu1  ;;  %3714 = vmatprep.mubr.bf16.mxu0 %v8606_v3 }
 0x317   : > { %v5697_v51 = vadd.f32 %v5696_v16, %v5695_v45  ;;  %v5802_v17 = vpop.f32.mrf.mxu0 }
 0x318   : > { %v5803_v11 = vadd.f32 %v5802_v17, %v5801_v60  ;;  %v5698_v47 = vpop.f32.mrf.mxu1 }
 0x319   : > { %v5804_v39 = vpop.f32.mrf.mxu0  ;;  %v3170_v54 = vadd.f32 %v5697_v51, %v8799_v12 }
 0x31a   : > { %v8853_v4 = vadd.f32 %v5803_v11, %v3162_v34  ;;  %v5699_v2 = vpop.f32.mrf.mxu1 }
 0x31b   : > { %v5700_v21 = vadd.f32 %v5699_v2, %v5698_v47  ;;  %v5805_v63 = vpop.f32.mrf.mxu0 }
 0x31c   : > { %v5806_v42 = vadd.f32 %v5805_v63, %v5804_v39  ;;  %v5701_v29 = vpop.f32.mrf.mxu1  ;;  %3562 = vmatmul.mubr.bf16.gmra.mxu1 %v8606_v3 }
 0x31d   : > { %v5807_v35 = vpop.f32.mrf.mxu0  ;;  %5073 = vmatprep.mubr.msk.bf16.mxu1 %vm7217_vm6, %v8625_v26  ;;  %5115 = vmatmul.mubr.msk.bf16.gmra.mxu0 %vm7016_vm4, %v8620_v5  ;;  %v3173_v27 = vadd.f32 %v5700_v21, %v8799_v12 }
 0x31e   : > { %v8863_v31 = vadd.f32 %v5806_v42, %v3165_v8  ;;  %v5702_v48 = vpop.f32.mrf.mxu1  ;;  %3722 = vmatprep.mubr.bf16.mxu0 %v8614_v53  ;;  %v9462_v42 = vmov 0.0|0.0  }
 0x31f   : > { %v5703_v14 = vadd.f32 %v5702_v48, %v5701_v29  ;;  %v5808_v22 = vpop.f32.mrf.mxu0 }
 0x320   : > { %v5809_v9 = vadd.f32 %v5808_v22, %v5807_v35  ;;  %v5704_v3 = vpop.f32.mrf.mxu1 }
 0x321   : > { %v5810_v52 = vpop.f32.mrf.mxu0  ;;  %v3178_v60 = vadd.f32 %v5703_v14, %v8799_v12 }
 0x322   : > { %v8867_v15 = vadd.f32 %v5809_v9, %v3170_v54  ;;  %v5705_v62 = vpop.f32.mrf.mxu1  ;;  %v6549_v9 = vld [vmem:[%s6950_s19 + $0x8] sm:$0xff] }
 0x323   : > { %v5706_v0 = vadd.f32 %v5705_v62, %v5704_v3  ;;  %v5811_v49 = vpop.f32.mrf.mxu0 }
 0x324   : > { %v5812_v5 = vadd.f32 %v5811_v49, %v5810_v52  ;;  %v5707_v61 = vpop.f32.mrf.mxu1  ;;  %3570 = vmatmul.mubr.bf16.gmra.mxu1 %v8614_v53 }
 0x325   : > { %v5813_v28 = vpop.f32.mrf.mxu0  ;;  %5076 = vmatprep.mubr.msk.bf16.mxu1 %vm7217_vm6, %v8643_v13  ;;  %5118 = vmatmul.mubr.msk.bf16.gmra.mxu0 %vm7016_vm4, %v8627_v20  ;;  %v3181_v39 = vadd.f32 %v5706_v0, %v8799_v12 }
 0x326   : > { %v8877_v40 = vadd.f32 %v5812_v5, %v3173_v27  ;;  %v5708_v23 = vpop.f32.mrf.mxu1  ;;  %3730 = vmatprep.mubr.bf16.mxu0 %v8629_v33 }
 0x327   : > { %v5709_v44 = vadd.f32 %v5708_v23, %v5707_v61  ;;  %v5814_v45 = vpop.f32.mrf.mxu0 }
 0x328   : > { %v5815_v16 = vadd.f32 %v5814_v45, %v5813_v28  ;;  %v5710_v53 = vpop.f32.mrf.mxu1 }
 0x329   : > { %v5816_v51 = vpop.f32.mrf.mxu0  ;;  %v3186_v48 = vadd.f32 %v5709_v44, %v8799_v12 }
 0x32a   : > { %v8881_v17 = vadd.f32 %v5815_v16, %v3178_v60  ;;  %v5711_v34 = vpop.f32.mrf.mxu1 }
 0x32b   : > { %v5712_v11 = vadd.f32 %v5711_v34, %v5710_v53  ;;  %v5817_v47 = vpop.f32.mrf.mxu0  ;;  %v6551_v34 = vld [vmem:[%s6950_s19 + $0x28] sm:$0xff] }
 0x32c   : > { %v5818_v20 = vadd.f32 %v5817_v47, %v5816_v51  ;;  %v5713_v2 = vpop.f32.mrf.mxu1  ;;  %3578 = vmatmul.mubr.bf16.gmra.mxu1 %v8629_v33  ;;  %v6550_v51 = vld [vmem:[%s6950_s19 + $0x20] sm:$0xff] }
 0x32d   : > { %v5819_v21 = vpop.f32.mrf.mxu0  ;;  %5121 = vmatmul.mubr.msk.bf16.gmra.mxu0 %vm7016_vm4, %v8635_v10  ;;  %6215 = vmatprep.mubr.msk.bf16.mxu1 %vm7217_vm6, %v8194_v18  ;;  %v6548_v10 = vld [vmem:[%s6950_s19] sm:$0xff]  ;;  %v3189_v62 = vadd.f32 %v5712_v11, %v8799_v12  ;;  %v3910_v11 = vpack.c.bf16 %v6551_v34, %v6550_v51 }
 0x32e   : > { %v8891_v63 = vadd.f32 %v5818_v20, %v3181_v39  ;;  %v5714_v8 = vpop.f32.mrf.mxu1  ;;  %3738 = vmatprep.mubr.bf16.mxu0 %v9462_v42  ;;  %v3908_v3 = vpack.c.bf16 %v6549_v9, %v6548_v10 }
 0x32f   : > { %v5715_v29 = vadd.f32 %v5714_v8, %v5713_v2  ;;  %v5820_v35 = vpop.f32.mrf.mxu0  ;;  %v9463_v8 = vld [vmem:[#allocation19_spill] sm:$0xff] }
 0x330   : > { %v5821_v33 = vadd.f32 %v5820_v35, %v5819_v21  ;;  %v5716_v14 = vpop.f32.mrf.mxu1 }
 0x331   : > { %v5822_v22 = vpop.f32.mrf.mxu0  ;;  %v3194_v44 = vadd.f32 %v5715_v29, %v8799_v12  ;;  %v9464_v29 = vld [vmem:[#allocation18_spill] sm:$0xff] }
 0x332   : > { %v8895_v54 = vadd.f32 %v5821_v33, %v3186_v48  ;;  %v5717_v59 = vpop.f32.mrf.mxu1  ;;  %v9465_v35 = vpack.c.bf16 %v9463_v8, %v9464_v29  ;;  %v6558_v8 = vld [vmem:[%s6950_s19 + $0x60] sm:$0xff]  ;;  %v6559_v29 = vld [vmem:[%s6950_s19 + $0x68] sm:$0xff] }
 0x333   : > { %v5718_v52 = vadd.f32 %v5717_v59, %v5716_v14  ;;  %v5823_v18 = vpop.f32.mrf.mxu0 }
 0x334   : > { %v5824_v0 = vadd.f32 %v5823_v18, %v5822_v22  ;;  %v5719_v49 = vpop.f32.mrf.mxu1  ;;  %6216 = vmatmul.mubr.msk.bf16.vlgmr.msra.gmra.mxu1 %vm7217_vm6, %v8263_v46 }
 0x335   : > { %v5825_v27 = vpop.f32.mrf.mxu0  ;;  %3739 = vmatmul.mubr.bf16.gmra.mxu0 %v9462_v42  ;;  %6219 = vmatprep.mubr.msk.bf16.mxu1 %vm7217_vm6, %v9452_v55  ;;  %v3197_v55 = vadd.f32 %v5718_v52, %v8799_v12  ;;  %v6553_v52 = vld [vmem:[%s6950_s19 + $0x38] sm:$0xff] }
 0x336   : > { %v8907_v5 = vadd.f32 %v5824_v0, %v3189_v62  ;;  %v5720_v61 = vpop.f32.mrf.mxu1  ;;  %6263 = vmatprep.mubr.bf16.mxu0 %v3908_v3  ;;  %v6552_v3 = vld [vmem:[%s6950_s19 + $0x30] sm:$0xff]  ;;  %v6554_v0 = vld [vmem:[%s6950_s19 + $0x40] sm:$0xff] }
 0x337   : > { %v5721_v28 = vadd.f32 %v5720_v61, %v5719_v49  ;;  %v5826_v23 = vpop.f32.mrf.mxu0  ;;  %v6555_v49 = vld [vmem:[%s6950_s19 + $0x48] sm:$0xff] }
 0x338   : > { %v5827_v45 = vadd.f32 %v5826_v23, %v5825_v27  ;;  %v5722_v60 = vpop.f32.mrf.mxu1  ;;  %v3912_v27 = vpack.c.bf16 %v6555_v49, %v6554_v0 }
 0x339   : > { %v5828_v16 = vpop.f32.mrf.mxu0  ;;  %v3202_v59 = vadd.f32 %v5721_v28, %v8799_v12 }
 0x33a   : > { %v8910_v46 = vadd.f32 %v5827_v45, %v3194_v44  ;;  %v5723_v53 = vpop.f32.mrf.mxu1 }
 0x33b   : > { %v5724_v47 = vadd.f32 %v5723_v53, %v5722_v60  ;;  %v5829_v39 = vpop.f32.mrf.mxu0 }
 0x33c   : > { %v5830_v20 = vadd.f32 %v5829_v39, %v5828_v16  ;;  %v5725_v2 = vpop.f32.mrf.mxu1  ;;  %6220 = vmatmul.mubr.msk.bf16.gmra.mxu1 %vm7217_vm6, %v9455_v30 }
 0x33d   : > { %v5831_v21 = vpop.f32.mrf.mxu0  ;;  %6223 = vmatprep.mubr.msk.bf16.mxu1 %vm7217_vm6, %v8320_v7  ;;  %6264 = vmatmul.mubr.bf16.vlgmr.msra.gmra.mxu0 %v9465_v35  ;;  %v3911_v7 = vpack.c.bf16 %v6553_v52, %v6552_v3  ;;  %v3205_v44 = vadd.f32 %v5724_v47, %v8799_v12  ;;  %v3914_v35 = vpack.c.bf16 %v6559_v29, %v6558_v8 }
 0x33e   : > { %v8924_v48 = vadd.f32 %v5830_v20, %v3197_v55  ;;  %v5726_v33 = vpop.f32.mrf.mxu1  ;;  %6267 = vmatprep.mubr.bf16.mxu0 %v3910_v11  ;;  %v6557_v20 = vld [vmem:[%s6950_s19 + $0x58] sm:$0xff] }
 0x33f   : > { %v5727_v14 = vadd.f32 %v5726_v33, %v5725_v2  ;;  %v5832_v22 = vpop.f32.mrf.mxu0 }
 0x340   : > { %v5833_v30 = vadd.f32 %v5832_v22, %v5831_v21  ;;  %v5728_v10 = vpop.f32.mrf.mxu1 }
 0x341   : > { %v5834_v9 = vpop.f32.mrf.mxu0  ;;  %v3210_v11 = vadd.f32 %v5727_v14, %v8799_v12 }
 0x342   : > { %v8929_v18 = vadd.f32 %v5833_v30, %v3202_v59  ;;  %v5729_v62 = vpop.f32.mrf.mxu1 }
 0x343   : > { %v5730_v61 = vadd.f32 %v5729_v62, %v5728_v10  ;;  %v5835_v23 = vpop.f32.mrf.mxu0 }
 0x344   : > { %v5836_v45 = vadd.f32 %v5835_v23, %v5834_v9  ;;  %v5731_v28 = vpop.f32.mrf.mxu1  ;;  %6224 = vmatmul.mubr.msk.bf16.gmra.mxu1 %vm7217_vm6, %v8457_v50  ;;  %v6556_v50 = vld [vmem:[%s6950_s19 + $0x50] sm:$0xff] }
 0x345   : > { %v5837_v60 = vpop.f32.mrf.mxu0  ;;  %6227 = vmatprep.mubr.msk.bf16.mxu1 %vm7217_vm6, %v8389_v43  ;;  %6268 = vmatmul.mubr.bf16.gmra.mxu0 %v3911_v7  ;;  %v3913_v2 = vpack.c.bf16 %v6557_v20, %v6556_v50  ;;  %v3213_v59 = vadd.f32 %v5730_v61, %v8799_v12  ;;  %v6561_v61 = vld [vmem:[%s6950_s19 + $0x78] sm:$0xff] }
 0x346   : > { %v8940_v16 = vadd.f32 %v5836_v45, %v3205_v44  ;;  %v5732_v53 = vpop.f32.mrf.mxu1  ;;  %6271 = vmatprep.mubr.bf16.mxu0 %v3912_v27  ;;  %v6562_v45 = vld [vmem:[%s6950_s19 + $0x80] sm:$0xff] }
 0x347   : > { %v5733_v51 = vadd.f32 %v5732_v53, %v5731_v28  ;;  %v5838_v34 = vpop.f32.mrf.mxu0  ;;  %v6563_v28 = vld [vmem:[%s6950_s19 + $0x88] sm:$0xff] }
 0x348   : > { %v5839_v47 = vadd.f32 %v5838_v34, %v5837_v60  ;;  %v5734_v39 = vpop.f32.mrf.mxu1  ;;  %v3916_v60 = vpack.c.bf16 %v6563_v28, %v6562_v45 }
 0x349   : > { %v5840_v55 = vpop.f32.mrf.mxu0  ;;  %v3218_v62 = vadd.f32 %v5733_v51, %v8799_v12 }
 0x34a   : > { %v8945_v21 = vadd.f32 %v5839_v47, %v3210_v11  ;;  %v5735_v43 = vpop.f32.mrf.mxu1 }
 0x34b   : > { %v5736_v33 = vadd.f32 %v5735_v43, %v5734_v39  ;;  %v5841_v22 = vpop.f32.mrf.mxu0 }
 0x34c   : > { %v5842_v30 = vadd.f32 %v5841_v22, %v5840_v55  ;;  %v5737_v14 = vpop.f32.mrf.mxu1  ;;  %6228 = vmatmul.mubr.msk.bf16.gmra.mxu1 %vm7217_vm6, %v8550_v58  ;;  %v6560_v58 = vld [vmem:[%s6950_s19 + $0x70] sm:$0xff] }
 0x34d   : > { %v5843_v10 = vpop.f32.mrf.mxu0  ;;  %6231 = vmatprep.mubr.msk.bf16.mxu1 %vm7217_vm6, %v8463_v25  ;;  %6272 = vmatmul.mubr.bf16.gmra.mxu0 %v3913_v2  ;;  %v3915_v23 = vpack.c.bf16 %v6561_v61, %v6560_v58  ;;  %v3221_v11 = vadd.f32 %v5736_v33, %v8799_v12  ;;  %v6565_v33 = vld [vmem:[%s6950_s19 + $0x98] sm:$0xff] }
 0x34e   : > { %v8956_v9 = vadd.f32 %v5842_v30, %v3213_v59  ;;  %v5738_v3 = vpop.f32.mrf.mxu1  ;;  %6275 = vmatprep.mubr.bf16.mxu0 %v3914_v35  ;;  %v6566_v30 = vld [vmem:[%s6950_s19 + $0xa8] sm:$0xff] }
 0x34f   : > { %v5739_v52 = vadd.f32 %v5738_v3, %v5737_v14  ;;  %v5844_v7 = vpop.f32.mrf.mxu0  ;;  %v6567_v14 = vld [vmem:[%s6950_s19 + $0xa0] sm:$0xff] }
 0x350   : > { %v5845_v0 = vadd.f32 %v5844_v7, %v5843_v10  ;;  %v5740_v49 = vpop.f32.mrf.mxu1  ;;  %v3918_v10 = vpack.c.bf16 %v6566_v30, %v6567_v14 }
 0x351   : > { %v5846_v27 = vpop.f32.mrf.mxu0  ;;  %v3226_v43 = vadd.f32 %v5739_v52, %v8799_v12 }
 0x352   : > { %v8961_v44 = vadd.f32 %v5845_v0, %v3218_v62  ;;  %v5741_v25 = vpop.f32.mrf.mxu1 }
 0x353   : > { %v5742_v53 = vadd.f32 %v5741_v25, %v5740_v49  ;;  %v5847_v34 = vpop.f32.mrf.mxu0 }
 0x354   : > { %v5848_v47 = vadd.f32 %v5847_v34, %v5846_v27  ;;  %v5743_v51 = vpop.f32.mrf.mxu1  ;;  %6232 = vmatmul.mubr.msk.bf16.gmra.mxu1 %vm7217_vm6, %v8580_v36  ;;  %v6564_v36 = vld [vmem:[%s6950_s19 + $0x90] sm:$0xff] }
 0x355   : > { %v5849_v39 = vpop.f32.mrf.mxu0  ;;  %6235 = vmatprep.mubr.msk.bf16.mxu1 %vm7217_vm6, %v8528_v57  ;;  %6276 = vmatmul.mubr.bf16.gmra.mxu0 %v3915_v23  ;;  %v3917_v22 = vpack.c.bf16 %v6565_v33, %v6564_v36  ;;  %v3229_v62 = vadd.f32 %v5742_v53, %v8799_v12  ;;  %v6569_v53 = vld [vmem:[%s6950_s19 + $0xb8] sm:$0xff] }
 0x356   : > { %v8972_v55 = vadd.f32 %v5848_v47, %v3221_v11  ;;  %v5744_v50 = vpop.f32.mrf.mxu1  ;;  %6279 = vmatprep.mubr.bf16.mxu0 %v3916_v60  ;;  %v6570_v47 = vld [vmem:[%s6950_s19 + $0xc0] sm:$0xff] }
 0x357   : > { %v5745_v20 = vadd.f32 %v5744_v50, %v5743_v51  ;;  %v5850_v2 = vpop.f32.mrf.mxu0  ;;  %v6571_v51 = vld [vmem:[%s6950_s19 + $0xc8] sm:$0xff] }
 0x358   : > { %v5851_v8 = vadd.f32 %v5850_v2, %v5849_v39  ;;  %v5746_v29 = vpop.f32.mrf.mxu1  ;;  %v3920_v39 = vpack.c.bf16 %v6571_v51, %v6570_v47 }
 0x359   : > { %v5852_v35 = vpop.f32.mrf.mxu0  ;;  %v3234_v25 = vadd.f32 %v5745_v20, %v8799_v12 }
 0x35a   : > { %v8977_v59 = vadd.f32 %v5851_v8, %v3226_v43  ;;  %v5747_v57 = vpop.f32.mrf.mxu1 }
 0x35b   : > { %v5748_v3 = vadd.f32 %v5747_v57, %v5746_v29  ;;  %v5853_v7 = vpop.f32.mrf.mxu0 }
 0x35c   : > { %v5854_v0 = vadd.f32 %v5853_v7, %v5852_v35  ;;  %v5749_v52 = vpop.f32.mrf.mxu1  ;;  %6236 = vmatmul.mubr.msk.bf16.gmra.mxu1 %vm7217_vm6, %v8616_v37  ;;  %v6568_v37 = vld [vmem:[%s6950_s19 + $0xb0] sm:$0xff] }
 0x35d   : > { %v5855_v49 = vpop.f32.mrf.mxu0  ;;  %6239 = vmatprep.mubr.msk.bf16.mxu1 %vm7217_vm6, %v8586_v6  ;;  %6280 = vmatmul.mubr.bf16.gmra.mxu0 %v3917_v22  ;;  %v3919_v34 = vpack.c.bf16 %v6569_v53, %v6568_v37  ;;  %v3237_v43 = vadd.f32 %v5748_v3, %v8799_v12  ;;  %v6573_v3 = vld [vmem:[%s6950_s19 + $0xd8] sm:$0xff] }
 0x35e   : > { %v8988_v27 = vadd.f32 %v5854_v0, %v3229_v62  ;;  %v5750_v58 = vpop.f32.mrf.mxu1  ;;  %6283 = vmatprep.mubr.bf16.mxu0 %v3918_v10  ;;  %v6575_v0 = vld [vmem:[%s6950_s19 + $0xe8] sm:$0xff] }
 0x35f   : > { %v5751_v61 = vadd.f32 %v5750_v58, %v5749_v52  ;;  %v5856_v23 = vpop.f32.mrf.mxu0 }
 0x360   : > { %v5857_v45 = vadd.f32 %v5856_v23, %v5855_v49  ;;  %v5752_v28 = vpop.f32.mrf.mxu1 }
 0x361   : > { %v5858_v60 = vpop.f32.mrf.mxu0  ;;  %v3242_v57 = vadd.f32 %v5751_v61, %v8799_v12 }
 0x362   : > { %v8993_v11 = vadd.f32 %v5857_v45, %v3234_v25  ;;  %v5753_v6 = vpop.f32.mrf.mxu1 }
 0x363   : > { %v5754_v50 = vadd.f32 %v5753_v6, %v5752_v28  ;;  %v5859_v2 = vpop.f32.mrf.mxu0 }
 0x364   : > { %v5860_v8 = vadd.f32 %v5859_v2, %v5858_v60  ;;  %v5755_v20 = vpop.f32.mrf.mxu1  ;;  %6240 = vmatmul.mubr.msk.bf16.gmra.mxu1 %vm7217_vm6, %v8625_v26  ;;  %v6572_v26 = vld [vmem:[%s6950_s19 + $0xd0] sm:$0xff] }
 0x365   : > { %v5861_v29 = vpop.f32.mrf.mxu0  ;;  %6243 = vmatprep.mubr.msk.bf16.mxu1 %vm7217_vm6, %v8643_v13  ;;  %6284 = vmatmul.mubr.bf16.gmra.mxu0 %v3919_v34  ;;  %v3921_v7 = vpack.c.bf16 %v6573_v3, %v6572_v26  ;;  %v6574_v13 = vld [vmem:[%s6950_s19 + $0xe0] sm:$0xff]  ;;  %v3245_v23 = vadd.f32 %v5754_v50, %v8799_v12  ;;  %v6577_v50 = vld [vmem:[%s6950_s19 + $0xf8] sm:$0xff] }
 0x366   : > { %v9004_v35 = vadd.f32 %v5860_v8, %v3237_v43  ;;  %v5756_v36 = vpop.f32.mrf.mxu1  ;;  %6287 = vmatprep.mubr.bf16.mxu0 %v3920_v39  ;;  %v3922_v52 = vpack.c.bf16 %v6575_v0, %v6574_v13  ;;  %v6576_v39 = vld [vmem:[%s6950_s19 + $0xf0] sm:$0xff]  ;;  %s4324_s19 = scalar_lea.sflag [#allocation5], %s6946_s16 }
 0x367   : > { %v5757_v33 = vadd.f32 %v5756_v36, %v5755_v20  ;;  %v5862_v22 = vpop.f32.mrf.mxu0  ;;  %v3923_v2 = vpack.c.bf16 %v6577_v50, %v6576_v39 }
 0x368   : > { %v5863_v30 = vadd.f32 %v5862_v22, %v5861_v29  ;;  %v5758_v14 = vpop.f32.mrf.mxu1 }
 0x369   : > { %v5864_v10 = vpop.f32.mrf.mxu0  ;;  %v3250_v34 = vadd.f32 %v5757_v33, %v8799_v12 }
 0x36a   : > { %v9009_v62 = vadd.f32 %v5863_v30, %v3242_v57  ;;  %v5759_v38 = vpop.f32.mrf.mxu1 }
 0x36b   : > { %v5760_v49 = vadd.f32 %v5759_v38, %v5758_v14  ;;  %v5865_v58 = vpop.f32.mrf.mxu0 }
 0x36c   : > { %v5866_v25 = vadd.f32 %v5865_v58, %v5864_v10  ;;  %v5761_v61 = vpop.f32.mrf.mxu1  ;;  %6244 = vmatmul.mubr.bf16.gmra.mxu1 %v9462_v42 }
 0x36d   : > { %v5867_v45 = vpop.f32.mrf.mxu0  ;;  %6288 = vmatmul.mubr.bf16.gmra.mxu0 %v3921_v7  ;;  %v3253_v29 = vadd.f32 %v5760_v49, %v8799_v12 }
 0x36e   : > { %v9015_v28 = vadd.f32 %v5866_v25, %v3245_v23  ;;  %v5762_v60 = vpop.f32.mrf.mxu1  ;;  %6291 = vmatprep.mubr.bf16.mxu0 %v3922_v52 }
 0x36f   : > { %v5763_v37 = vadd.f32 %v5762_v60, %v5761_v61  ;;  %v5868_v53 = vpop.f32.mrf.mxu0 }
 0x370   : > { %v5869_v6 = vadd.f32 %v5868_v53, %v5867_v45  ;;  %v5764_v47 = vpop.f32.mrf.mxu1 }
 0x371   : > { %v5870_v51 = vpop.f32.mrf.mxu0  ;;  %v3258_v26 = vadd.f32 %v5763_v37, %v8799_v12 }
 0x372   : > { %v9020_v43 = vadd.f32 %v5869_v6, %v3250_v34  ;;  %v5765_v8 = vpop.f32.mrf.mxu1 }
 0x373   : > { %v5766_v42 = vadd.f32 %v5765_v8, %v5764_v47  ;;  %v5871_v20 = vpop.f32.mrf.mxu0 }
 0x374   : > { %v5872_v36 = vadd.f32 %v5871_v20, %v5870_v51  ;;  %v5895_v22 = vpop.f32.mrf.mxu1 }
 0x375   : > { %v5873_v57 = vpop.f32.mrf.mxu0  ;;  %6292 = vmatmul.mubr.bf16.gmra.mxu0 %v3923_v2  ;;  %v3261_v23 = vadd.f32 %v5766_v42, %v8799_v12 }
 0x376   : > { %v9023_v30 = vadd.f32 %v5872_v36, %v3253_v29  ;;  %v5896_v33 = vpop.f32.mrf.mxu1 }
 0x377   : > { %v5897_v14 = vadd.f32 %v5896_v33, %v5895_v22  ;;  %v5874_v10 = vpop.f32.mrf.mxu0 }
 0x378   : > { %v5875_v3 = vadd.f32 %v5874_v10, %v5873_v57  ;;  %v5898_v7 = vpop.f32.mrf.mxu1 }
 0x379   : > { %v3460_v38 = vadd.f32 %v5897_v14, %v8811_v41  ;;  %v5876_v13 = vpop.f32.mrf.mxu0 }
 0x37a   : > { %v9027_v0 = vadd.f32 %v5875_v3, %v3258_v26  ;;  %v5899_v52 = vpop.f32.mrf.mxu1 }
 0x37b   : > { %v5900_v49 = vadd.f32 %v5899_v52, %v5898_v7  ;;  %v5877_v58 = vpop.f32.mrf.mxu0 }
 0x37c   : > { %v5878_v25 = vadd.f32 %v5877_v58, %v5876_v13  ;;  %v5901_v61 = vpop.f32.mrf.mxu1 }
 0x37d   : > { %v3463_v45 = vadd.f32 %v5900_v49, %v8821_v24  ;;  %v6007_v60 = vpop.f32.mrf.mxu0 }
 0x37e   : > { %v9031_v53 = vadd.f32 %v5878_v25, %v3261_v23  ;;  %v5902_v37 = vpop.f32.mrf.mxu1 }
 0x37f   : > { %v5903_v34 = vadd.f32 %v5902_v37, %v5901_v61  ;;  %v6008_v6 = vpop.f32.mrf.mxu0 }
 0x380   : > { %v6009_v47 = vadd.f32 %v6008_v6, %v6007_v60  ;;  %v5904_v41 = vpop.f32.mrf.mxu1 }
 0x381   : > { %v3468_v51 = vadd.f32 %v5903_v34, %v8825_v56  ;;  %v6010_v39 = vpop.f32.mrf.mxu0 }
 0x382   : > { %v5905_v50 = vpop.f32.mrf.mxu1  ;;  %v9034_v2 = vadd.f32 %v6009_v47, %v3460_v38 }
 0x383   : > { %v5906_v8 = vadd.f32 %v5905_v50, %v5904_v41  ;;  %v6011_v12 = vpop.f32.mrf.mxu0 }
 0x384   : > { %v6012_v42 = vadd.f32 %v6011_v12, %v6010_v39  ;;  %v5907_v20 = vpop.f32.mrf.mxu1 }
 0x385   : > { %v3471_v24 = vadd.f32 %v5906_v8, %v8835_v1  ;;  %v6013_v29 = vpop.f32.mrf.mxu0 }
 0x386   : > { %v5908_v36 = vpop.f32.mrf.mxu1  ;;  %v9037_v22 = vadd.f32 %v6012_v42, %v3463_v45 }
 0x387   : > { %v5909_v57 = vadd.f32 %v5908_v36, %v5907_v20  ;;  %v6014_v33 = vpop.f32.mrf.mxu0 }
 0x388   : > { %v6015_v14 = vadd.f32 %v6014_v33, %v6013_v29  ;;  %v5910_v10 = vpop.f32.mrf.mxu1 }
 0x389   : > { %v3476_v56 = vadd.f32 %v5909_v57, %v8839_v32  ;;  %v6016_v26 = vpop.f32.mrf.mxu0 }
 0x38a   : > { %v5911_v3 = vpop.f32.mrf.mxu1  ;;  %v9040_v7 = vadd.f32 %v6015_v14, %v3468_v51 }
 0x38b   : > { %v5912_v38 = vadd.f32 %v5911_v3, %v5910_v10  ;;  %v6017_v13 = vpop.f32.mrf.mxu0 }
 0x38c   : > { %v6018_v52 = vadd.f32 %v6017_v13, %v6016_v26  ;;  %v5913_v49 = vpop.f32.mrf.mxu1 }
 0x38d   : > { %v3479_v1 = vadd.f32 %v5912_v38, %v8849_v19  ;;  %v6019_v58 = vpop.f32.mrf.mxu0 }
 0x38e   : > { %v5914_v23 = vpop.f32.mrf.mxu1  ;;  %v9043_v25 = vadd.f32 %v6018_v52, %v3471_v24 }
 0x38f   : > { %v5915_v61 = vadd.f32 %v5914_v23, %v5913_v49  ;;  %v6020_v45 = vpop.f32.mrf.mxu0 }
 0x390   : > { %v6021_v60 = vadd.f32 %v6020_v45, %v6019_v58  ;;  %v5916_v37 = vpop.f32.mrf.mxu1 }
 0x391   : > { %v3484_v32 = vadd.f32 %v5915_v61, %v8853_v4  ;;  %v6022_v34 = vpop.f32.mrf.mxu0 }
 0x392   : > { %v5917_v6 = vpop.f32.mrf.mxu1  ;;  %v9046_v47 = vadd.f32 %v6021_v60, %v3476_v56 }
 0x393   : > { %v5918_v41 = vadd.f32 %v5917_v6, %v5916_v37  ;;  %v6023_v51 = vpop.f32.mrf.mxu0 }
 0x394   : > { %v6024_v39 = vadd.f32 %v6023_v51, %v6022_v34  ;;  %v5919_v50 = vpop.f32.mrf.mxu1 }
 0x395   : > { %v3487_v19 = vadd.f32 %v5918_v41, %v8863_v31  ;;  %v6025_v8 = vpop.f32.mrf.mxu0 }
 0x396   : > { %v5920_v12 = vpop.f32.mrf.mxu1  ;;  %v9049_v42 = vadd.f32 %v6024_v39, %v3479_v1 }
 0x397   : > { %v5921_v20 = vadd.f32 %v5920_v12, %v5919_v50  ;;  %v6026_v24 = vpop.f32.mrf.mxu0 }
 0x398   : > { %v6027_v29 = vadd.f32 %v6026_v24, %v6025_v8  ;;  %v5922_v36 = vpop.f32.mrf.mxu1 }
 0x399   : > { %v3492_v4 = vadd.f32 %v5921_v20, %v8867_v15  ;;  %v6028_v57 = vpop.f32.mrf.mxu0 }
 0x39a   : > { %v5923_v33 = vpop.f32.mrf.mxu1  ;;  %v9052_v14 = vadd.f32 %v6027_v29, %v3484_v32 }
 0x39b   : > { %v5924_v10 = vadd.f32 %v5923_v33, %v5922_v36  ;;  %v6029_v56 = vpop.f32.mrf.mxu0 }
 0x39c   : > { %v6030_v26 = vadd.f32 %v6029_v56, %v6028_v57  ;;  %v5925_v3 = vpop.f32.mrf.mxu1 }
 0x39d   : > { %v3495_v31 = vadd.f32 %v5924_v10, %v8877_v40  ;;  %v6031_v38 = vpop.f32.mrf.mxu0 }
 0x39e   : > { %v5926_v13 = vpop.f32.mrf.mxu1  ;;  %v9055_v52 = vadd.f32 %v6030_v26, %v3487_v19 }
 0x39f   : > { %v5927_v49 = vadd.f32 %v5926_v13, %v5925_v3  ;;  %v6032_v1 = vpop.f32.mrf.mxu0 }
 0x3a0   : > { %v6033_v58 = vadd.f32 %v6032_v1, %v6031_v38  ;;  %v5928_v23 = vpop.f32.mrf.mxu1 }
 0x3a1   : > { %v3500_v15 = vadd.f32 %v5927_v49, %v8881_v17  ;;  %v6034_v61 = vpop.f32.mrf.mxu0 }
 0x3a2   : > { %v5929_v45 = vpop.f32.mrf.mxu1  ;;  %v9058_v60 = vadd.f32 %v6033_v58, %v3492_v4 }
 0x3a3   : > { %v5930_v37 = vadd.f32 %v5929_v45, %v5928_v23  ;;  %v6035_v32 = vpop.f32.mrf.mxu0 }
 0x3a4   : > { %v6036_v34 = vadd.f32 %v6035_v32, %v6034_v61  ;;  %v5931_v6 = vpop.f32.mrf.mxu1 }
 0x3a5   : > { %v3503_v40 = vadd.f32 %v5930_v37, %v8891_v63  ;;  %v6037_v41 = vpop.f32.mrf.mxu0 }
 0x3a6   : > { %v5932_v51 = vpop.f32.mrf.mxu1  ;;  %v9061_v39 = vadd.f32 %v6036_v34, %v3495_v31 }
 0x3a7   : > { %v5933_v50 = vadd.f32 %v5932_v51, %v5931_v6  ;;  %v6038_v19 = vpop.f32.mrf.mxu0 }
 0x3a8   : > { %v6039_v8 = vadd.f32 %v6038_v19, %v6037_v41  ;;  %v5934_v12 = vpop.f32.mrf.mxu1 }
 0x3a9   : > { %v3508_v17 = vadd.f32 %v5933_v50, %v8895_v54  ;;  %v6040_v20 = vpop.f32.mrf.mxu0 }
 0x3aa   : > { %v5935_v24 = vpop.f32.mrf.mxu1  ;;  %v9064_v29 = vadd.f32 %v6039_v8, %v3500_v15 }
 0x3ab   : > { %v5936_v36 = vadd.f32 %v5935_v24, %v5934_v12  ;;  %v6041_v4 = vpop.f32.mrf.mxu0 }
 0x3ac   : > { %v6042_v57 = vadd.f32 %v6041_v4, %v6040_v20  ;;  %v5937_v33 = vpop.f32.mrf.mxu1 }
 0x3ad   : > { %v3511_v63 = vadd.f32 %v5936_v36, %v8907_v5  ;;  %v6043_v10 = vpop.f32.mrf.mxu0 }
 0x3ae   : > { %v5938_v56 = vpop.f32.mrf.mxu1  ;;  %v9067_v26 = vadd.f32 %v6042_v57, %v3503_v40 }
 0x3af   : > { %v5939_v3 = vadd.f32 %v5938_v56, %v5937_v33  ;;  %v6044_v31 = vpop.f32.mrf.mxu0 }
 0x3b0   : > { %v6045_v38 = vadd.f32 %v6044_v31, %v6043_v10  ;;  %v5940_v13 = vpop.f32.mrf.mxu1 }
 0x3b1   : > { %v3516_v54 = vadd.f32 %v5939_v3, %v8910_v46  ;;  %v6046_v49 = vpop.f32.mrf.mxu0 }
 0x3b2   : > { %v5941_v1 = vpop.f32.mrf.mxu1  ;;  %v9070_v58 = vadd.f32 %v6045_v38, %v3508_v17 }
 0x3b3   : > { %v5942_v23 = vadd.f32 %v5941_v1, %v5940_v13  ;;  %v6047_v15 = vpop.f32.mrf.mxu0 }
 0x3b4   : > { %v6048_v61 = vadd.f32 %v6047_v15, %v6046_v49  ;;  %v5943_v45 = vpop.f32.mrf.mxu1 }
 0x3b5   : > { %v3519_v5 = vadd.f32 %v5942_v23, %v8924_v48  ;;  %v6049_v37 = vpop.f32.mrf.mxu0 }
 0x3b6   : > { %v5944_v32 = vpop.f32.mrf.mxu1  ;;  %v9073_v34 = vadd.f32 %v6048_v61, %v3511_v63 }
 0x3b7   : > { %v5945_v6 = vadd.f32 %v5944_v32, %v5943_v45  ;;  %v6050_v40 = vpop.f32.mrf.mxu0 }
 0x3b8   : > { %v6051_v41 = vadd.f32 %v6050_v40, %v6049_v37  ;;  %v5946_v51 = vpop.f32.mrf.mxu1 }
 0x3b9   : > { %v3524_v46 = vadd.f32 %v5945_v6, %v8929_v18  ;;  %v6052_v50 = vpop.f32.mrf.mxu0 }
 0x3ba   : > { %v5947_v19 = vpop.f32.mrf.mxu1  ;;  %v9076_v8 = vadd.f32 %v6051_v41, %v3516_v54 }
 0x3bb   : > { %v5948_v12 = vadd.f32 %v5947_v19, %v5946_v51  ;;  %v6053_v17 = vpop.f32.mrf.mxu0 }
 0x3bc   : > { %v6054_v20 = vadd.f32 %v6053_v17, %v6052_v50  ;;  %v5949_v24 = vpop.f32.mrf.mxu1 }
 0x3bd   : > { %v3527_v48 = vadd.f32 %v5948_v12, %v8940_v16  ;;  %v6055_v36 = vpop.f32.mrf.mxu0 }
 0x3be   : > { %v5950_v4 = vpop.f32.mrf.mxu1  ;;  %v9079_v57 = vadd.f32 %v6054_v20, %v3519_v5 }
 0x3bf   : > { %v5951_v33 = vadd.f32 %v5950_v4, %v5949_v24  ;;  %v6056_v63 = vpop.f32.mrf.mxu0 }
 0x3c0   : > { %v6057_v10 = vadd.f32 %v6056_v63, %v6055_v36  ;;  %v5952_v56 = vpop.f32.mrf.mxu1 }
 0x3c1   : > { %v3532_v18 = vadd.f32 %v5951_v33, %v8945_v21  ;;  %v6058_v3 = vpop.f32.mrf.mxu0 }
 0x3c2   : > { %v5953_v31 = vpop.f32.mrf.mxu1  ;;  %v9082_v38 = vadd.f32 %v6057_v10, %v3524_v46 }
 0x3c3   : > { %v5954_v13 = vadd.f32 %v5953_v31, %v5952_v56  ;;  %v6059_v54 = vpop.f32.mrf.mxu0 }
 0x3c4   : > { %v6060_v49 = vadd.f32 %v6059_v54, %v6058_v3  ;;  %v5955_v1 = vpop.f32.mrf.mxu1 }
 0x3c5   : > { %v3535_v16 = vadd.f32 %v5954_v13, %v8956_v9  ;;  %v6061_v23 = vpop.f32.mrf.mxu0 }
 0x3c6   : > { %v5956_v15 = vpop.f32.mrf.mxu1  ;;  %v9085_v61 = vadd.f32 %v6060_v49, %v3527_v48 }
 0x3c7   : > { %v5957_v45 = vadd.f32 %v5956_v15, %v5955_v1  ;;  %v6062_v5 = vpop.f32.mrf.mxu0 }
 0x3c8   : > { %v6063_v37 = vadd.f32 %v6062_v5, %v6061_v23  ;;  %v5958_v32 = vpop.f32.mrf.mxu1 }
 0x3c9   : > { %v3540_v21 = vadd.f32 %v5957_v45, %v8961_v44  ;;  %v6064_v6 = vpop.f32.mrf.mxu0 }
 0x3ca   : > { %v5959_v40 = vpop.f32.mrf.mxu1  ;;  %v9088_v41 = vadd.f32 %v6063_v37, %v3532_v18 }
 0x3cb   : > { %v5960_v51 = vadd.f32 %v5959_v40, %v5958_v32  ;;  %v6065_v46 = vpop.f32.mrf.mxu0 }
 0x3cc   : > { %v6066_v50 = vadd.f32 %v6065_v46, %v6064_v6  ;;  %v5961_v19 = vpop.f32.mrf.mxu1 }
 0x3cd   : > { %v3543_v9 = vadd.f32 %v5960_v51, %v8972_v55  ;;  %v6067_v12 = vpop.f32.mrf.mxu0 }
 0x3ce   : > { %v5962_v17 = vpop.f32.mrf.mxu1  ;;  %v9091_v20 = vadd.f32 %v6066_v50, %v3535_v16 }
 0x3cf   : > { %v5963_v24 = vadd.f32 %v5962_v17, %v5961_v19  ;;  %v6068_v48 = vpop.f32.mrf.mxu0 }
 0x3d0   : > { %v6069_v36 = vadd.f32 %v6068_v48, %v6067_v12  ;;  %v5964_v4 = vpop.f32.mrf.mxu1 }
 0x3d1   : > { %v3548_v44 = vadd.f32 %v5963_v24, %v8977_v59  ;;  %v6070_v33 = vpop.f32.mrf.mxu0 }
 0x3d2   : > { %v5965_v63 = vpop.f32.mrf.mxu1  ;;  %v9094_v10 = vadd.f32 %v6069_v36, %v3540_v21 }
 0x3d3   : > { %v5966_v56 = vadd.f32 %v5965_v63, %v5964_v4  ;;  %v6071_v18 = vpop.f32.mrf.mxu0 }
 0x3d4   : > { %v6072_v3 = vadd.f32 %v6071_v18, %v6070_v33  ;;  %v5967_v31 = vpop.f32.mrf.mxu1 }
 0x3d5   : > { %v3551_v55 = vadd.f32 %v5966_v56, %v8988_v27  ;;  %v6073_v13 = vpop.f32.mrf.mxu0 }
 0x3d6   : > { %v5968_v54 = vpop.f32.mrf.mxu1  ;;  %v9097_v49 = vadd.f32 %v6072_v3, %v3543_v9 }
 0x3d7   : > { %v5969_v1 = vadd.f32 %v5968_v54, %v5967_v31  ;;  %v6074_v16 = vpop.f32.mrf.mxu0 }
 0x3d8   : > { %v6075_v23 = vadd.f32 %v6074_v16, %v6073_v13  ;;  %v5970_v15 = vpop.f32.mrf.mxu1 }
 0x3d9   : > { %v3556_v59 = vadd.f32 %v5969_v1, %v8993_v11  ;;  %v6076_v45 = vpop.f32.mrf.mxu0 }
 0x3da   : > { %v5971_v5 = vpop.f32.mrf.mxu1  ;;  %v9100_v37 = vadd.f32 %v6075_v23, %v3548_v44 }
 0x3db   : > { %v5972_v32 = vadd.f32 %v5971_v5, %v5970_v15  ;;  %v6077_v21 = vpop.f32.mrf.mxu0 }
 0x3dc   : > { %v6078_v6 = vadd.f32 %v6077_v21, %v6076_v45  ;;  %v5973_v40 = vpop.f32.mrf.mxu1 }
 0x3dd   : > { %v3559_v27 = vadd.f32 %v5972_v32, %v9004_v35  ;;  %v6079_v51 = vpop.f32.mrf.mxu0 }
 0x3de   : > { %v5974_v46 = vpop.f32.mrf.mxu1  ;;  %v9103_v50 = vadd.f32 %v6078_v6, %v3551_v55 }
 0x3df   : > { %v5975_v19 = vadd.f32 %v5974_v46, %v5973_v40  ;;  %v6080_v9 = vpop.f32.mrf.mxu0 }
 0x3e0   : > { %v6081_v12 = vadd.f32 %v6080_v9, %v6079_v51  ;;  %v5976_v17 = vpop.f32.mrf.mxu1 }
 0x3e1   : > { %v3564_v11 = vadd.f32 %v5975_v19, %v9009_v62  ;;  %v6082_v24 = vpop.f32.mrf.mxu0 }
 0x3e2   : > { %v5977_v48 = vpop.f32.mrf.mxu1  ;;  %v9106_v36 = vadd.f32 %v6081_v12, %v3556_v59 }
 0x3e3   : > { %v5978_v4 = vadd.f32 %v5977_v48, %v5976_v17  ;;  %v6083_v44 = vpop.f32.mrf.mxu0 }
 0x3e4   : > { %v6084_v33 = vadd.f32 %v6083_v44, %v6082_v24  ;;  %v5979_v63 = vpop.f32.mrf.mxu1 }
 0x3e5   : > { %v3567_v35 = vadd.f32 %v5978_v4, %v9015_v28  ;;  %v6085_v56 = vpop.f32.mrf.mxu0 }
 0x3e6   : > { %v5980_v18 = vpop.f32.mrf.mxu1  ;;  %v9109_v3 = vadd.f32 %v6084_v33, %v3559_v27 }
 0x3e7   : > { %v5981_v31 = vadd.f32 %v5980_v18, %v5979_v63  ;;  %v6086_v55 = vpop.f32.mrf.mxu0 }
 0x3e8   : > { %v6087_v13 = vadd.f32 %v6086_v55, %v6085_v56  ;;  %v5982_v54 = vpop.f32.mrf.mxu1 }
 0x3e9   : > { %v3572_v62 = vadd.f32 %v5981_v31, %v9020_v43  ;;  %v6088_v1 = vpop.f32.mrf.mxu0 }
 0x3ea   : > { %v5983_v16 = vpop.f32.mrf.mxu1  ;;  %v9112_v23 = vadd.f32 %v6087_v13, %v3564_v11 }
 0x3eb   : > { %v5984_v15 = vadd.f32 %v5983_v16, %v5982_v54  ;;  %v6089_v59 = vpop.f32.mrf.mxu0 }
 0x3ec   : > { %v6090_v45 = vadd.f32 %v6089_v59, %v6088_v1  ;;  %v9114_v5 = vpop.f32.mrf.mxu1 }
 0x3ed   : > { %v3575_v28 = vadd.f32 %v5984_v15, %v9023_v30  ;;  %v6091_v32 = vpop.f32.mrf.mxu0 }
 0x3ee   : > { %v9117_v21 = vpop.f32.mrf.mxu1  ;;  %v9119_v6 = vadd.f32 %v6090_v45, %v3567_v35  ;;  %v9140_v35 = vld [vmem:[%s9281_s6] ss:$0 sm:$0xff] }
 0x3ef   : > { %v6092_v40 = vpop.f32.mrf.mxu0 }
 0x3f0   : > { %v6093_v27 = vadd.f32 %v6092_v40, %v6091_v32  ;;  %v9121_v51 = vpop.f32.mrf.mxu1 }
 0x3f1   : > { %v6094_v43 = vpop.f32.mrf.mxu0 }
 0x3f2   : > { %v9123_v46 = vpop.f32.mrf.mxu1  ;;  %v9125_v19 = vadd.f32 %v6093_v27, %v3572_v62 }
 0x3f3   : > { %v6095_v9 = vpop.f32.mrf.mxu0 }
 0x3f4   : > { %v6096_v12 = vadd.f32 %v6095_v9, %v6094_v43  ;;  %v6217_v17 = vpop.f32.mrf.mxu1 }
 0x3f5   : > { %v9127_v11 = vpop.f32.mrf.mxu0  ;;  %v3790_v31 = vadd.f32 %v6217_v17, %v9040_v7 }
 0x3f6   : > { %v3781_v30 = vpop.f32.mrf.mxu1  ;;  %v9129_v24 = vadd.f32 %v6096_v12, %v3575_v28 }
 0x3f7   : > { %v9131_v48 = vpop.f32.mrf.mxu0  ;;  %v3782_v62 = vadd.f32 %v3781_v30, %v9034_v2 }
 0x3f8   : > { %v6218_v4 = vpop.f32.mrf.mxu1 }
 0x3f9   : > { %v9133_v44 = vpop.f32.mrf.mxu0  ;;  %v3793_v45 = vadd.f32 %v6218_v4, %v9043_v25 }
 0x3fa   : > { %v3784_v33 = vpop.f32.mrf.mxu1 }
 0x3fb   : > { %v9135_v63 = vpop.f32.mrf.mxu0  ;;  %v3785_v7 = vadd.f32 %v3784_v33, %v9037_v22 }
 0x3fc   : > { %v6221_v56 = vpop.f32.mrf.mxu1 }
 0x3fd   : > { %v6265_v18 = vpop.f32.mrf.mxu0  ;;  %v3806_v17 = vadd.f32 %v6221_v56, %v9052_v14 }
 0x3fe   : > { %v4038_v55 = vadd.f32 %v6265_v18, %v9140_v35  ;;  %v3797_v13 = vpop.f32.mrf.mxu1 }
 0x3ff   : > { %v4029_v54 = vpop.f32.mrf.mxu0 }
 0x400   : > { %v4158_v1 = vadd.f32 %v4038_v55, %v3790_v31  ;;  %v4030_v16 = vadd.f32 %v9140_v35, %v4029_v54  ;;  %v6222_v15 = vpop.f32.mrf.mxu1  ;;  %v3798_v31 = vadd.f32 %v3797_v13, %v9046_v47 }
 0x401   : > { %v6266_v59 = vpop.f32.mrf.mxu0 }
 0x402   : > { %4190 = vst [vmem:[#allocation2 + $0x10] sm:$0xff] %v4158_v1  ;;  %v4156_v28 = vadd.f32 %v4030_v16, %v3782_v62  ;;  %v4041_v32 = vadd.f32 %v6266_v59, %v9140_v35  ;;  %v3800_v40 = vpop.f32.mrf.mxu1  ;;  %v3809_v62 = vadd.f32 %v6222_v15, %v9055_v52 }
 0x403   : > { %v4032_v27 = vpop.f32.mrf.mxu0  ;;  %v3801_v59 = vadd.f32 %v3800_v40, %v9049_v42 }
 0x404   : > { %4188 = vst [vmem:[#allocation2] sm:$0xff] %v4156_v28  ;;  %v4159_v43 = vadd.f32 %v4041_v32, %v3793_v45  ;;  %v4033_v9 = vadd.f32 %v9140_v35, %v4032_v27  ;;  %v6225_v2 = vpop.f32.mrf.mxu1 }
 0x405   : > { %v6269_v12 = vpop.f32.mrf.mxu0  ;;  %v3822_v32 = vadd.f32 %v6225_v2, %v9064_v29 }
 0x406   : > { %4191 = vst [vmem:[#allocation2 + $0x18] sm:$0xff] %v4159_v43  ;;  %v4157_v30 = vadd.f32 %v4033_v9, %v3785_v7  ;;  %v4054_v25 = vadd.f32 %v6269_v12, %v9140_v35  ;;  %v3813_v4 = vpop.f32.mrf.mxu1 }
 0x407   : > { %v4045_v18 = vpop.f32.mrf.mxu0  ;;  %v3814_v42 = vadd.f32 %v3813_v4, %v9058_v60 }
 0x408   : > { %4189 = vst [vmem:[#allocation2 + $0x8] sm:$0xff] %v4157_v30  ;;  %v4162_v55 = vadd.f32 %v4054_v25, %v3806_v17  ;;  %v4046_v22 = vadd.f32 %v9140_v35, %v4045_v18  ;;  %v6226_v33 = vpop.f32.mrf.mxu1 }
 0x409   : > { %v6270_v54 = vpop.f32.mrf.mxu0  ;;  %v3825_v2 = vadd.f32 %v6226_v33, %v9067_v26 }
 0x40a   : > { %4194 = vst [vmem:[#allocation2 + $0x30] sm:$0xff] %v4162_v55  ;;  %v4160_v1 = vadd.f32 %v4046_v22, %v3798_v31  ;;  %v4057_v14 = vadd.f32 %v6270_v54, %v9140_v35  ;;  %v3816_v56 = vpop.f32.mrf.mxu1 }
 0x40b   : > { %v4048_v16 = vpop.f32.mrf.mxu0  ;;  %v3817_v60 = vadd.f32 %v3816_v56, %v9061_v39 }
 0x40c   : > { %4192 = vst [vmem:[#allocation2 + $0x20] sm:$0xff] %v4160_v1  ;;  %v4163_v45 = vadd.f32 %v4057_v14, %v3809_v62  ;;  %v4049_v47 = vadd.f32 %v9140_v35, %v4048_v16  ;;  %v6229_v13 = vpop.f32.mrf.mxu1 }
 0x40d   : > { %v6273_v28 = vpop.f32.mrf.mxu0  ;;  %v4260_v25 = vld [vmem:[#allocation2 + $0x10] ss:$2 sm:$0xff]  ;;  %v4284_v54 = vld [vmem:[#allocation2 + $0x11] ss:$2 sm:$0xff] }
 0x40e   : > { %4195 = vst [vmem:[#allocation2 + $0x38] sm:$0xff] %v4163_v45  ;;  %v4161_v27 = vadd.f32 %v4049_v47, %v3801_v59  ;;  %v4070_v52 = vadd.f32 %v6273_v28, %v9140_v35  ;;  %v3829_v15 = vpop.f32.mrf.mxu1  ;;  %v3838_v47 = vadd.f32 %v6229_v13, %v9076_v8 }
 0x40f   : > { %v4220_v7 = vld [vmem:[#allocation2] ss:$2 sm:$0xff]  ;;  %v4236_v43 = vld [vmem:[#allocation2 + $0x1] ss:$2 sm:$0xff]  ;;  %v4061_v9 = vpop.f32.mrf.mxu0  ;;  %v3830_v56 = vadd.f32 %v3829_v15, %v9070_v58 }
 0x410   : > { %v4251_v12 = vadd.f32 %v4236_v43, %v4220_v7  ;;  %4193 = vst [vmem:[#allocation2 + $0x28] sm:$0xff] %v4161_v27  ;;  %v4166_v40 = vadd.f32 %v4070_v52, %v3822_v32  ;;  %v4062_v17 = vadd.f32 %v9140_v35, %v4061_v9  ;;  %v6230_v30 = vpop.f32.mrf.mxu1 }
 0x411   : > { %v6274_v18 = vpop.f32.mrf.mxu0 }
 0x412   : > { %v4275_v29 = vadd.f32 %v4260_v25, %v4251_v12  ;;  %4198 = vst [vmem:[#allocation2 + $0x50] sm:$0xff] %v4166_v40  ;;  %v4164_v31 = vadd.f32 %v4062_v17, %v3814_v42  ;;  %v4073_v55 = vadd.f32 %v6274_v18, %v9140_v35  ;;  %v3832_v22 = vpop.f32.mrf.mxu1  ;;  %v3841_v42 = vadd.f32 %v6230_v30, %v9079_v57 }
 0x413   : > { %v4064_v62 = vpop.f32.mrf.mxu0  ;;  %v3833_v58 = vadd.f32 %v3832_v22, %v9073_v34 }
 0x414   : > { %v4299_v1 = vadd.f32 %v4284_v54, %v4275_v29  ;;  %4196 = vst [vmem:[#allocation2 + $0x40] sm:$0xff] %v4164_v31  ;;  %v4167_v4 = vadd.f32 %v4073_v55, %v3825_v2  ;;  %v4065_v14 = vadd.f32 %v9140_v35, %v4064_v62  ;;  %v6233_v16 = vpop.f32.mrf.mxu1 }
 0x415   : > { %v6277_v59 = vpop.f32.mrf.mxu0  ;;  %v4262_v13 = vld [vmem:[#allocation2 + $0x30] ss:$2 sm:$0xff]  ;;  %v4286_v18 = vld [vmem:[#allocation2 + $0x31] ss:$2 sm:$0xff]  ;;  %v3854_v57 = vadd.f32 %v6233_v16, %v9088_v41 }
 0x416   : > { %v4307_v45 = vmul.f32 0.25, %v4299_v1  ;;  %4199 = vst [vmem:[#allocation2 + $0x58] sm:$0xff] %v4167_v4  ;;  %v4165_v26 = vadd.f32 %v4065_v14, %v3817_v60  ;;  %v4086_v33 = vadd.f32 %v6277_v59, %v9140_v35  ;;  %v3845_v28 = vpop.f32.mrf.mxu1 }
 0x417   : > { %v4222_v32 = vld [vmem:[#allocation2 + $0x20] ss:$2 sm:$0xff]  ;;  %v4238_v27 = vld [vmem:[#allocation2 + $0x21] ss:$2 sm:$0xff]  ;;  %v4077_v52 = vpop.f32.mrf.mxu0  ;;  %v3846_v34 = vadd.f32 %v3845_v28, %v9082_v38 }
 0x418   : > { %4315 = vst [vmem:[%s9169_s29] sm:$0xff] %v4307_v45  ;;  %v4252_v39 = vadd.f32 %v4238_v27, %v4222_v32  ;;  %4197 = vst [vmem:[#allocation2 + $0x48] sm:$0xff] %v4165_v26  ;;  %v4170_v7 = vadd.f32 %v4086_v33, %v3838_v47  ;;  %v4078_v43 = vadd.f32 %v9140_v35, %v4077_v52  ;;  %v6234_v8 = vpop.f32.mrf.mxu1 }
 0x419   : > { %v6278_v9 = vpop.f32.mrf.mxu0  ;;  %v3857_v16 = vadd.f32 %v6234_v8, %v9091_v20 }
 0x41a   : > { %v4276_v12 = vadd.f32 %v4262_v13, %v4252_v39  ;;  %4202 = vst [vmem:[#allocation2 + $0x70] sm:$0xff] %v4170_v7  ;;  %v4168_v40 = vadd.f32 %v4078_v43, %v3830_v56  ;;  %v4089_v17 = vadd.f32 %v6278_v9, %v9140_v35  ;;  %v3848_v25 = vpop.f32.mrf.mxu1 }
 0x41b   : > { %v4080_v29 = vpop.f32.mrf.mxu0  ;;  %v3849_v38 = vadd.f32 %v3848_v25, %v9085_v61 }
 0x41c   : > { %v4300_v2 = vadd.f32 %v4286_v18, %v4276_v12  ;;  %4200 = vst [vmem:[#allocation2 + $0x60] sm:$0xff] %v4168_v40  ;;  %v4171_v15 = vadd.f32 %v4089_v17, %v3841_v42  ;;  %v4081_v31 = vadd.f32 %v9140_v35, %v4080_v29  ;;  %v6237_v55 = vpop.f32.mrf.mxu1 }
 0x41d   : > { %v6281_v54 = vpop.f32.mrf.mxu0  ;;  %v4264_v33 = vld [vmem:[#allocation2 + $0x50] ss:$2 sm:$0xff]  ;;  %v4288_v56 = vld [vmem:[#allocation2 + $0x51] ss:$2 sm:$0xff]  ;;  %v3870_v20 = vadd.f32 %v6237_v55, %v9100_v37 }
 0x41e   : > { %v4308_v62 = vmul.f32 0.25, %v4300_v2  ;;  %4203 = vst [vmem:[#allocation2 + $0x78] sm:$0xff] %v4171_v15  ;;  %v4169_v30 = vadd.f32 %v4081_v31, %v3833_v58  ;;  %v4102_v1 = vadd.f32 %v6281_v54, %v9140_v35  ;;  %v3861_v60 = vpop.f32.mrf.mxu1 }
 0x41f   : > { %v4224_v4 = vld [vmem:[#allocation2 + $0x40] ss:$2 sm:$0xff]  ;;  %v4240_v14 = vld [vmem:[#allocation2 + $0x41] ss:$2 sm:$0xff]  ;;  %v4093_v59 = vpop.f32.mrf.mxu0  ;;  %v3862_v61 = vadd.f32 %v3861_v60, %v9094_v10 }
 0x420   : > { %4316 = vst [vmem:[%s9169_s29 + $0x8] sm:$0xff] %v4308_v62  ;;  %v4253_v45 = vadd.f32 %v4240_v14, %v4224_v4  ;;  %4201 = vst [vmem:[#allocation2 + $0x68] sm:$0xff] %v4169_v30  ;;  %v4174_v22 = vadd.f32 %v4102_v1, %v3854_v57  ;;  %v4094_v47 = vadd.f32 %v9140_v35, %v4093_v59  ;;  %v6238_v26 = vpop.f32.mrf.mxu1 }
 0x421   : > { %v6282_v32 = vpop.f32.mrf.mxu0  ;;  %v3873_v55 = vadd.f32 %v6238_v26, %v9103_v50 }
 0x422   : > { %v4277_v41 = vadd.f32 %v4264_v33, %v4253_v45  ;;  %4206 = vst [vmem:[#allocation2 + $0x90] sm:$0xff] %v4174_v22  ;;  %v4172_v27 = vadd.f32 %v4094_v47, %v3846_v34  ;;  %v4105_v52 = vadd.f32 %v6282_v32, %v9140_v35  ;;  %v3864_v39 = vpop.f32.mrf.mxu1  ;;  %v5987_v34 = vadd.f32 %v9117_v21, %v9114_v5 }
 0x423   : > { %v4096_v7 = vpop.f32.mrf.mxu0  ;;  %v3865_v10 = vadd.f32 %v3864_v39, %v9097_v49  ;;  %v6099_v49 = vadd.f32 %v9131_v48, %v9127_v11 }
 0x424   : > { %v4301_v43 = vadd.f32 %v4288_v56, %v4277_v41  ;;  %4204 = vst [vmem:[#allocation2 + $0x80] sm:$0xff] %v4172_v27  ;;  %v4175_v28 = vadd.f32 %v4105_v52, %v3857_v16  ;;  %v4097_v13 = vadd.f32 %v9140_v35, %v4096_v7  ;;  %v6241_v9 = vpop.f32.mrf.mxu1  ;;  %v5990_v56 = vadd.f32 %v9123_v46, %v9121_v51 }
 0x425   : > { %v6285_v12 = vpop.f32.mrf.mxu0  ;;  %v4266_v54 = vld [vmem:[#allocation2 + $0x70] ss:$2 sm:$0xff]  ;;  %v4290_v4 = vld [vmem:[#allocation2 + $0x71] ss:$2 sm:$0xff]  ;;  %v3886_v26 = vadd.f32 %v6241_v9, %v9112_v23  ;;  %v3580_v23 = vadd.f32 %v5987_v34, %v9027_v0 }
 0x426   : > { %v4309_v42 = vmul.f32 0.25, %v4301_v43  ;;  %4207 = vst [vmem:[#allocation2 + $0x98] sm:$0xff] %v4175_v28  ;;  %v4173_v8 = vadd.f32 %v4097_v13, %v3849_v38  ;;  %v4118_v40 = vadd.f32 %v6285_v12, %v9140_v35  ;;  %v3877_v17 = vpop.f32.mrf.mxu1 }
 0x427   : > { %v4226_v18 = vld [vmem:[#allocation2 + $0x60] ss:$2 sm:$0xff]  ;;  %v4242_v29 = vld [vmem:[#allocation2 + $0x61] ss:$2 sm:$0xff]  ;;  %v4109_v2 = vpop.f32.mrf.mxu0  ;;  %v3878_v39 = vadd.f32 %v3877_v17, %v9106_v36  ;;  %v6102_v36 = vadd.f32 %v9135_v63, %v9133_v44  ;;  %v3741_v12 = vadd.f32 %v6099_v49, %v3580_v23 }
 0x428   : > { %4317 = vst [vmem:[%s9169_s29 + $0x10] sm:$0xff] %v4309_v42  ;;  %v4254_v58 = vadd.f32 %v4242_v29, %v4226_v18  ;;  %4205 = vst [vmem:[#allocation2 + $0x88] sm:$0xff] %v4173_v8  ;;  %v4178_v25 = vadd.f32 %v4118_v40, %v3870_v20  ;;  %v4110_v15 = vadd.f32 %v9140_v35, %v4109_v2  ;;  %v6242_v31 = vpop.f32.mrf.mxu1 }
 0x429   : > { %v6286_v62 = vpop.f32.mrf.mxu0  ;;  %v3889_v48 = vadd.f32 %v6242_v31, %v9119_v6  ;;  %v3583_v6 = vadd.f32 %v5990_v56, %v9031_v53 }
 0x42a   : > { %v4278_v37 = vadd.f32 %v4266_v54, %v4254_v58  ;;  %4210 = vst [vmem:[#allocation2 + $0xb0] sm:$0xff] %v4178_v25  ;;  %v4176_v57 = vadd.f32 %v4110_v15, %v3862_v61  ;;  %v4121_v30 = vadd.f32 %v6286_v62, %v9140_v35  ;;  %v3880_v1 = vpop.f32.mrf.mxu1 }
 0x42b   : > { %v4112_v14 = vpop.f32.mrf.mxu0  ;;  %v3881_v20 = vadd.f32 %v3880_v1, %v9109_v3  ;;  %v3744_v58 = vadd.f32 %v6102_v36, %v3583_v6 }
 0x42c   : > { %v4302_v59 = vadd.f32 %v4290_v4, %v4278_v37  ;;  %4208 = vst [vmem:[#allocation2 + $0xa0] sm:$0xff] %v4176_v57  ;;  %v4179_v60 = vadd.f32 %v4121_v30, %v3873_v55  ;;  %v4113_v45 = vadd.f32 %v9140_v35, %v4112_v14  ;;  %v6245_v22 = vpop.f32.mrf.mxu1 }
 0x42d   : > { %v6289_v50 = vpop.f32.mrf.mxu0  ;;  %v4268_v7 = vld [vmem:[#allocation2 + $0x90] ss:$2 sm:$0xff]  ;;  %v4292_v9 = vld [vmem:[#allocation2 + $0x91] ss:$2 sm:$0xff]  ;;  %v3902_v18 = vadd.f32 %v6245_v22, %v3741_v12 }
 0x42e   : > { %v4310_v47 = vmul.f32 0.25, %v4302_v59  ;;  %4211 = vst [vmem:[#allocation2 + $0xb8] sm:$0xff] %v4179_v60  ;;  %v4177_v33 = vadd.f32 %v4113_v45, %v3865_v10  ;;  %v4134_v32 = vadd.f32 %v6289_v50, %v9140_v35  ;;  %v3893_v43 = vpop.f32.mrf.mxu1 }
 0x42f   : > { %v4228_v41 = vld [vmem:[#allocation2 + $0x80] ss:$2 sm:$0xff]  ;;  %v4244_v16 = vld [vmem:[#allocation2 + $0x81] ss:$2 sm:$0xff]  ;;  %v4125_v27 = vpop.f32.mrf.mxu0  ;;  %v3894_v25 = vadd.f32 %v3893_v43, %v9125_v19 }
 0x430   : > { %4318 = vst [vmem:[%s9169_s29 + $0x18] sm:$0xff] %v4310_v47  ;;  %v4255_v52 = vadd.f32 %v4244_v16, %v4228_v41  ;;  %4209 = vst [vmem:[#allocation2 + $0xa8] sm:$0xff] %v4177_v33  ;;  %v4182_v5 = vadd.f32 %v4134_v32, %v3886_v26  ;;  %v4126_v21 = vadd.f32 %v9140_v35, %v4125_v27  ;;  %v6246_v8 = vpop.f32.mrf.mxu1 }
 0x431   : > { %v6290_v38 = vpop.f32.mrf.mxu0  ;;  %v3905_v55 = vadd.f32 %v6246_v8, %v3744_v58 }
 0x432   : > { %v4279_v11 = vadd.f32 %v4268_v7, %v4255_v52  ;;  %4214 = vst [vmem:[#allocation2 + $0xd0] sm:$0xff] %v4182_v5  ;;  %v4180_v28 = vadd.f32 %v4126_v21, %v3878_v39  ;;  %v4137_v13 = vadd.f32 %v6290_v38, %v9140_v35  ;;  %v3896_v54 = vpop.f32.mrf.mxu1 }
 0x433   : > { %v4128_v42 = vpop.f32.mrf.mxu0  ;;  %v3897_v59 = vadd.f32 %v3896_v54, %v9129_v24 }
 0x434   : > { %v4303_v0 = vadd.f32 %v4292_v9, %v4279_v11  ;;  %4212 = vst [vmem:[#allocation2 + $0xc0] sm:$0xff] %v4180_v28  ;;  %v4183_v51 = vadd.f32 %v4137_v13, %v3889_v48  ;;  %v4129_v46 = vadd.f32 %v9140_v35, %v4128_v42 }
 0x435   : > { %v6293_v40 = vpop.f32.mrf.mxu0  ;;  %v4270_v31 = vld [vmem:[#allocation2 + $0xb0] ss:$2 sm:$0xff]  ;;  %v4294_v1 = vld [vmem:[#allocation2 + $0xb1] ss:$2 sm:$0xff] }
 0x436   : > { %v4311_v17 = vmul.f32 0.25, %v4303_v0  ;;  %4215 = vst [vmem:[#allocation2 + $0xd8] sm:$0xff] %v4183_v51  ;;  %v4181_v29 = vadd.f32 %v4129_v46, %v3881_v20  ;;  %v4150_v44 = vadd.f32 %v6293_v40, %v9140_v35 }
 0x437   : > { %v4230_v63 = vld [vmem:[#allocation2 + $0xa0] ss:$2 sm:$0xff]  ;;  %v4246_v2 = vld [vmem:[#allocation2 + $0xa1] ss:$2 sm:$0xff]  ;;  %v4141_v61 = vpop.f32.mrf.mxu0 }
 0x438   : > { %4319 = vst [vmem:[%s9169_s29 + $0x20] sm:$0xff] %v4311_v17  ;;  %v4256_v3 = vadd.f32 %v4246_v2, %v4230_v63  ;;  %4213 = vst [vmem:[#allocation2 + $0xc8] sm:$0xff] %v4181_v29  ;;  %v4186_v15 = vadd.f32 %v4150_v44, %v3902_v18  ;;  %v4142_v53 = vadd.f32 %v9140_v35, %v4141_v61 }
 0x439   : > { %v6294_v62 = vpop.f32.mrf.mxu0 }
 0x43a   : > { %v4280_v37 = vadd.f32 %v4270_v31, %v4256_v3  ;;  %4218 = vst [vmem:[#allocation2 + $0xf0] sm:$0xff] %v4186_v15  ;;  %v4184_v57 = vadd.f32 %v4142_v53, %v3894_v25  ;;  %v4153_v30 = vadd.f32 %v6294_v62, %v9140_v35 }
 0x43b   : > { %v4144_v4 = vpop.f32.mrf.mxu0 }
 0x43c   : > { %v4304_v14 = vadd.f32 %v4294_v1, %v4280_v37  ;;  %4216 = vst [vmem:[#allocation2 + $0xe0] sm:$0xff] %v4184_v57  ;;  %v4187_v19 = vadd.f32 %v4153_v30, %v3905_v55  ;;  %v4145_v10 = vadd.f32 %v9140_v35, %v4144_v4 }
 0x43d   : > { %v4272_v47 = vld [vmem:[#allocation2 + $0xd0] ss:$2 sm:$0xff]  ;;  %v4296_v33 = vld [vmem:[#allocation2 + $0xd1] ss:$2 sm:$0xff] }
 0x43e   : > { %v4312_v60 = vmul.f32 0.25, %v4304_v14  ;;  %4219 = vst [vmem:[#allocation2 + $0xf8] sm:$0xff] %v4187_v19  ;;  %v4185_v45 = vadd.f32 %v4145_v10, %v3897_v59 }
 0x43f   : > { %v4232_v34 = vld [vmem:[#allocation2 + $0xc0] ss:$2 sm:$0xff]  ;;  %v4248_v22 = vld [vmem:[#allocation2 + $0xc1] ss:$2 sm:$0xff] }
 0x440   : > { %4320 = vst [vmem:[%s9169_s29 + $0x28] sm:$0xff] %v4312_v60  ;;  %v4257_v50 = vadd.f32 %v4248_v22, %v4232_v34  ;;  %4217 = vst [vmem:[#allocation2 + $0xe8] sm:$0xff] %v4185_v45 }
 0x442   : > { %v4281_v26 = vadd.f32 %v4272_v47, %v4257_v50 }
 0x444   : > { %v4305_v24 = vadd.f32 %v4296_v33, %v4281_v26 }
 0x445   : > { %v4274_v16 = vld [vmem:[#allocation2 + $0xf0] ss:$2 sm:$0xff]  ;;  %v4298_v52 = vld [vmem:[#allocation2 + $0xf1] ss:$2 sm:$0xff] }
 0x446   : > { %v4313_v32 = vmul.f32 0.25, %v4305_v24 }
 0x447   : > { %v4234_v49 = vld [vmem:[#allocation2 + $0xe0] ss:$2 sm:$0xff]  ;;  %v4250_v35 = vld [vmem:[#allocation2 + $0xe1] ss:$2 sm:$0xff] }
 0x448   : > { %4321 = vst [vmem:[%s9169_s29 + $0x30] sm:$0xff] %v4313_v32  ;;  %v4258_v41 = vadd.f32 %v4250_v35, %v4234_v49 }
 0x44a   : > { %v4282_v27 = vadd.f32 %v4274_v16, %v4258_v41 }
 0x44c   : > { %v4306_v39 = vadd.f32 %v4298_v52, %v4282_v27 }
 0x44e   : > { %v4314_v5 = vmul.f32 0.25, %v4306_v39 }
 0x450   : > { %4322 = vst [vmem:[%s9169_s29 + $0x38] sm:$0xff] %v4314_v5 }
 0x451   : > { %6697 = shalt.err (!%p6694_p9)
}
 0x452   : > { %s6698_s10 = scalar_lea.hbm %s9229_s18, 1024  ;;  %s6702_s21 = scalar_lea.hbm %s9282_s7, 2048 }
 0x453   : > { %p6699_p1 = scmp.ne.s32.totalorder %s9229_s18, %s6698_s10  ;;  %p6703_p11 = scmp.lt.s32.totalorder %s9229_s18, %s9282_s7 }
 0x454   : > { %p6704_p13 = scmp.lt.s32.totalorder %s6702_s21, %s6698_s10 }
 0x455   : > { %p6700_p8 = pnand %p6699_p1, %p9466_p6 }
 0x456   : > { %p6705_p2 = por %p6704_p13, %p6703_p11 }
 0x457   : > { %p6701_p10 = pneg %p6700_p8 }
 0x459   : > { %p6706_p4 = pnand %p6705_p2, %p6701_p10 }
 0x45b   : > { %6709 = shalt.err (!%p6706_p4)
}
 0x45c   : > { %s6769_s22 = smov 128   ;;  %s6770_s1 = smov 8  }
 0x45d   : > { %6325 = dma.vmem_to_hbm [thread:$0]  (%p9466_p6), %s9231_s15, 1024, %s9229_s18, %s4324_s19, %s6769_s22, %s6769_s22, %s6770_s1  }
 0x45e PF: > { %s4352_s30 = sand.u32 1, %s6744_s24   ;;  %p9467_p12 = scmp.ne.s32.totalorder %s9332_s8, 0 }
 0x45f   : > { %p9468_p0 = scmp.ge.s32.totalorder %s6756_s27, 2  ;;  %s4353_s28 = scalar_lea.sflag [#allocation5], %s4352_s30 }
 0x461   : > { %p6342_p5 = pnand %p9468_p0, %p9467_p12 }
 0x463   : > { %p6343_p3 = pneg %p6342_p5 }
 0x465   : > { %6739 = dma.done.wait (%p6343_p3), %s4353_s28, 1024  }
 0x466   : > { %6741 = vsyncadd (%p6343_p3), %s4353_s28, 4294966272  ;;  %p22_p7 = scmp.ge.s32.totalorder %s6891_s14, 4   ;;  %s9469_s24 = smov %s6748_s25 }
 0x467   : > { %s9470_s25 = smov %s6752_s26  ;;  %s9471_s26 = smov %s6901_s17 }
 0x468   : > { %s9472_s27 = smov %s6891_s14  ;;  %24 = sbr.rel (!%p22_p7) target bundleno = 9 (0x9), region = 136 }
 0x46d   :  { %4358 = vsyncpa [#allocation4], 1 }
 0x46e   :  { %4360 = vsyncpa [#allocation4 + $0x1], 1 }
 0x46f   :  { %4361 = vsyncpa [#allocation7], 1 }
 0x470   :  { %4362 = vsyncpa [#allocation10], 1 }
 0x471   :  { %4363 = vsyncpa [#allocation5], 1 }
 0x472   :  { %4365 = vsyncpa [#allocation5 + $0x1], 1 }

</bundles_post_ra>
